<compile_context>
chip_gen: v7x
topology: tpu7x:2x2x1
jax: 0.10.0
libtpu: 0.0.40
codegen_flags: <defaults>
</compile_context>

<pallas_src>
import jax
import jax.numpy as jnp
from jax import lax
from jax.experimental import pallas as pl
from jax.experimental.pallas import tpu as pltpu


# ------------------------------ Pallas kernel ------------------------------ #

def char_lstm_kernel(emb_ref,        # (T*Bp, E)   time-major embedded inputs
                     wih0_ref,       # (E, 4Hp)    layer-0 input weight (gate-padded)
                     whh0_ref,       # (Hp, 4Hp)   layer-0 recurrent weight
                     b0_ref,         # (1, 4Hp)    layer-0 bias (bih + bhh)
                     w1_ref,         # (2Hp, 4Hp)  layer-1 [W_ih; W_hh] stacked
                     b1_ref,         # (1, 4Hp)    layer-1 bias (bih + bhh)
                     fcw_ref,        # (Hp, Vp)    final Linear weight
                     fcb_ref,        # (1, Vp)     final Linear bias
                     out_ref,        # (Bp, Vp)    logits
                     xp_ref):        # VMEM scratch (T*Bp, 4Hp)
    Bp = out_ref.shape[0]
    G = xp_ref.shape[1]              # 4 * Hp
    Hp = G // 4
    T = xp_ref.shape[0] // Bp

    # Phase 1: layer-0 input projection for EVERY time step in one MXU matmul,
    # bias folded in.  Per-step layer-0 work below is only h @ W_hh.
    xp_ref[...] = (
        jnp.dot(emb_ref[...], wih0_ref[...], preferred_element_type=jnp.float32)
        + b0_ref[...])

    # Hoisted bias broadcast (not re-broadcast every loop iteration).
    b1 = jnp.broadcast_to(b1_ref[...], (Bp, G))

    def gate_update(gates, c):
        # PyTorch gate order i, f, g, o; Hp-wide slices are 128-lane aligned.
        i = jax.nn.sigmoid(gates[:, 0 * Hp:1 * Hp])
        f = jax.nn.sigmoid(gates[:, 1 * Hp:2 * Hp])
        g = jnp.tanh(gates[:, 2 * Hp:3 * Hp])
        o = jax.nn.sigmoid(gates[:, 3 * Hp:4 * Hp])
        c_new = f * c + i * g
        h_new = o * jnp.tanh(c_new)
        return h_new, c_new

    def step(t, carry):
        h0, c0, h1, c1 = carry
        # Layer 0: precomputed input projection + recurrent matmul.
        g0 = xp_ref[pl.ds(t * Bp, Bp), :] + jnp.dot(
            h0, whh0_ref[...], preferred_element_type=jnp.float32)
        h0, c0 = gate_update(g0, c0)
        # Layer 1: single fused matmul over concat([h0, h1]).
        g1 = jnp.dot(jnp.concatenate([h0, h1], axis=-1), w1_ref[...],
                     preferred_element_type=jnp.float32) + b1
        h1, c1 = gate_update(g1, c1)
        return h0, c0, h1, c1

    z = jnp.zeros((Bp, Hp), jnp.float32)
    _, _, h1_last, _ = lax.fori_loop(0, T, step, (z, z, z, z), unroll=True)

    # Dropout(0.2) is identity at inference; fc on the last step's hidden state.
    out_ref[...] = (
        jnp.dot(h1_last, fcw_ref[...], preferred_element_type=jnp.float32)
        + fcb_ref[...])


# ----------------------------- wrapper / weight prep ------------------------ #

def _round_up(x, m):
    return (x + m - 1) // m * m


def _pad_gate_rows(w, H, Hp):
    """(4H, K) -> (4Hp, K): zero-pad each gate's output rows independently."""
    K = w.shape[1]
    return jnp.pad(w.reshape(4, H, K),
                   ((0, 0), (0, Hp - H), (0, 0))).reshape(4 * Hp, K)


def _pad_gate_vec(b, H, Hp):
    """(4H,) -> (4Hp,): zero-pad each gate's bias block independently."""
    return jnp.pad(b.reshape(4, H), ((0, 0), (0, Hp - H))).reshape(4 * Hp)


def char_lstm_forward(x_ids, params):
    """x_ids: int32 [B, T]. Returns logits [B, V] (PyTorch CharLSTM.forward, eval)."""
    emb_table = params["embedding"]            # (V, E)
    B, T = x_ids.shape
    V, E = emb_table.shape
    H = params["whh0"].shape[1]                # whh0 is (4H, H)

    LANES, SUBLANES = 128, 8
    Bp = _round_up(B, SUBLANES)                # sublane-aligned batch
    Hp = _round_up(H, LANES)                   # lane-aligned gate blocks
    Vp = _round_up(V, LANES)                   # lane-dense output store

    # Embedding gather directly in time-major order (transpose the tiny id
    # matrix instead of the embedded tensor); pad the batch with token 0.
    ids = jnp.pad(x_ids, ((0, Bp - B), (0, 0)))                        # (Bp, T)
    emb = emb_table[ids.T].astype(jnp.float32)                         # (T, Bp, E)
    emb2d = emb.reshape(T * Bp, E)                                     # (T*Bp, E)

    # Layer 0 weights: gate-padded, pre-transposed for row-major matmuls.
    wih0 = _pad_gate_rows(params["wih0"], H, Hp).T                     # (E, 4Hp)
    whh0 = jnp.pad(_pad_gate_rows(params["whh0"], H, Hp),
                   ((0, 0), (0, Hp - H))).T                            # (Hp, 4Hp)
    b0 = _pad_gate_vec(params["bih0"] + params["bhh0"], H, Hp)[None]   # (1, 4Hp)

    # Layer 1: stack [W_ih; W_hh] into one (2Hp, 4Hp) weight.
    wih1 = jnp.pad(_pad_gate_rows(params["wih1"], H, Hp),
                   ((0, 0), (0, Hp - H)))                              # (4Hp, Hp)
    whh1 = jnp.pad(_pad_gate_rows(params["whh1"], H, Hp),
                   ((0, 0), (0, Hp - H)))                              # (4Hp, Hp)
    w1 = jnp.concatenate([wih1, whh1], axis=1).T                       # (2Hp, 4Hp)
    b1 = _pad_gate_vec(params["bih1"] + params["bhh1"], H, Hp)[None]   # (1, 4Hp)

    # Final Linear.
    fcw = jnp.pad(params["fcw"], ((0, Vp - V), (0, Hp - H))).T         # (Hp, Vp)
    fcb = jnp.pad(params["fcb"], (0, Vp - V))[None]                    # (1, Vp)

    def _const(shape):
        return pl.BlockSpec(shape, lambda i: (0,) * len(shape))

    grid_spec = pltpu.PrefetchScalarGridSpec(
        num_scalar_prefetch=0,
        grid=(1,),                              # whole problem in one kernel call
        in_specs=[
            _const((T * Bp, E)),
            _const((E, 4 * Hp)),
            _const((Hp, 4 * Hp)),
            _const((1, 4 * Hp)),
            _const((2 * Hp, 4 * Hp)),
            _const((1, 4 * Hp)),
            _const((Hp, Vp)),
            _const((1, Vp)),
        ],
        out_specs=pl.BlockSpec((Bp, Vp), lambda i: (0, 0)),
        scratch_shapes=[pltpu.VMEM((T * Bp, 4 * Hp), jnp.float32)],
    )

    out = pl.pallas_call(
        char_lstm_kernel,
        out_shape=jax.ShapeDtypeStruct((Bp, Vp), jnp.float32),
        grid_spec=grid_spec,
        compiler_params=pltpu.CompilerParams(
            dimension_semantics=("arbitrary",)),
    )(emb2d, wih0, whh0, b0, w1, b1, fcw, fcb)

    return out[:B, :V]


# ----------------------------- pure-JAX reference --------------------------- #

def char_lstm_reference(x_ids, params):
    emb = params["embedding"][x_ids]           # (B, T, E)
    B, T, E = emb.shape
    H = params["whh0"].shape[1]                # whh0 is (4H, H)

    def cell(x_t, h, c, wih, whh, bih, bhh):
        gates = x_t @ wih.T + h @ whh.T + bih + bhh
        i = jax.nn.sigmoid(gates[:, 0 * H:1 * H])
        f = jax.nn.sigmoid(gates[:, 1 * H:2 * H])
        g = jnp.tanh(gates[:, 2 * H:3 * H])
        o = jax.nn.sigmoid(gates[:, 3 * H:4 * H])
        c_new = f * c + i * g
        h_new = o * jnp.tanh(c_new)
        return h_new, c_new

    def step(carry, x_t):
        h0, c0, h1, c1 = carry
        h0, c0 = cell(x_t, h0, c0, params["wih0"], params["whh0"],
                      params["bih0"], params["bhh0"])
        h1, c1 = cell(h0, h1, c1, params["wih1"], params["whh1"],
                      params["bih1"], params["bhh1"])
        return (h0, c0, h1, c1), None

    z = jnp.zeros((B, H), jnp.float32)
    (_, _, h1, _), _ = lax.scan(step, (z, z, z, z), jnp.transpose(emb, (1, 0, 2)))
    return h1 @ params["fcw"].T + params["fcb"]


# ----------------------------------- main ----------------------------------- #

if __name__ == "__main__":
    # Small shapes consistent with the module (scaled down from 128/256 defaults).
    B, T = 2, 8
    vocab_size, embedding_dim, hidden_size = 32, 32, 32

    key = jax.random.PRNGKey(0)
    ks = jax.random.split(key, 12)
    s = 0.1
    params = {
        "embedding": jax.random.normal(ks[0], (vocab_size, embedding_dim), jnp.float32) * s,
        "wih0": jax.random.normal(ks[1], (4 * hidden_size, embedding_dim), jnp.float32) * s,
        "whh0": jax.random.normal(ks[2], (4 * hidden_size, hidden_size), jnp.float32) * s,
        "bih0": jax.random.normal(ks[3], (4 * hidden_size,), jnp.float32) * s,
        "bhh0": jax.random.normal(ks[4], (4 * hidden_size,), jnp.float32) * s,
        "wih1": jax.random.normal(ks[5], (4 * hidden_size, hidden_size), jnp.float32) * s,
        "whh1": jax.random.normal(ks[6], (4 * hidden_size, hidden_size), jnp.float32) * s,
        "bih1": jax.random.normal(ks[7], (4 * hidden_size,), jnp.float32) * s,
        "bhh1": jax.random.normal(ks[8], (4 * hidden_size,), jnp.float32) * s,
        "fcw": jax.random.normal(ks[9], (vocab_size, hidden_size), jnp.float32) * s,
        "fcb": jax.random.normal(ks[10], (vocab_size,), jnp.float32) * s,
    }

    x_ids = jax.random.randint(ks[11], (B, T), 0, vocab_size, dtype=jnp.int32)

    out = jax.block_until_ready(char_lstm_forward(x_ids, params))
    ref = jax.block_until_ready(char_lstm_reference(x_ids, params))

    assert out.shape == (B, vocab_size)
    assert jnp.allclose(out, ref, atol=1e-5, rtol=1e-5), "mismatch vs reference"

    print("KERNEL_OK")
</pallas_src>

<mosaic_0001>
module attributes {stable_mosaic.version = 11 : i64} {
  func.func @char_lstm_kernel(%arg0: i32, %arg1: memref<64x32xf32, #tpu.memory_space<vmem>>, %arg2: memref<32x512xf32, #tpu.memory_space<vmem>>, %arg3: memref<128x512xf32, #tpu.memory_space<vmem>>, %arg4: memref<1x512xf32, #tpu.memory_space<vmem>>, %arg5: memref<256x512xf32, #tpu.memory_space<vmem>>, %arg6: memref<1x512xf32, #tpu.memory_space<vmem>>, %arg7: memref<128x128xf32, #tpu.memory_space<vmem>>, %arg8: memref<1x128xf32, #tpu.memory_space<vmem>>, %arg9: memref<8x128xf32, #tpu.memory_space<vmem>>, %arg10: memref<64x512xf32, #tpu.memory_space<vmem>>) attributes {dimension_semantics = [#tpu.dimension_semantics<arbitrary>], iteration_bounds = array<i64: 1>, scalar_prefetch = 0 : i64, scratch_operands = 1 : i64, tpu.core_type = #tpu.core_type<tc>, window_params = [{pipeline_mode = #tpu.pipeline_mode<synchronous>, transform_indices = @transform_0, window_bounds = array<i64: 64, 32>}, {pipeline_mode = #tpu.pipeline_mode<synchronous>, transform_indices = @transform_1, window_bounds = array<i64: 32, 512>}, {pipeline_mode = #tpu.pipeline_mode<synchronous>, transform_indices = @transform_2, window_bounds = array<i64: 128, 512>}, {pipeline_mode = #tpu.pipeline_mode<synchronous>, transform_indices = @transform_3, window_bounds = array<i64: 1, 512>}, {pipeline_mode = #tpu.pipeline_mode<synchronous>, transform_indices = @transform_4, window_bounds = array<i64: 256, 512>}, {pipeline_mode = #tpu.pipeline_mode<synchronous>, transform_indices = @transform_5, window_bounds = array<i64: 1, 512>}, {pipeline_mode = #tpu.pipeline_mode<synchronous>, transform_indices = @transform_6, window_bounds = array<i64: 128, 128>}, {pipeline_mode = #tpu.pipeline_mode<synchronous>, transform_indices = @transform_7, window_bounds = array<i64: 1, 128>}, {pipeline_mode = #tpu.pipeline_mode<synchronous>, transform_indices = @transform_8, window_bounds = array<i64: 8, 128>}]} {
    %c0 = arith.constant 0 : index
    %c0_0 = arith.constant 0 : index
    %0 = vector.load %arg1[%c0, %c0_0] : memref<64x32xf32, #tpu.memory_space<vmem>>, vector<64x32xf32>
    %c0_1 = arith.constant 0 : index
    %c0_2 = arith.constant 0 : index
    %1 = vector.load %arg2[%c0_1, %c0_2] : memref<32x512xf32, #tpu.memory_space<vmem>>, vector<32x512xf32>
    %cst = arith.constant dense<0.000000e+00> : vector<64x512xf32>
    %2 = tpu.matmul %0, %1, %cst {dimension_numbers = #tpu.dot_dimension_numbers<[1], [0], [0], [1], [0, 0, 1, 1], [], []>} : vector<64x32xf32>, vector<32x512xf32>, vector<64x512xf32> -> vector<64x512xf32>
    %c0_3 = arith.constant 0 : index
    %c0_4 = arith.constant 0 : index
    %3 = vector.load %arg4[%c0_3, %c0_4] : memref<1x512xf32, #tpu.memory_space<vmem>>, vector<1x512xf32>
    %4 = vector.broadcast %3 : vector<1x512xf32> to vector<64x512xf32>
    %5 = arith.addf %2, %4 : vector<64x512xf32>
    %c0_5 = arith.constant 0 : index
    %c0_6 = arith.constant 0 : index
    %6 = vector.load %arg10[%c0_5, %c0_6] : memref<64x512xf32, #tpu.memory_space<vmem>>, vector<64x512xf32>
    tpu.vector_store %arg10[%c0_5, %c0_6], %5 {strides = array<i32>} : memref<64x512xf32, #tpu.memory_space<vmem>>, vector<64x512xf32>,
    %c0_7 = arith.constant 0 : index
    %c0_8 = arith.constant 0 : index
    %7 = vector.load %arg6[%c0_7, %c0_8] : memref<1x512xf32, #tpu.memory_space<vmem>>, vector<1x512xf32>
    %8 = vector.shape_cast %7 : vector<1x512xf32> to vector<1x512xf32>
    %9 = vector.broadcast %8 : vector<1x512xf32> to vector<8x512xf32>
    %cst_9 = arith.constant 0.000000e+00 : f32
    %10 = vector.broadcast %cst_9 : f32 to vector<8x128xf32>
    %c0_i32 = arith.constant 0 : i32
    %c8_i32 = arith.constant 8 : i32
    %11 = arith.muli %c0_i32, %c8_i32 : i32
    %12 = arith.index_cast %11 : i32 to index
    %c0_10 = arith.constant 0 : index
    %13 = vector.load %arg10[%12, %c0_10] : memref<64x512xf32, #tpu.memory_space<vmem>>, vector<8x512xf32>
    %c0_11 = arith.constant 0 : index
    %c0_12 = arith.constant 0 : index
    %14 = vector.load %arg3[%c0_11, %c0_12] : memref<128x512xf32, #tpu.memory_space<vmem>>, vector<128x512xf32>
    %cst_13 = arith.constant dense<0.000000e+00> : vector<8x512xf32>
    %15 = tpu.matmul %10, %14, %cst_13 {dimension_numbers = #tpu.dot_dimension_numbers<[1], [0], [0], [1], [0, 0, 1, 1], [], []>} : vector<8x128xf32>, vector<128x512xf32>, vector<8x512xf32> -> vector<8x512xf32>
    %16 = arith.addf %13, %15 : vector<8x512xf32>
    %17 = vector.extract_strided_slice %16 {offsets = [0, 0], sizes = [8, 128], strides = [1, 1]} : vector<8x512xf32> to vector<8x128xf32>
    %18 = arith.negf %17 : vector<8x128xf32>
    %19 = math.exp %18 : vector<8x128xf32>
    %cst_14 = arith.constant 1.000000e+00 : f32
    %20 = vector.broadcast %cst_14 : f32 to vector<8x128xf32>
    %21 = arith.addf %20, %19 : vector<8x128xf32>
    %22 = arith.divf %20, %21 : vector<8x128xf32>
    %23 = vector.extract_strided_slice %16 {offsets = [0, 128], sizes = [8, 128], strides = [1, 1]} : vector<8x512xf32> to vector<8x128xf32>
    %24 = arith.negf %23 : vector<8x128xf32>
    %25 = math.exp %24 : vector<8x128xf32>
    %cst_15 = arith.constant 1.000000e+00 : f32
    %26 = vector.broadcast %cst_15 : f32 to vector<8x128xf32>
    %27 = arith.addf %26, %25 : vector<8x128xf32>
    %28 = arith.divf %26, %27 : vector<8x128xf32>
    %29 = vector.extract_strided_slice %16 {offsets = [0, 256], sizes = [8, 128], strides = [1, 1]} : vector<8x512xf32> to vector<8x128xf32>
    %30 = math.tanh %29 : vector<8x128xf32>
    %31 = vector.extract_strided_slice %16 {offsets = [0, 384], sizes = [8, 128], strides = [1, 1]} : vector<8x512xf32> to vector<8x128xf32>
    %32 = arith.negf %31 : vector<8x128xf32>
    %33 = math.exp %32 : vector<8x128xf32>
    %cst_16 = arith.constant 1.000000e+00 : f32
    %34 = vector.broadcast %cst_16 : f32 to vector<8x128xf32>
    %35 = arith.addf %34, %33 : vector<8x128xf32>
    %36 = arith.divf %34, %35 : vector<8x128xf32>
    %37 = arith.mulf %28, %10 : vector<8x128xf32>
    %38 = arith.mulf %22, %30 : vector<8x128xf32>
    %39 = arith.addf %37, %38 : vector<8x128xf32>
    %40 = math.tanh %39 : vector<8x128xf32>
    %41 = arith.mulf %36, %40 : vector<8x128xf32>
    %42 = tpu.concatenate %41, %10 in 1 : vector<8x128xf32>, vector<8x128xf32> -> vector<8x256xf32>
    %c0_17 = arith.constant 0 : index
    %c0_18 = arith.constant 0 : index
    %43 = vector.load %arg5[%c0_17, %c0_18] : memref<256x512xf32, #tpu.memory_space<vmem>>, vector<256x512xf32>
    %cst_19 = arith.constant dense<0.000000e+00> : vector<8x512xf32>
    %44 = tpu.matmul %42, %43, %cst_19 {dimension_numbers = #tpu.dot_dimension_numbers<[1], [0], [0], [1], [0, 0, 1, 1], [], []>} : vector<8x256xf32>, vector<256x512xf32>, vector<8x512xf32> -> vector<8x512xf32>
    %45 = arith.addf %44, %9 : vector<8x512xf32>
    %46 = vector.extract_strided_slice %45 {offsets = [0, 0], sizes = [8, 128], strides = [1, 1]} : vector<8x512xf32> to vector<8x128xf32>
    %47 = arith.negf %46 : vector<8x128xf32>
    %48 = math.exp %47 : vector<8x128xf32>
    %cst_20 = arith.constant 1.000000e+00 : f32
    %49 = vector.broadcast %cst_20 : f32 to vector<8x128xf32>
    %50 = arith.addf %49, %48 : vector<8x128xf32>
    %51 = arith.divf %49, %50 : vector<8x128xf32>
    %52 = vector.extract_strided_slice %45 {offsets = [0, 128], sizes = [8, 128], strides = [1, 1]} : vector<8x512xf32> to vector<8x128xf32>
    %53 = arith.negf %52 : vector<8x128xf32>
    %54 = math.exp %53 : vector<8x128xf32>
    %cst_21 = arith.constant 1.000000e+00 : f32
    %55 = vector.broadcast %cst_21 : f32 to vector<8x128xf32>
    %56 = arith.addf %55, %54 : vector<8x128xf32>
    %57 = arith.divf %55, %56 : vector<8x128xf32>
    %58 = vector.extract_strided_slice %45 {offsets = [0, 256], sizes = [8, 128], strides = [1, 1]} : vector<8x512xf32> to vector<8x128xf32>
    %59 = math.tanh %58 : vector<8x128xf32>
    %60 = vector.extract_strided_slice %45 {offsets = [0, 384], sizes = [8, 128], strides = [1, 1]} : vector<8x512xf32> to vector<8x128xf32>
    %61 = arith.negf %60 : vector<8x128xf32>
    %62 = math.exp %61 : vector<8x128xf32>
    %cst_22 = arith.constant 1.000000e+00 : f32
    %63 = vector.broadcast %cst_22 : f32 to vector<8x128xf32>
    %64 = arith.addf %63, %62 : vector<8x128xf32>
    %65 = arith.divf %63, %64 : vector<8x128xf32>
    %66 = arith.mulf %57, %10 : vector<8x128xf32>
    %67 = arith.mulf %51, %59 : vector<8x128xf32>
    %68 = arith.addf %66, %67 : vector<8x128xf32>
    %69 = math.tanh %68 : vector<8x128xf32>
    %70 = arith.mulf %65, %69 : vector<8x128xf32>
    %c1_i32 = arith.constant 1 : i32
    %c8_i32_23 = arith.constant 8 : i32
    %71 = arith.muli %c1_i32, %c8_i32_23 : i32
    %72 = arith.index_cast %71 : i32 to index
    %c0_24 = arith.constant 0 : index
    %73 = vector.load %arg10[%72, %c0_24] : memref<64x512xf32, #tpu.memory_space<vmem>>, vector<8x512xf32>
    %c0_25 = arith.constant 0 : index
    %c0_26 = arith.constant 0 : index
    %74 = vector.load %arg3[%c0_25, %c0_26] : memref<128x512xf32, #tpu.memory_space<vmem>>, vector<128x512xf32>
    %cst_27 = arith.constant dense<0.000000e+00> : vector<8x512xf32>
    %75 = tpu.matmul %41, %74, %cst_27 {dimension_numbers = #tpu.dot_dimension_numbers<[1], [0], [0], [1], [0, 0, 1, 1], [], []>} : vector<8x128xf32>, vector<128x512xf32>, vector<8x512xf32> -> vector<8x512xf32>
    %76 = arith.addf %73, %75 : vector<8x512xf32>
    %77 = vector.extract_strided_slice %76 {offsets = [0, 0], sizes = [8, 128], strides = [1, 1]} : vector<8x512xf32> to vector<8x128xf32>
    %78 = arith.negf %77 : vector<8x128xf32>
    %79 = math.exp %78 : vector<8x128xf32>
    %cst_28 = arith.constant 1.000000e+00 : f32
    %80 = vector.broadcast %cst_28 : f32 to vector<8x128xf32>
    %81 = arith.addf %80, %79 : vector<8x128xf32>
    %82 = arith.divf %80, %81 : vector<8x128xf32>
    %83 = vector.extract_strided_slice %76 {offsets = [0, 128], sizes = [8, 128], strides = [1, 1]} : vector<8x512xf32> to vector<8x128xf32>
    %84 = arith.negf %83 : vector<8x128xf32>
    %85 = math.exp %84 : vector<8x128xf32>
    %cst_29 = arith.constant 1.000000e+00 : f32
    %86 = vector.broadcast %cst_29 : f32 to vector<8x128xf32>
    %87 = arith.addf %86, %85 : vector<8x128xf32>
    %88 = arith.divf %86, %87 : vector<8x128xf32>
    %89 = vector.extract_strided_slice %76 {offsets = [0, 256], sizes = [8, 128], strides = [1, 1]} : vector<8x512xf32> to vector<8x128xf32>
    %90 = math.tanh %89 : vector<8x128xf32>
    %91 = vector.extract_strided_slice %76 {offsets = [0, 384], sizes = [8, 128], strides = [1, 1]} : vector<8x512xf32> to vector<8x128xf32>
    %92 = arith.negf %91 : vector<8x128xf32>
    %93 = math.exp %92 : vector<8x128xf32>
    %cst_30 = arith.constant 1.000000e+00 : f32
    %94 = vector.broadcast %cst_30 : f32 to vector<8x128xf32>
    %95 = arith.addf %94, %93 : vector<8x128xf32>
    %96 = arith.divf %94, %95 : vector<8x128xf32>
    %97 = arith.mulf %88, %39 : vector<8x128xf32>
    %98 = arith.mulf %82, %90 : vector<8x128xf32>
    %99 = arith.addf %97, %98 : vector<8x128xf32>
    %100 = math.tanh %99 : vector<8x128xf32>
    %101 = arith.mulf %96, %100 : vector<8x128xf32>
    %102 = tpu.concatenate %101, %70 in 1 : vector<8x128xf32>, vector<8x128xf32> -> vector<8x256xf32>
    %c0_31 = arith.constant 0 : index
    %c0_32 = arith.constant 0 : index
    %103 = vector.load %arg5[%c0_31, %c0_32] : memref<256x512xf32, #tpu.memory_space<vmem>>, vector<256x512xf32>
    %cst_33 = arith.constant dense<0.000000e+00> : vector<8x512xf32>
    %104 = tpu.matmul %102, %103, %cst_33 {dimension_numbers = #tpu.dot_dimension_numbers<[1], [0], [0], [1], [0, 0, 1, 1], [], []>} : vector<8x256xf32>, vector<256x512xf32>, vector<8x512xf32> -> vector<8x512xf32>
    %105 = arith.addf %104, %9 : vector<8x512xf32>
    %106 = vector.extract_strided_slice %105 {offsets = [0, 0], sizes = [8, 128], strides = [1, 1]} : vector<8x512xf32> to vector<8x128xf32>
    %107 = arith.negf %106 : vector<8x128xf32>
    %108 = math.exp %107 : vector<8x128xf32>
    %cst_34 = arith.constant 1.000000e+00 : f32
    %109 = vector.broadcast %cst_34 : f32 to vector<8x128xf32>
    %110 = arith.addf %109, %108 : vector<8x128xf32>
    %111 = arith.divf %109, %110 : vector<8x128xf32>
    %112 = vector.extract_strided_slice %105 {offsets = [0, 128], sizes = [8, 128], strides = [1, 1]} : vector<8x512xf32> to vector<8x128xf32>
    %113 = arith.negf %112 : vector<8x128xf32>
    %114 = math.exp %113 : vector<8x128xf32>
    %cst_35 = arith.constant 1.000000e+00 : f32
    %115 = vector.broadcast %cst_35 : f32 to vector<8x128xf32>
    %116 = arith.addf %115, %114 : vector<8x128xf32>
    %117 = arith.divf %115, %116 : vector<8x128xf32>
    %118 = vector.extract_strided_slice %105 {offsets = [0, 256], sizes = [8, 128], strides = [1, 1]} : vector<8x512xf32> to vector<8x128xf32>
    %119 = math.tanh %118 : vector<8x128xf32>
    %120 = vector.extract_strided_slice %105 {offsets = [0, 384], sizes = [8, 128], strides = [1, 1]} : vector<8x512xf32> to vector<8x128xf32>
    %121 = arith.negf %120 : vector<8x128xf32>
    %122 = math.exp %121 : vector<8x128xf32>
    %cst_36 = arith.constant 1.000000e+00 : f32
    %123 = vector.broadcast %cst_36 : f32 to vector<8x128xf32>
    %124 = arith.addf %123, %122 : vector<8x128xf32>
    %125 = arith.divf %123, %124 : vector<8x128xf32>
    %126 = arith.mulf %117, %68 : vector<8x128xf32>
    %127 = arith.mulf %111, %119 : vector<8x128xf32>
    %128 = arith.addf %126, %127 : vector<8x128xf32>
    %129 = math.tanh %128 : vector<8x128xf32>
    %130 = arith.mulf %125, %129 : vector<8x128xf32>
    %c2_i32 = arith.constant 2 : i32
    %c8_i32_37 = arith.constant 8 : i32
    %131 = arith.muli %c2_i32, %c8_i32_37 : i32
    %132 = arith.index_cast %131 : i32 to index
    %c0_38 = arith.constant 0 : index
    %133 = vector.load %arg10[%132, %c0_38] : memref<64x512xf32, #tpu.memory_space<vmem>>, vector<8x512xf32>
    %c0_39 = arith.constant 0 : index
    %c0_40 = arith.constant 0 : index
    %134 = vector.load %arg3[%c0_39, %c0_40] : memref<128x512xf32, #tpu.memory_space<vmem>>, vector<128x512xf32>
    %cst_41 = arith.constant dense<0.000000e+00> : vector<8x512xf32>
    %135 = tpu.matmul %101, %134, %cst_41 {dimension_numbers = #tpu.dot_dimension_numbers<[1], [0], [0], [1], [0, 0, 1, 1], [], []>} : vector<8x128xf32>, vector<128x512xf32>, vector<8x512xf32> -> vector<8x512xf32>
    %136 = arith.addf %133, %135 : vector<8x512xf32>
    %137 = vector.extract_strided_slice %136 {offsets = [0, 0], sizes = [8, 128], strides = [1, 1]} : vector<8x512xf32> to vector<8x128xf32>
    %138 = arith.negf %137 : vector<8x128xf32>
    %139 = math.exp %138 : vector<8x128xf32>
    %cst_42 = arith.constant 1.000000e+00 : f32
    %140 = vector.broadcast %cst_42 : f32 to vector<8x128xf32>
    %141 = arith.addf %140, %139 : vector<8x128xf32>
    %142 = arith.divf %140, %141 : vector<8x128xf32>
    %143 = vector.extract_strided_slice %136 {offsets = [0, 128], sizes = [8, 128], strides = [1, 1]} : vector<8x512xf32> to vector<8x128xf32>
    %144 = arith.negf %143 : vector<8x128xf32>
    %145 = math.exp %144 : vector<8x128xf32>
    %cst_43 = arith.constant 1.000000e+00 : f32
    %146 = vector.broadcast %cst_43 : f32 to vector<8x128xf32>
    %147 = arith.addf %146, %145 : vector<8x128xf32>
    %148 = arith.divf %146, %147 : vector<8x128xf32>
    %149 = vector.extract_strided_slice %136 {offsets = [0, 256], sizes = [8, 128], strides = [1, 1]} : vector<8x512xf32> to vector<8x128xf32>
    %150 = math.tanh %149 : vector<8x128xf32>
    %151 = vector.extract_strided_slice %136 {offsets = [0, 384], sizes = [8, 128], strides = [1, 1]} : vector<8x512xf32> to vector<8x128xf32>
    %152 = arith.negf %151 : vector<8x128xf32>
    %153 = math.exp %152 : vector<8x128xf32>
    %cst_44 = arith.constant 1.000000e+00 : f32
    %154 = vector.broadcast %cst_44 : f32 to vector<8x128xf32>
    %155 = arith.addf %154, %153 : vector<8x128xf32>
    %156 = arith.divf %154, %155 : vector<8x128xf32>
    %157 = arith.mulf %148, %99 : vector<8x128xf32>
    %158 = arith.mulf %142, %150 : vector<8x128xf32>
    %159 = arith.addf %157, %158 : vector<8x128xf32>
    %160 = math.tanh %159 : vector<8x128xf32>
    %161 = arith.mulf %156, %160 : vector<8x128xf32>
    %162 = tpu.concatenate %161, %130 in 1 : vector<8x128xf32>, vector<8x128xf32> -> vector<8x256xf32>
    %c0_45 = arith.constant 0 : index
    %c0_46 = arith.constant 0 : index
    %163 = vector.load %arg5[%c0_45, %c0_46] : memref<256x512xf32, #tpu.memory_space<vmem>>, vector<256x512xf32>
    %cst_47 = arith.constant dense<0.000000e+00> : vector<8x512xf32>
    %164 = tpu.matmul %162, %163, %cst_47 {dimension_numbers = #tpu.dot_dimension_numbers<[1], [0], [0], [1], [0, 0, 1, 1], [], []>} : vector<8x256xf32>, vector<256x512xf32>, vector<8x512xf32> -> vector<8x512xf32>
    %165 = arith.addf %164, %9 : vector<8x512xf32>
    %166 = vector.extract_strided_slice %165 {offsets = [0, 0], sizes = [8, 128], strides = [1, 1]} : vector<8x512xf32> to vector<8x128xf32>
    %167 = arith.negf %166 : vector<8x128xf32>
    %168 = math.exp %167 : vector<8x128xf32>
    %cst_48 = arith.constant 1.000000e+00 : f32
    %169 = vector.broadcast %cst_48 : f32 to vector<8x128xf32>
    %170 = arith.addf %169, %168 : vector<8x128xf32>
    %171 = arith.divf %169, %170 : vector<8x128xf32>
    %172 = vector.extract_strided_slice %165 {offsets = [0, 128], sizes = [8, 128], strides = [1, 1]} : vector<8x512xf32> to vector<8x128xf32>
    %173 = arith.negf %172 : vector<8x128xf32>
    %174 = math.exp %173 : vector<8x128xf32>
    %cst_49 = arith.constant 1.000000e+00 : f32
    %175 = vector.broadcast %cst_49 : f32 to vector<8x128xf32>
    %176 = arith.addf %175, %174 : vector<8x128xf32>
    %177 = arith.divf %175, %176 : vector<8x128xf32>
    %178 = vector.extract_strided_slice %165 {offsets = [0, 256], sizes = [8, 128], strides = [1, 1]} : vector<8x512xf32> to vector<8x128xf32>
    %179 = math.tanh %178 : vector<8x128xf32>
    %180 = vector.extract_strided_slice %165 {offsets = [0, 384], sizes = [8, 128], strides = [1, 1]} : vector<8x512xf32> to vector<8x128xf32>
    %181 = arith.negf %180 : vector<8x128xf32>
    %182 = math.exp %181 : vector<8x128xf32>
    %cst_50 = arith.constant 1.000000e+00 : f32
    %183 = vector.broadcast %cst_50 : f32 to vector<8x128xf32>
    %184 = arith.addf %183, %182 : vector<8x128xf32>
    %185 = arith.divf %183, %184 : vector<8x128xf32>
    %186 = arith.mulf %177, %128 : vector<8x128xf32>
    %187 = arith.mulf %171, %179 : vector<8x128xf32>
    %188 = arith.addf %186, %187 : vector<8x128xf32>
    %189 = math.tanh %188 : vector<8x128xf32>
    %190 = arith.mulf %185, %189 : vector<8x128xf32>
    %c3_i32 = arith.constant 3 : i32
    %c8_i32_51 = arith.constant 8 : i32
    %191 = arith.muli %c3_i32, %c8_i32_51 : i32
    %192 = arith.index_cast %191 : i32 to index
    %c0_52 = arith.constant 0 : index
    %193 = vector.load %arg10[%192, %c0_52] : memref<64x512xf32, #tpu.memory_space<vmem>>, vector<8x512xf32>
    %c0_53 = arith.constant 0 : index
    %c0_54 = arith.constant 0 : index
    %194 = vector.load %arg3[%c0_53, %c0_54] : memref<128x512xf32, #tpu.memory_space<vmem>>, vector<128x512xf32>
    %cst_55 = arith.constant dense<0.000000e+00> : vector<8x512xf32>
    %195 = tpu.matmul %161, %194, %cst_55 {dimension_numbers = #tpu.dot_dimension_numbers<[1], [0], [0], [1], [0, 0, 1, 1], [], []>} : vector<8x128xf32>, vector<128x512xf32>, vector<8x512xf32> -> vector<8x512xf32>
    %196 = arith.addf %193, %195 : vector<8x512xf32>
    %197 = vector.extract_strided_slice %196 {offsets = [0, 0], sizes = [8, 128], strides = [1, 1]} : vector<8x512xf32> to vector<8x128xf32>
    %198 = arith.negf %197 : vector<8x128xf32>
    %199 = math.exp %198 : vector<8x128xf32>
    %cst_56 = arith.constant 1.000000e+00 : f32
    %200 = vector.broadcast %cst_56 : f32 to vector<8x128xf32>
    %201 = arith.addf %200, %199 : vector<8x128xf32>
    %202 = arith.divf %200, %201 : vector<8x128xf32>
    %203 = vector.extract_strided_slice %196 {offsets = [0, 128], sizes = [8, 128], strides = [1, 1]} : vector<8x512xf32> to vector<8x128xf32>
    %204 = arith.negf %203 : vector<8x128xf32>
    %205 = math.exp %204 : vector<8x128xf32>
    %cst_57 = arith.constant 1.000000e+00 : f32
    %206 = vector.broadcast %cst_57 : f32 to vector<8x128xf32>
    %207 = arith.addf %206, %205 : vector<8x128xf32>
    %208 = arith.divf %206, %207 : vector<8x128xf32>
    %209 = vector.extract_strided_slice %196 {offsets = [0, 256], sizes = [8, 128], strides = [1, 1]} : vector<8x512xf32> to vector<8x128xf32>
    %210 = math.tanh %209 : vector<8x128xf32>
    %211 = vector.extract_strided_slice %196 {offsets = [0, 384], sizes = [8, 128], strides = [1, 1]} : vector<8x512xf32> to vector<8x128xf32>
    %212 = arith.negf %211 : vector<8x128xf32>
    %213 = math.exp %212 : vector<8x128xf32>
    %cst_58 = arith.constant 1.000000e+00 : f32
    %214 = vector.broadcast %cst_58 : f32 to vector<8x128xf32>
    %215 = arith.addf %214, %213 : vector<8x128xf32>
    %216 = arith.divf %214, %215 : vector<8x128xf32>
    %217 = arith.mulf %208, %159 : vector<8x128xf32>
    %218 = arith.mulf %202, %210 : vector<8x128xf32>
    %219 = arith.addf %217, %218 : vector<8x128xf32>
    %220 = math.tanh %219 : vector<8x128xf32>
    %221 = arith.mulf %216, %220 : vector<8x128xf32>
    %222 = tpu.concatenate %221, %190 in 1 : vector<8x128xf32>, vector<8x128xf32> -> vector<8x256xf32>
    %c0_59 = arith.constant 0 : index
    %c0_60 = arith.constant 0 : index
    %223 = vector.load %arg5[%c0_59, %c0_60] : memref<256x512xf32, #tpu.memory_space<vmem>>, vector<256x512xf32>
    %cst_61 = arith.constant dense<0.000000e+00> : vector<8x512xf32>
    %224 = tpu.matmul %222, %223, %cst_61 {dimension_numbers = #tpu.dot_dimension_numbers<[1], [0], [0], [1], [0, 0, 1, 1], [], []>} : vector<8x256xf32>, vector<256x512xf32>, vector<8x512xf32> -> vector<8x512xf32>
    %225 = arith.addf %224, %9 : vector<8x512xf32>
    %226 = vector.extract_strided_slice %225 {offsets = [0, 0], sizes = [8, 128], strides = [1, 1]} : vector<8x512xf32> to vector<8x128xf32>
    %227 = arith.negf %226 : vector<8x128xf32>
    %228 = math.exp %227 : vector<8x128xf32>
    %cst_62 = arith.constant 1.000000e+00 : f32
    %229 = vector.broadcast %cst_62 : f32 to vector<8x128xf32>
    %230 = arith.addf %229, %228 : vector<8x128xf32>
    %231 = arith.divf %229, %230 : vector<8x128xf32>
    %232 = vector.extract_strided_slice %225 {offsets = [0, 128], sizes = [8, 128], strides = [1, 1]} : vector<8x512xf32> to vector<8x128xf32>
    %233 = arith.negf %232 : vector<8x128xf32>
    %234 = math.exp %233 : vector<8x128xf32>
    %cst_63 = arith.constant 1.000000e+00 : f32
    %235 = vector.broadcast %cst_63 : f32 to vector<8x128xf32>
    %236 = arith.addf %235, %234 : vector<8x128xf32>
    %237 = arith.divf %235, %236 : vector<8x128xf32>
    %238 = vector.extract_strided_slice %225 {offsets = [0, 256], sizes = [8, 128], strides = [1, 1]} : vector<8x512xf32> to vector<8x128xf32>
    %239 = math.tanh %238 : vector<8x128xf32>
    %240 = vector.extract_strided_slice %225 {offsets = [0, 384], sizes = [8, 128], strides = [1, 1]} : vector<8x512xf32> to vector<8x128xf32>
    %241 = arith.negf %240 : vector<8x128xf32>
    %242 = math.exp %241 : vector<8x128xf32>
    %cst_64 = arith.constant 1.000000e+00 : f32
    %243 = vector.broadcast %cst_64 : f32 to vector<8x128xf32>
    %244 = arith.addf %243, %242 : vector<8x128xf32>
    %245 = arith.divf %243, %244 : vector<8x128xf32>
    %246 = arith.mulf %237, %188 : vector<8x128xf32>
    %247 = arith.mulf %231, %239 : vector<8x128xf32>
    %248 = arith.addf %246, %247 : vector<8x128xf32>
    %249 = math.tanh %248 : vector<8x128xf32>
    %250 = arith.mulf %245, %249 : vector<8x128xf32>
    %c4_i32 = arith.constant 4 : i32
    %c8_i32_65 = arith.constant 8 : i32
    %251 = arith.muli %c4_i32, %c8_i32_65 : i32
    %252 = arith.index_cast %251 : i32 to index
    %c0_66 = arith.constant 0 : index
    %253 = vector.load %arg10[%252, %c0_66] : memref<64x512xf32, #tpu.memory_space<vmem>>, vector<8x512xf32>
    %c0_67 = arith.constant 0 : index
    %c0_68 = arith.constant 0 : index
    %254 = vector.load %arg3[%c0_67, %c0_68] : memref<128x512xf32, #tpu.memory_space<vmem>>, vector<128x512xf32>
    %cst_69 = arith.constant dense<0.000000e+00> : vector<8x512xf32>
    %255 = tpu.matmul %221, %254, %cst_69 {dimension_numbers = #tpu.dot_dimension_numbers<[1], [0], [0], [1], [0, 0, 1, 1], [], []>} : vector<8x128xf32>, vector<128x512xf32>, vector<8x512xf32> -> vector<8x512xf32>
    %256 = arith.addf %253, %255 : vector<8x512xf32>
    %257 = vector.extract_strided_slice %256 {offsets = [0, 0], sizes = [8, 128], strides = [1, 1]} : vector<8x512xf32> to vector<8x128xf32>
    %258 = arith.negf %257 : vector<8x128xf32>
    %259 = math.exp %258 : vector<8x128xf32>
    %cst_70 = arith.constant 1.000000e+00 : f32
    %260 = vector.broadcast %cst_70 : f32 to vector<8x128xf32>
    %261 = arith.addf %260, %259 : vector<8x128xf32>
    %262 = arith.divf %260, %261 : vector<8x128xf32>
    %263 = vector.extract_strided_slice %256 {offsets = [0, 128], sizes = [8, 128], strides = [1, 1]} : vector<8x512xf32> to vector<8x128xf32>
    %264 = arith.negf %263 : vector<8x128xf32>
    %265 = math.exp %264 : vector<8x128xf32>
    %cst_71 = arith.constant 1.000000e+00 : f32
    %266 = vector.broadcast %cst_71 : f32 to vector<8x128xf32>
    %267 = arith.addf %266, %265 : vector<8x128xf32>
    %268 = arith.divf %266, %267 : vector<8x128xf32>
    %269 = vector.extract_strided_slice %256 {offsets = [0, 256], sizes = [8, 128], strides = [1, 1]} : vector<8x512xf32> to vector<8x128xf32>
    %270 = math.tanh %269 : vector<8x128xf32>
    %271 = vector.extract_strided_slice %256 {offsets = [0, 384], sizes = [8, 128], strides = [1, 1]} : vector<8x512xf32> to vector<8x128xf32>
    %272 = arith.negf %271 : vector<8x128xf32>
    %273 = math.exp %272 : vector<8x128xf32>
    %cst_72 = arith.constant 1.000000e+00 : f32
    %274 = vector.broadcast %cst_72 : f32 to vector<8x128xf32>
    %275 = arith.addf %274, %273 : vector<8x128xf32>
    %276 = arith.divf %274, %275 : vector<8x128xf32>
    %277 = arith.mulf %268, %219 : vector<8x128xf32>
    %278 = arith.mulf %262, %270 : vector<8x128xf32>
    %279 = arith.addf %277, %278 : vector<8x128xf32>
    %280 = math.tanh %279 : vector<8x128xf32>
    %281 = arith.mulf %276, %280 : vector<8x128xf32>
    %282 = tpu.concatenate %281, %250 in 1 : vector<8x128xf32>, vector<8x128xf32> -> vector<8x256xf32>
    %c0_73 = arith.constant 0 : index
    %c0_74 = arith.constant 0 : index
    %283 = vector.load %arg5[%c0_73, %c0_74] : memref<256x512xf32, #tpu.memory_space<vmem>>, vector<256x512xf32>
    %cst_75 = arith.constant dense<0.000000e+00> : vector<8x512xf32>
    %284 = tpu.matmul %282, %283, %cst_75 {dimension_numbers = #tpu.dot_dimension_numbers<[1], [0], [0], [1], [0, 0, 1, 1], [], []>} : vector<8x256xf32>, vector<256x512xf32>, vector<8x512xf32> -> vector<8x512xf32>
    %285 = arith.addf %284, %9 : vector<8x512xf32>
    %286 = vector.extract_strided_slice %285 {offsets = [0, 0], sizes = [8, 128], strides = [1, 1]} : vector<8x512xf32> to vector<8x128xf32>
    %287 = arith.negf %286 : vector<8x128xf32>
    %288 = math.exp %287 : vector<8x128xf32>
    %cst_76 = arith.constant 1.000000e+00 : f32
    %289 = vector.broadcast %cst_76 : f32 to vector<8x128xf32>
    %290 = arith.addf %289, %288 : vector<8x128xf32>
    %291 = arith.divf %289, %290 : vector<8x128xf32>
    %292 = vector.extract_strided_slice %285 {offsets = [0, 128], sizes = [8, 128], strides = [1, 1]} : vector<8x512xf32> to vector<8x128xf32>
    %293 = arith.negf %292 : vector<8x128xf32>
    %294 = math.exp %293 : vector<8x128xf32>
    %cst_77 = arith.constant 1.000000e+00 : f32
    %295 = vector.broadcast %cst_77 : f32 to vector<8x128xf32>
    %296 = arith.addf %295, %294 : vector<8x128xf32>
    %297 = arith.divf %295, %296 : vector<8x128xf32>
    %298 = vector.extract_strided_slice %285 {offsets = [0, 256], sizes = [8, 128], strides = [1, 1]} : vector<8x512xf32> to vector<8x128xf32>
    %299 = math.tanh %298 : vector<8x128xf32>
    %300 = vector.extract_strided_slice %285 {offsets = [0, 384], sizes = [8, 128], strides = [1, 1]} : vector<8x512xf32> to vector<8x128xf32>
    %301 = arith.negf %300 : vector<8x128xf32>
    %302 = math.exp %301 : vector<8x128xf32>
    %cst_78 = arith.constant 1.000000e+00 : f32
    %303 = vector.broadcast %cst_78 : f32 to vector<8x128xf32>
    %304 = arith.addf %303, %302 : vector<8x128xf32>
    %305 = arith.divf %303, %304 : vector<8x128xf32>
    %306 = arith.mulf %297, %248 : vector<8x128xf32>
    %307 = arith.mulf %291, %299 : vector<8x128xf32>
    %308 = arith.addf %306, %307 : vector<8x128xf32>
    %309 = math.tanh %308 : vector<8x128xf32>
    %310 = arith.mulf %305, %309 : vector<8x128xf32>
    %c5_i32 = arith.constant 5 : i32
    %c8_i32_79 = arith.constant 8 : i32
    %311 = arith.muli %c5_i32, %c8_i32_79 : i32
    %312 = arith.index_cast %311 : i32 to index
    %c0_80 = arith.constant 0 : index
    %313 = vector.load %arg10[%312, %c0_80] : memref<64x512xf32, #tpu.memory_space<vmem>>, vector<8x512xf32>
    %c0_81 = arith.constant 0 : index
    %c0_82 = arith.constant 0 : index
    %314 = vector.load %arg3[%c0_81, %c0_82] : memref<128x512xf32, #tpu.memory_space<vmem>>, vector<128x512xf32>
    %cst_83 = arith.constant dense<0.000000e+00> : vector<8x512xf32>
    %315 = tpu.matmul %281, %314, %cst_83 {dimension_numbers = #tpu.dot_dimension_numbers<[1], [0], [0], [1], [0, 0, 1, 1], [], []>} : vector<8x128xf32>, vector<128x512xf32>, vector<8x512xf32> -> vector<8x512xf32>
    %316 = arith.addf %313, %315 : vector<8x512xf32>
    %317 = vector.extract_strided_slice %316 {offsets = [0, 0], sizes = [8, 128], strides = [1, 1]} : vector<8x512xf32> to vector<8x128xf32>
    %318 = arith.negf %317 : vector<8x128xf32>
    %319 = math.exp %318 : vector<8x128xf32>
    %cst_84 = arith.constant 1.000000e+00 : f32
    %320 = vector.broadcast %cst_84 : f32 to vector<8x128xf32>
    %321 = arith.addf %320, %319 : vector<8x128xf32>
    %322 = arith.divf %320, %321 : vector<8x128xf32>
    %323 = vector.extract_strided_slice %316 {offsets = [0, 128], sizes = [8, 128], strides = [1, 1]} : vector<8x512xf32> to vector<8x128xf32>
    %324 = arith.negf %323 : vector<8x128xf32>
    %325 = math.exp %324 : vector<8x128xf32>
    %cst_85 = arith.constant 1.000000e+00 : f32
    %326 = vector.broadcast %cst_85 : f32 to vector<8x128xf32>
    %327 = arith.addf %326, %325 : vector<8x128xf32>
    %328 = arith.divf %326, %327 : vector<8x128xf32>
    %329 = vector.extract_strided_slice %316 {offsets = [0, 256], sizes = [8, 128], strides = [1, 1]} : vector<8x512xf32> to vector<8x128xf32>
    %330 = math.tanh %329 : vector<8x128xf32>
    %331 = vector.extract_strided_slice %316 {offsets = [0, 384], sizes = [8, 128], strides = [1, 1]} : vector<8x512xf32> to vector<8x128xf32>
    %332 = arith.negf %331 : vector<8x128xf32>
    %333 = math.exp %332 : vector<8x128xf32>
    %cst_86 = arith.constant 1.000000e+00 : f32
    %334 = vector.broadcast %cst_86 : f32 to vector<8x128xf32>
    %335 = arith.addf %334, %333 : vector<8x128xf32>
    %336 = arith.divf %334, %335 : vector<8x128xf32>
    %337 = arith.mulf %328, %279 : vector<8x128xf32>
    %338 = arith.mulf %322, %330 : vector<8x128xf32>
    %339 = arith.addf %337, %338 : vector<8x128xf32>
    %340 = math.tanh %339 : vector<8x128xf32>
    %341 = arith.mulf %336, %340 : vector<8x128xf32>
    %342 = tpu.concatenate %341, %310 in 1 : vector<8x128xf32>, vector<8x128xf32> -> vector<8x256xf32>
    %c0_87 = arith.constant 0 : index
    %c0_88 = arith.constant 0 : index
    %343 = vector.load %arg5[%c0_87, %c0_88] : memref<256x512xf32, #tpu.memory_space<vmem>>, vector<256x512xf32>
    %cst_89 = arith.constant dense<0.000000e+00> : vector<8x512xf32>
    %344 = tpu.matmul %342, %343, %cst_89 {dimension_numbers = #tpu.dot_dimension_numbers<[1], [0], [0], [1], [0, 0, 1, 1], [], []>} : vector<8x256xf32>, vector<256x512xf32>, vector<8x512xf32> -> vector<8x512xf32>
    %345 = arith.addf %344, %9 : vector<8x512xf32>
    %346 = vector.extract_strided_slice %345 {offsets = [0, 0], sizes = [8, 128], strides = [1, 1]} : vector<8x512xf32> to vector<8x128xf32>
    %347 = arith.negf %346 : vector<8x128xf32>
    %348 = math.exp %347 : vector<8x128xf32>
    %cst_90 = arith.constant 1.000000e+00 : f32
    %349 = vector.broadcast %cst_90 : f32 to vector<8x128xf32>
    %350 = arith.addf %349, %348 : vector<8x128xf32>
    %351 = arith.divf %349, %350 : vector<8x128xf32>
    %352 = vector.extract_strided_slice %345 {offsets = [0, 128], sizes = [8, 128], strides = [1, 1]} : vector<8x512xf32> to vector<8x128xf32>
    %353 = arith.negf %352 : vector<8x128xf32>
    %354 = math.exp %353 : vector<8x128xf32>
    %cst_91 = arith.constant 1.000000e+00 : f32
    %355 = vector.broadcast %cst_91 : f32 to vector<8x128xf32>
    %356 = arith.addf %355, %354 : vector<8x128xf32>
    %357 = arith.divf %355, %356 : vector<8x128xf32>
    %358 = vector.extract_strided_slice %345 {offsets = [0, 256], sizes = [8, 128], strides = [1, 1]} : vector<8x512xf32> to vector<8x128xf32>
    %359 = math.tanh %358 : vector<8x128xf32>
    %360 = vector.extract_strided_slice %345 {offsets = [0, 384], sizes = [8, 128], strides = [1, 1]} : vector<8x512xf32> to vector<8x128xf32>
    %361 = arith.negf %360 : vector<8x128xf32>
    %362 = math.exp %361 : vector<8x128xf32>
    %cst_92 = arith.constant 1.000000e+00 : f32
    %363 = vector.broadcast %cst_92 : f32 to vector<8x128xf32>
    %364 = arith.addf %363, %362 : vector<8x128xf32>
    %365 = arith.divf %363, %364 : vector<8x128xf32>
    %366 = arith.mulf %357, %308 : vector<8x128xf32>
    %367 = arith.mulf %351, %359 : vector<8x128xf32>
    %368 = arith.addf %366, %367 : vector<8x128xf32>
    %369 = math.tanh %368 : vector<8x128xf32>
    %370 = arith.mulf %365, %369 : vector<8x128xf32>
    %c6_i32 = arith.constant 6 : i32
    %c8_i32_93 = arith.constant 8 : i32
    %371 = arith.muli %c6_i32, %c8_i32_93 : i32
    %372 = arith.index_cast %371 : i32 to index
    %c0_94 = arith.constant 0 : index
    %373 = vector.load %arg10[%372, %c0_94] : memref<64x512xf32, #tpu.memory_space<vmem>>, vector<8x512xf32>
    %c0_95 = arith.constant 0 : index
    %c0_96 = arith.constant 0 : index
    %374 = vector.load %arg3[%c0_95, %c0_96] : memref<128x512xf32, #tpu.memory_space<vmem>>, vector<128x512xf32>
    %cst_97 = arith.constant dense<0.000000e+00> : vector<8x512xf32>
    %375 = tpu.matmul %341, %374, %cst_97 {dimension_numbers = #tpu.dot_dimension_numbers<[1], [0], [0], [1], [0, 0, 1, 1], [], []>} : vector<8x128xf32>, vector<128x512xf32>, vector<8x512xf32> -> vector<8x512xf32>
    %376 = arith.addf %373, %375 : vector<8x512xf32>
    %377 = vector.extract_strided_slice %376 {offsets = [0, 0], sizes = [8, 128], strides = [1, 1]} : vector<8x512xf32> to vector<8x128xf32>
    %378 = arith.negf %377 : vector<8x128xf32>
    %379 = math.exp %378 : vector<8x128xf32>
    %cst_98 = arith.constant 1.000000e+00 : f32
    %380 = vector.broadcast %cst_98 : f32 to vector<8x128xf32>
    %381 = arith.addf %380, %379 : vector<8x128xf32>
    %382 = arith.divf %380, %381 : vector<8x128xf32>
    %383 = vector.extract_strided_slice %376 {offsets = [0, 128], sizes = [8, 128], strides = [1, 1]} : vector<8x512xf32> to vector<8x128xf32>
    %384 = arith.negf %383 : vector<8x128xf32>
    %385 = math.exp %384 : vector<8x128xf32>
    %cst_99 = arith.constant 1.000000e+00 : f32
    %386 = vector.broadcast %cst_99 : f32 to vector<8x128xf32>
    %387 = arith.addf %386, %385 : vector<8x128xf32>
    %388 = arith.divf %386, %387 : vector<8x128xf32>
    %389 = vector.extract_strided_slice %376 {offsets = [0, 256], sizes = [8, 128], strides = [1, 1]} : vector<8x512xf32> to vector<8x128xf32>
    %390 = math.tanh %389 : vector<8x128xf32>
    %391 = vector.extract_strided_slice %376 {offsets = [0, 384], sizes = [8, 128], strides = [1, 1]} : vector<8x512xf32> to vector<8x128xf32>
    %392 = arith.negf %391 : vector<8x128xf32>
    %393 = math.exp %392 : vector<8x128xf32>
    %cst_100 = arith.constant 1.000000e+00 : f32
    %394 = vector.broadcast %cst_100 : f32 to vector<8x128xf32>
    %395 = arith.addf %394, %393 : vector<8x128xf32>
    %396 = arith.divf %394, %395 : vector<8x128xf32>
    %397 = arith.mulf %388, %339 : vector<8x128xf32>
    %398 = arith.mulf %382, %390 : vector<8x128xf32>
    %399 = arith.addf %397, %398 : vector<8x128xf32>
    %400 = math.tanh %399 : vector<8x128xf32>
    %401 = arith.mulf %396, %400 : vector<8x128xf32>
    %402 = tpu.concatenate %401, %370 in 1 : vector<8x128xf32>, vector<8x128xf32> -> vector<8x256xf32>
    %c0_101 = arith.constant 0 : index
    %c0_102 = arith.constant 0 : index
    %403 = vector.load %arg5[%c0_101, %c0_102] : memref<256x512xf32, #tpu.memory_space<vmem>>, vector<256x512xf32>
    %cst_103 = arith.constant dense<0.000000e+00> : vector<8x512xf32>
    %404 = tpu.matmul %402, %403, %cst_103 {dimension_numbers = #tpu.dot_dimension_numbers<[1], [0], [0], [1], [0, 0, 1, 1], [], []>} : vector<8x256xf32>, vector<256x512xf32>, vector<8x512xf32> -> vector<8x512xf32>
    %405 = arith.addf %404, %9 : vector<8x512xf32>
    %406 = vector.extract_strided_slice %405 {offsets = [0, 0], sizes = [8, 128], strides = [1, 1]} : vector<8x512xf32> to vector<8x128xf32>
    %407 = arith.negf %406 : vector<8x128xf32>
    %408 = math.exp %407 : vector<8x128xf32>
    %cst_104 = arith.constant 1.000000e+00 : f32
    %409 = vector.broadcast %cst_104 : f32 to vector<8x128xf32>
    %410 = arith.addf %409, %408 : vector<8x128xf32>
    %411 = arith.divf %409, %410 : vector<8x128xf32>
    %412 = vector.extract_strided_slice %405 {offsets = [0, 128], sizes = [8, 128], strides = [1, 1]} : vector<8x512xf32> to vector<8x128xf32>
    %413 = arith.negf %412 : vector<8x128xf32>
    %414 = math.exp %413 : vector<8x128xf32>
    %cst_105 = arith.constant 1.000000e+00 : f32
    %415 = vector.broadcast %cst_105 : f32 to vector<8x128xf32>
    %416 = arith.addf %415, %414 : vector<8x128xf32>
    %417 = arith.divf %415, %416 : vector<8x128xf32>
    %418 = vector.extract_strided_slice %405 {offsets = [0, 256], sizes = [8, 128], strides = [1, 1]} : vector<8x512xf32> to vector<8x128xf32>
    %419 = math.tanh %418 : vector<8x128xf32>
    %420 = vector.extract_strided_slice %405 {offsets = [0, 384], sizes = [8, 128], strides = [1, 1]} : vector<8x512xf32> to vector<8x128xf32>
    %421 = arith.negf %420 : vector<8x128xf32>
    %422 = math.exp %421 : vector<8x128xf32>
    %cst_106 = arith.constant 1.000000e+00 : f32
    %423 = vector.broadcast %cst_106 : f32 to vector<8x128xf32>
    %424 = arith.addf %423, %422 : vector<8x128xf32>
    %425 = arith.divf %423, %424 : vector<8x128xf32>
    %426 = arith.mulf %417, %368 : vector<8x128xf32>
    %427 = arith.mulf %411, %419 : vector<8x128xf32>
    %428 = arith.addf %426, %427 : vector<8x128xf32>
    %429 = math.tanh %428 : vector<8x128xf32>
    %430 = arith.mulf %425, %429 : vector<8x128xf32>
    %c7_i32 = arith.constant 7 : i32
    %c8_i32_107 = arith.constant 8 : i32
    %431 = arith.muli %c7_i32, %c8_i32_107 : i32
    %432 = arith.index_cast %431 : i32 to index
    %c0_108 = arith.constant 0 : index
    %433 = vector.load %arg10[%432, %c0_108] : memref<64x512xf32, #tpu.memory_space<vmem>>, vector<8x512xf32>
    %c0_109 = arith.constant 0 : index
    %c0_110 = arith.constant 0 : index
    %434 = vector.load %arg3[%c0_109, %c0_110] : memref<128x512xf32, #tpu.memory_space<vmem>>, vector<128x512xf32>
    %cst_111 = arith.constant dense<0.000000e+00> : vector<8x512xf32>
    %435 = tpu.matmul %401, %434, %cst_111 {dimension_numbers = #tpu.dot_dimension_numbers<[1], [0], [0], [1], [0, 0, 1, 1], [], []>} : vector<8x128xf32>, vector<128x512xf32>, vector<8x512xf32> -> vector<8x512xf32>
    %436 = arith.addf %433, %435 : vector<8x512xf32>
    %437 = vector.extract_strided_slice %436 {offsets = [0, 0], sizes = [8, 128], strides = [1, 1]} : vector<8x512xf32> to vector<8x128xf32>
    %438 = arith.negf %437 : vector<8x128xf32>
    %439 = math.exp %438 : vector<8x128xf32>
    %cst_112 = arith.constant 1.000000e+00 : f32
    %440 = vector.broadcast %cst_112 : f32 to vector<8x128xf32>
    %441 = arith.addf %440, %439 : vector<8x128xf32>
    %442 = arith.divf %440, %441 : vector<8x128xf32>
    %443 = vector.extract_strided_slice %436 {offsets = [0, 128], sizes = [8, 128], strides = [1, 1]} : vector<8x512xf32> to vector<8x128xf32>
    %444 = arith.negf %443 : vector<8x128xf32>
    %445 = math.exp %444 : vector<8x128xf32>
    %cst_113 = arith.constant 1.000000e+00 : f32
    %446 = vector.broadcast %cst_113 : f32 to vector<8x128xf32>
    %447 = arith.addf %446, %445 : vector<8x128xf32>
    %448 = arith.divf %446, %447 : vector<8x128xf32>
    %449 = vector.extract_strided_slice %436 {offsets = [0, 256], sizes = [8, 128], strides = [1, 1]} : vector<8x512xf32> to vector<8x128xf32>
    %450 = math.tanh %449 : vector<8x128xf32>
    %451 = vector.extract_strided_slice %436 {offsets = [0, 384], sizes = [8, 128], strides = [1, 1]} : vector<8x512xf32> to vector<8x128xf32>
    %452 = arith.negf %451 : vector<8x128xf32>
    %453 = math.exp %452 : vector<8x128xf32>
    %cst_114 = arith.constant 1.000000e+00 : f32
    %454 = vector.broadcast %cst_114 : f32 to vector<8x128xf32>
    %455 = arith.addf %454, %453 : vector<8x128xf32>
    %456 = arith.divf %454, %455 : vector<8x128xf32>
    %457 = arith.mulf %448, %399 : vector<8x128xf32>
    %458 = arith.mulf %442, %450 : vector<8x128xf32>
    %459 = arith.addf %457, %458 : vector<8x128xf32>
    %460 = math.tanh %459 : vector<8x128xf32>
    %461 = arith.mulf %456, %460 : vector<8x128xf32>
    %462 = tpu.concatenate %461, %430 in 1 : vector<8x128xf32>, vector<8x128xf32> -> vector<8x256xf32>
    %c0_115 = arith.constant 0 : index
    %c0_116 = arith.constant 0 : index
    %463 = vector.load %arg5[%c0_115, %c0_116] : memref<256x512xf32, #tpu.memory_space<vmem>>, vector<256x512xf32>
    %cst_117 = arith.constant dense<0.000000e+00> : vector<8x512xf32>
    %464 = tpu.matmul %462, %463, %cst_117 {dimension_numbers = #tpu.dot_dimension_numbers<[1], [0], [0], [1], [0, 0, 1, 1], [], []>} : vector<8x256xf32>, vector<256x512xf32>, vector<8x512xf32> -> vector<8x512xf32>
    %465 = arith.addf %464, %9 : vector<8x512xf32>
    %466 = vector.extract_strided_slice %465 {offsets = [0, 0], sizes = [8, 128], strides = [1, 1]} : vector<8x512xf32> to vector<8x128xf32>
    %467 = arith.negf %466 : vector<8x128xf32>
    %468 = math.exp %467 : vector<8x128xf32>
    %cst_118 = arith.constant 1.000000e+00 : f32
    %469 = vector.broadcast %cst_118 : f32 to vector<8x128xf32>
    %470 = arith.addf %469, %468 : vector<8x128xf32>
    %471 = arith.divf %469, %470 : vector<8x128xf32>
    %472 = vector.extract_strided_slice %465 {offsets = [0, 128], sizes = [8, 128], strides = [1, 1]} : vector<8x512xf32> to vector<8x128xf32>
    %473 = arith.negf %472 : vector<8x128xf32>
    %474 = math.exp %473 : vector<8x128xf32>
    %cst_119 = arith.constant 1.000000e+00 : f32
    %475 = vector.broadcast %cst_119 : f32 to vector<8x128xf32>
    %476 = arith.addf %475, %474 : vector<8x128xf32>
    %477 = arith.divf %475, %476 : vector<8x128xf32>
    %478 = vector.extract_strided_slice %465 {offsets = [0, 256], sizes = [8, 128], strides = [1, 1]} : vector<8x512xf32> to vector<8x128xf32>
    %479 = math.tanh %478 : vector<8x128xf32>
    %480 = vector.extract_strided_slice %465 {offsets = [0, 384], sizes = [8, 128], strides = [1, 1]} : vector<8x512xf32> to vector<8x128xf32>
    %481 = arith.negf %480 : vector<8x128xf32>
    %482 = math.exp %481 : vector<8x128xf32>
    %cst_120 = arith.constant 1.000000e+00 : f32
    %483 = vector.broadcast %cst_120 : f32 to vector<8x128xf32>
    %484 = arith.addf %483, %482 : vector<8x128xf32>
    %485 = arith.divf %483, %484 : vector<8x128xf32>
    %486 = arith.mulf %477, %428 : vector<8x128xf32>
    %487 = arith.mulf %471, %479 : vector<8x128xf32>
    %488 = arith.addf %486, %487 : vector<8x128xf32>
    %489 = math.tanh %488 : vector<8x128xf32>
    %490 = arith.mulf %485, %489 : vector<8x128xf32>
    %c8_i32_121 = arith.constant 8 : i32
    %c0_122 = arith.constant 0 : index
    %c0_123 = arith.constant 0 : index
    %491 = vector.load %arg7[%c0_122, %c0_123] : memref<128x128xf32, #tpu.memory_space<vmem>>, vector<128x128xf32>
    %cst_124 = arith.constant dense<0.000000e+00> : vector<8x128xf32>
    %492 = tpu.matmul %490, %491, %cst_124 {dimension_numbers = #tpu.dot_dimension_numbers<[1], [0], [0], [1], [0, 0, 1, 1], [], []>} : vector<8x128xf32>, vector<128x128xf32>, vector<8x128xf32> -> vector<8x128xf32>
    %c0_125 = arith.constant 0 : index
    %c0_126 = arith.constant 0 : index
    %493 = vector.load %arg8[%c0_125, %c0_126] : memref<1x128xf32, #tpu.memory_space<vmem>>, vector<1x128xf32>
    %494 = vector.broadcast %493 : vector<1x128xf32> to vector<8x128xf32>
    %495 = arith.addf %492, %494 : vector<8x128xf32>
    %c0_127 = arith.constant 0 : index
    %c0_128 = arith.constant 0 : index
    %496 = vector.load %arg9[%c0_127, %c0_128] : memref<8x128xf32, #tpu.memory_space<vmem>>, vector<8x128xf32>
    tpu.vector_store %arg9[%c0_127, %c0_128], %495 {strides = array<i32>} : memref<8x128xf32, #tpu.memory_space<vmem>>, vector<8x128xf32>,
    return
  }
  func.func @transform_0(%arg0: i32) -> (i32, i32) {
    %c0_i32 = arith.constant 0 : i32
    %c0_i32_0 = arith.constant 0 : i32
    %c0_i32_1 = arith.constant 0 : i32
    return %c0_i32, %c0_i32_0 : i32, i32
  }
  func.func @transform_1(%arg0: i32) -> (i32, i32) {
    %c0_i32 = arith.constant 0 : i32
    %c0_i32_0 = arith.constant 0 : i32
    %c0_i32_1 = arith.constant 0 : i32
    return %c0_i32, %c0_i32_0 : i32, i32
  }
  func.func @transform_2(%arg0: i32) -> (i32, i32) {
    %c0_i32 = arith.constant 0 : i32
    %c0_i32_0 = arith.constant 0 : i32
    %c0_i32_1 = arith.constant 0 : i32
    return %c0_i32, %c0_i32_0 : i32, i32
  }
  func.func @transform_3(%arg0: i32) -> (i32, i32) {
    %c0_i32 = arith.constant 0 : i32
    %c0_i32_0 = arith.constant 0 : i32
    %c0_i32_1 = arith.constant 0 : i32
    return %c0_i32, %c0_i32_0 : i32, i32
  }
  func.func @transform_4(%arg0: i32) -> (i32, i32) {
    %c0_i32 = arith.constant 0 : i32
    %c0_i32_0 = arith.constant 0 : i32
    %c0_i32_1 = arith.constant 0 : i32
    return %c0_i32, %c0_i32_0 : i32, i32
  }
  func.func @transform_5(%arg0: i32) -> (i32, i32) {
    %c0_i32 = arith.constant 0 : i32
    %c0_i32_0 = arith.constant 0 : i32
    %c0_i32_1 = arith.constant 0 : i32
    return %c0_i32, %c0_i32_0 : i32, i32
  }
  func.func @transform_6(%arg0: i32) -> (i32, i32) {
    %c0_i32 = arith.constant 0 : i32
    %c0_i32_0 = arith.constant 0 : i32
    %c0_i32_1 = arith.constant 0 : i32
    return %c0_i32, %c0_i32_0 : i32, i32
  }
  func.func @transform_7(%arg0: i32) -> (i32, i32) {
    %c0_i32 = arith.constant 0 : i32
    %c0_i32_0 = arith.constant 0 : i32
    %c0_i32_1 = arith.constant 0 : i32
    return %c0_i32, %c0_i32_0 : i32, i32
  }
  func.func @transform_8(%arg0: i32) -> (i32, i32) {
    %c0_i32 = arith.constant 0 : i32
    %c0_i32_0 = arith.constant 0 : i32
    %c0_i32_1 = arith.constant 0 : i32
    return %c0_i32, %c0_i32_0 : i32, i32
  }
}

</mosaic_0001>

<bundles_post_ra>
// kernel: tpu_custom_call.1
= control target key start
LH: loop header
LB: loop body
LE: loop exit
PB: predicated region body
PF: predicated region fallthrough
CT: control target
= control target key end

     0   :  { %13 = vsyncpa [#allocation4], 0  ;;  %s6946_s0 = inlined_call_operand.vmem [shape: f32[64,32], index: 0, kind: input, shape index: {}]   ;;  %s6947_s1 = inlined_call_operand.hbm [shape: f32[32,512], index: 1, kind: input, shape index: {}]   ;;  %s6948_s2 = inlined_call_operand.hbm [shape: f32[128,512], index: 2, kind: input, shape index: {}]   ;;  %s6949_s3 = inlined_call_operand.vmem [shape: f32[1,512], index: 3, kind: input, shape index: {}]   ;;  %s6950_s4 = inlined_call_operand.hbm [shape: f32[256,512], index: 4, kind: input, shape index: {}]   ;;  %s6951_s5 = inlined_call_operand.vmem [shape: f32[1,512], index: 5, kind: input, shape index: {}]   ;;  %s6952_s6 = inlined_call_operand.hbm [shape: f32[128,128], index: 6, kind: input, shape index: {}]   ;;  %s6953_s7 = inlined_call_operand.vmem [shape: f32[1,128], index: 7, kind: input, shape index: {}]   ;;  %s6954_s8 = inlined_call_operand.hbm [shape: f32[8,128], index: 8, kind: output, shape index: {}]  }
   0x1   :  { %14 = vsyncpa [#allocation7], 0 }
   0x2   :  { %15 = vsyncpa [#allocation10], 0 }
   0x3   :  { %16 = vsyncpa [#allocation5], 0  ;;  %s5602_s27 = smov [#allocation6]   ;;  %s5603_s29 = smov [#allocation3]  }
   0x4   :  { %s36_s28 = sshll.u32 %s5602_s27, 4  ;;  %s24_s30 = sshll.u32 %s5603_s29, 4  ;;  %s37_s28 = int_to_ptr.vmem [resolvable:$true] %s36_s28  ;;  %s5659_s30 = int_to_ptr.vmem [resolvable:$true] %s24_s30 }
   0x5   :  { %s5484_s11 = scalar_lea.hbm %s6948_s2, 8192 }
   0x6   :  { %p5485_p0 = scmp.ne.s32.totalorder %s6948_s2, %s5484_s11  ;;  %p5488_p1 = scmp.lt.u32.totalorder %s5484_s11, %s6948_s2 }
   0x8   :  { %p5490_p2 = pnand %p5488_p1, %p5485_p0 }
   0xa   :  { %5493 = shalt.err (!%p5490_p2)
}
   0xb   :  { %s5494_s16 = scalar_lea.vmem %s37_s28, 8192  ;;  %p5499_p4 = scmp.lt.s32.totalorder %s37_s28, %s37_s28 }
   0xc   :  { %p5495_p3 = scmp.ne.s32.totalorder %s37_s28, %s5494_s16  ;;  %p5500_p5 = scmp.lt.s32.totalorder %s5494_s16, %s5494_s16 }
   0xe   :  { %p5501_p6 = por %p5500_p5, %p5499_p4 }
  0x10   :  { %p5502_p7 = pnand %p5501_p6, %p5495_p3 }
  0x12   :  { %5505 = shalt.err (!%p5502_p7)
}
  0x13   :  { %s5604_s17 = smov 512   ;;  %s5605_s18 = smov 32  }
  0x14   :  { %42 = dma.hbm_to_vmem [thread:$0]  %s6948_s2, 8192, %s37_s28, [#allocation7], %s5604_s17, %s5604_s17, %s5605_s18  }
  0x15   :  { %s5506_s23 = scalar_lea.hbm %s6947_s1, 2048 }
  0x16   :  { %p5507_p8 = scmp.ne.s32.totalorder %s6947_s1, %s5506_s23  ;;  %p5510_p9 = scmp.lt.u32.totalorder %s5506_s23, %s6947_s1 }
  0x18   :  { %p5512_p10 = pnand %p5510_p9, %p5507_p8 }
  0x1a   :  { %5515 = shalt.err (!%p5512_p10)
}
  0x1b   :  { %s5516_s29 = scalar_lea.vmem %s5659_s30, 2048  ;;  %p5521_p12 = scmp.lt.s32.totalorder %s5659_s30, %s5659_s30 }
  0x1c   :  { %p5517_p11 = scmp.ne.s32.totalorder %s5659_s30, %s5516_s29  ;;  %p5522_p13 = scmp.lt.s32.totalorder %s5516_s29, %s5516_s29 }
  0x1e   :  { %p5523_p0 = por %p5522_p13, %p5521_p12 }
  0x20   :  { %p5524_p1 = pnand %p5523_p0, %p5517_p11 }
  0x22   :  { %5527 = shalt.err (!%p5524_p1)
}
  0x23   :  { %30 = dma.hbm_to_vmem [thread:$0]  %s6947_s1, 2048, %s5659_s30, [#allocation4], %s5604_s17, %s5604_s17, %s5605_s18  }
  0x24   :  { %s5606_s9 = smov [#allocation8]   ;;  %s5607_s11 = smov [#allocation9]  }
  0x25   :  { %s50_s10 = sshll.u32 %s5606_s9, 4  ;;  %s64_s12 = sshll.u32 %s5607_s11, 4  ;;  %s51_s10 = int_to_ptr.vmem [resolvable:$true] %s50_s10  ;;  %s5696_s12 = int_to_ptr.vmem [resolvable:$true] %s64_s12 }
  0x26   :  { %s5528_s15 = scalar_lea.hbm %s6950_s4, 16384 }
  0x27   :  { %p5529_p2 = scmp.ne.s32.totalorder %s6950_s4, %s5528_s15  ;;  %p5532_p3 = scmp.lt.u32.totalorder %s5528_s15, %s6950_s4 }
  0x29   :  { %p5534_p4 = pnand %p5532_p3, %p5529_p2 }
  0x2b   :  { %5537 = shalt.err (!%p5534_p4)
}
  0x2c   :  { %s5538_s1 = scalar_lea.vmem %s51_s10, 16384  ;;  %p5543_p6 = scmp.lt.s32.totalorder %s51_s10, %s51_s10 }
  0x2d   :  { %p5539_p5 = scmp.ne.s32.totalorder %s51_s10, %s5538_s1  ;;  %p5544_p7 = scmp.lt.s32.totalorder %s5538_s1, %s5538_s1 }
  0x2f   :  { %p5545_p8 = por %p5544_p7, %p5543_p6 }
  0x31   :  { %p5546_p9 = pnand %p5545_p8, %p5539_p5 }
  0x33   :  { %5549 = shalt.err (!%p5546_p9)
}
  0x34   :  { %56 = dma.hbm_to_vmem [thread:$0]  %s6950_s4, 16384, %s51_s10, [#allocation7], %s5604_s17, %s5604_s17, %s5605_s18  }
  0x35   :  { %s5550_s25 = scalar_lea.hbm %s6952_s6, 2048 }
  0x36   :  { %p5551_p10 = scmp.ne.s32.totalorder %s6952_s6, %s5550_s25  ;;  %p5554_p11 = scmp.lt.u32.totalorder %s5550_s25, %s6952_s6 }
  0x38   :  { %p5556_p12 = pnand %p5554_p11, %p5551_p10 }
  0x3a   :  { %5559 = shalt.err (!%p5556_p12)
}
  0x3b   :  { %s5560_s28 = scalar_lea.vmem %s5696_s12, 2048  ;;  %p5565_p0 = scmp.lt.s32.totalorder %s5696_s12, %s5696_s12 }
  0x3c   :  { %p5561_p13 = scmp.ne.s32.totalorder %s5696_s12, %s5560_s28  ;;  %p5566_p1 = scmp.lt.s32.totalorder %s5560_s28, %s5560_s28 }
  0x3e   :  { %p5567_p2 = por %p5566_p1, %p5565_p0 }
  0x40   :  { %p5568_p3 = pnand %p5567_p2, %p5561_p13 }
  0x42   :  { %5571 = shalt.err (!%p5568_p3)
}
  0x43   :  { %s5608_s4 = smov 128   ;;  %s5609_s17 = smov 8  }
  0x44   :  { %70 = dma.hbm_to_vmem [thread:$0]  %s6952_s6, 2048, %s5696_s12, [#allocation10], %s5608_s4, %s5608_s4, %s5609_s17  }
  0x45   :  { %5594 = dma.done.wait [#allocation4], 2048  }
  0x46   :  { %5595 = vsyncadd [#allocation4], 4294965248 }
  0x47   :  { %5596 = dma.done.wait [#allocation7], 24576  }
  0x48   :  { %5597 = vsyncadd [#allocation7], 4294942720 }
  0x49   :  { %5598 = dma.done.wait [#allocation10], 2048  }
  0x4a   :  { %5599 = vsyncadd [#allocation10], 4294965248  ;;  %v6955_v0 = vmov 0.0   ;;  %v94_v1 = vld [vmem:[#allocation3 + $0x8] sm:$0xff]  ;;  %v96_v3 = vld [vmem:[#allocation3 + $0x18] sm:$0xff]  ;;  %vm131_vm0 = vcmask 261120  }
  0x4b   :  { %220 = vmatprep.mubr.f32.mxu0 %v6955_v0  ;;  %333 = vmatprep.mubr.f32.mxu1 %v6955_v0  ;;  %v98_v2 = vld [vmem:[#allocation3 + $0x28] sm:$0xff]  ;;  %v100_v5 = vld [vmem:[#allocation3 + $0x38] sm:$0xff]  ;;  %v93_v6 = vld [vmem:[#allocation3] sm:$0xff]  ;;  %vm5612_vm1 = vmmov 0   ;;  %s5613_s29 = smov [#allocation11]  }
  0x4c   :  { %v3576_v4 = vpack.c.bf16 %v98_v2, %v94_v1  ;;  %v97_v7 = vld [vmem:[#allocation3 + $0x20] sm:$0xff]  ;;  %v3584_v8 = vpack.c.bf16 %v100_v5, %v96_v3  ;;  %v95_v10 = vld [vmem:[#allocation3 + $0x10] sm:$0xff]  ;;  %v102_v12 = vld [vmem:[#allocation3 + $0x48] sm:$0xff]  ;;  %s3448_s2 = sshll.u32 %s5613_s29, 4  ;;  %s3449_s2 = int_to_ptr.vmem [resolvable:$true] %s3448_s2 }
  0x4d   :  { %v3578_v9 = vpack.c.bf16 %v97_v7, %v93_v6  ;;  %v99_v11 = vld [vmem:[#allocation3 + $0x30] sm:$0xff]  ;;  %v106_v14 = vld [vmem:[#allocation3 + $0x68] sm:$0xff]  ;;  %v104_v15 = vld [vmem:[#allocation3 + $0x58] sm:$0xff]  ;;  %s5572_s28 = scalar_lea.vmem %s3449_s2, 128  ;;  %p5577_p5 = scmp.lt.s32.totalorder %s3449_s2, %s3449_s2 }
  0x4e   :  { %3577 = vmatprep.subr.bf16.mxu0 %v3576_v4  ;;  %v3586_v13 = vpack.c.bf16 %v99_v11, %v95_v10  ;;  %v108_v16 = vld [vmem:[#allocation3 + $0x78] sm:$0xff]  ;;  %3585 = vmatprep.subr.bf16.mxu1 %v3584_v8  ;;  %v3580_v17 = vpack.c.bf16 %v106_v14, %v102_v12  ;;  %v101_v19 = vld [vmem:[#allocation3 + $0x40] sm:$0xff]  ;;  %v103_v21 = vld [vmem:[#allocation3 + $0x50] sm:$0xff]  ;;  %p5573_p4 = scmp.ne.s32.totalorder %s3449_s2, %s5572_s28  ;;  %p5578_p6 = scmp.lt.s32.totalorder %s5572_s28, %s5572_s28 }
  0x4f   :  { %3579 = vmatpush1.bf16.msra.mxu0 %v3578_v9  ;;  %v3588_v18 = vpack.c.bf16 %v108_v16, %v104_v15  ;;  %v105_v20 = vld [vmem:[#allocation3 + $0x60] sm:$0xff]  ;;  %v107_v23 = vld [vmem:[#allocation3 + $0x70] sm:$0xff]  ;;  %v441_v24 = vld [vmem:[#allocation6 + $0x8] sm:$0xff] }
  0x50   :  { %3587 = vmatpush1.bf16.msra.mxu1 %v3586_v13  ;;  %v3582_v22 = vpack.c.bf16 %v105_v20, %v101_v19  ;;  %3581 = vmatprep.subr.bf16.mxu0 %v3580_v17  ;;  %v3590_v25 = vpack.c.bf16 %v107_v23, %v103_v21  ;;  %v445_v26 = vld [vmem:[#allocation6 + $0x28] sm:$0xff]  ;;  %v443_v27 = vld [vmem:[#allocation6 + $0x18] sm:$0xff]  ;;  %v440_v31 = vld [vmem:[#allocation6] sm:$0xff]  ;;  %p5579_p7 = por %p5578_p6, %p5577_p5 }
  0x51   :  { %3589 = vmatprep.subr.bf16.mxu1 %v3588_v18  ;;  %v447_v28 = vld [vmem:[#allocation6 + $0x38] sm:$0xff]  ;;  %v5732_v29 = vpack.c.bf16 %v445_v26, %v441_v24  ;;  %v444_v32 = vld [vmem:[#allocation6 + $0x20] sm:$0xff]  ;;  %v442_v33 = vld [vmem:[#allocation6 + $0x10] sm:$0xff] }
  0x52   :  { %v5734_v30 = vpack.c.bf16 %v447_v28, %v443_v27  ;;  %v85_v34 = vld [vmem:[%s6946_s0] sm:$0xff]  ;;  %v5739_v35 = vpack.c.bf16 %v444_v32, %v440_v31  ;;  %v446_v36 = vld [vmem:[#allocation6 + $0x30] sm:$0xff]  ;;  %v449_v37 = vld [vmem:[#allocation6 + $0x48] sm:$0xff]  ;;  %p5580_p8 = pnand %p5579_p7, %p5573_p4 }
  0x53   :  { %7089 = vst [vmem:[#allocation16_spill] sm:$0xff] %v5732_v29  ;;  %3583 = vmatpush1.bf16.msra.mxu0 %v3582_v22  ;;  %v5742_v38 = vpack.c.bf16 %v446_v36, %v442_v33  ;;  %v453_v39 = vld [vmem:[#allocation6 + $0x68] sm:$0xff]  ;;  %v451_v40 = vld [vmem:[#allocation6 + $0x58] sm:$0xff]  ;;  %v448_v43 = vld [vmem:[#allocation6 + $0x40] sm:$0xff] }
  0x54   :  { %7090 = vst [vmem:[#allocation17_spill] sm:$0xff] %v5734_v30  ;;  %3591 = vmatpush1.bf16.msra.mxu1 %v3590_v25  ;;  %3593 = vmatprep.subr.bf16.mxu0 %v5732_v29  ;;  %v455_v41 = vld [vmem:[#allocation6 + $0x78] sm:$0xff]  ;;  %v5745_v42 = vpack.c.bf16 %v453_v39, %v449_v37  ;;  %v452_v44 = vld [vmem:[#allocation6 + $0x60] sm:$0xff]  ;;  %v450_v45 = vld [vmem:[#allocation6 + $0x50] sm:$0xff] }
  0x55   :  { %3625 = vmatprep.subr.bf16.mxu1 %v5734_v30  ;;  %v86_v46 = vld [vmem:[%s6946_s0 + $0x8] sm:$0xff]  ;;  %v5751_v47 = vpack.c.bf16 %v455_v41, %v451_v40  ;;  %v454_v48 = vld [vmem:[#allocation6 + $0x70] sm:$0xff]  ;;  %v5755_v50 = vpack.c.bf16 %v452_v44, %v448_v43  ;;  %v459_v52 = vld [vmem:[#allocation6 + $0x98] sm:$0xff] }
  0x56   :  { %3459 = vmatmul.mubr.msk.f32.vlgmr.msra.gmra.mrb[0].mxu0 %vm131_vm0, %v85_v34  ;;  %v457_v49 = vld [vmem:[#allocation6 + $0x88] sm:$0xff]  ;;  %v463_v53 = vld [vmem:[#allocation6 + $0xb8] sm:$0xff]  ;;  %v5759_v54 = vpack.c.bf16 %v454_v48, %v450_v45  ;;  %v456_v55 = vld [vmem:[#allocation6 + $0x80] sm:$0xff] }
  0x57   :  { %3467 = vmatmul.mubr.msk.f32.vlgmr.msra.gmra.mrb[0].mxu1 %vm131_vm0, %v85_v34  ;;  %3595 = vmatpush1.bf16.msra.mxu0 %v5739_v35  ;;  %v461_v51 = vld [vmem:[#allocation6 + $0xa8] sm:$0xff]  ;;  %v460_v56 = vld [vmem:[#allocation6 + $0xa0] sm:$0xff]  ;;  %v458_v58 = vld [vmem:[#allocation6 + $0x90] sm:$0xff]  ;;  %v5767_v60 = vpack.c.bf16 %v463_v53, %v459_v52 }
  0x58   :  { %3627 = vmatpush1.bf16.msra.mxu1 %v5742_v38  ;;  %226 = vmatprep.mubr.f32.mxu0 %v6955_v0  ;;  %v5763_v57 = vpack.c.bf16 %v461_v51, %v457_v49  ;;  %v462_v59 = vld [vmem:[#allocation6 + $0xb0] sm:$0xff]  ;;  %v465_v61 = vld [vmem:[#allocation6 + $0xc8] sm:$0xff]  ;;  %v5774_v1 = vpack.c.bf16 %v460_v56, %v456_v55  ;;  %v467_v2 = vld [vmem:[#allocation6 + $0xd8] sm:$0xff] }
  0x59   :  { %339 = vmatprep.mubr.f32.mxu1 %v6955_v0  ;;  %3597 = vmatprep.subr.bf16.mxu0 %v5745_v42  ;;  %v469_v62 = vld [vmem:[#allocation6 + $0xe8] sm:$0xff]  ;;  %v87_v63 = vld [vmem:[%s6946_s0 + $0x10] sm:$0xff]  ;;  %v471_v3 = vld [vmem:[#allocation6 + $0xf8] sm:$0xff]  ;;  %v5778_v4 = vpack.c.bf16 %v462_v59, %v458_v58 }
  0x5a   :  { %3460 = vmatmul.mubr.msk.f32.gmra.mrb[2].mxu0 %vm131_vm0, %v86_v46  ;;  %3629 = vmatprep.subr.bf16.mxu1 %v5751_v47  ;;  %v464_v5 = vld [vmem:[#allocation6 + $0xc0] sm:$0xff]  ;;  %v5782_v7 = vpack.c.bf16 %v469_v62, %v465_v61  ;;  %v466_v8 = vld [vmem:[#allocation6 + $0xd0] sm:$0xff]  ;;  %v5786_v10 = vpack.c.bf16 %v471_v3, %v467_v2  ;;  %v473_v11 = vld [vmem:[#allocation6 + $0x108] sm:$0xff] }
  0x5b   :  { %3468 = vmatmul.mubr.msk.f32.gmra.mrb[2].mxu1 %vm131_vm0, %v86_v46  ;;  %3599 = vmatpush1.bf16.msra.mxu0 %v5755_v50  ;;  %v468_v6 = vld [vmem:[#allocation6 + $0xe0] sm:$0xff]  ;;  %v470_v9 = vld [vmem:[#allocation6 + $0xf0] sm:$0xff]  ;;  %v477_v12 = vld [vmem:[#allocation6 + $0x128] sm:$0xff] }
  0x5c   :  { %3631 = vmatpush1.bf16.msra.mxu1 %v5759_v54  ;;  %232 = vmatprep.mubr.f32.mxu0 %v6955_v0  ;;  %v88_v13 = vld [vmem:[%s6946_s0 + $0x18] sm:$0xff]  ;;  %v5793_v14 = vpack.c.bf16 %v468_v6, %v464_v5  ;;  %v5797_v17 = vpack.c.bf16 %v470_v9, %v466_v8  ;;  %v472_v18 = vld [vmem:[#allocation6 + $0x100] sm:$0xff]  ;;  %v5801_v20 = vpack.c.bf16 %v477_v12, %v473_v11  ;;  %v474_v21 = vld [vmem:[#allocation6 + $0x110] sm:$0xff] }
  0x5d   :  { %345 = vmatprep.mubr.f32.mxu1 %v6955_v0  ;;  %3601 = vmatprep.subr.bf16.mxu0 %v5763_v57  ;;  %v475_v15 = vld [vmem:[#allocation6 + $0x118] sm:$0xff]  ;;  %v476_v19 = vld [vmem:[#allocation6 + $0x120] sm:$0xff]  ;;  %v478_v22 = vld [vmem:[#allocation6 + $0x130] sm:$0xff] }
  0x5e   :  { %3461 = vmatmul.mubr.msk.f32.gmra.mrb[4].mxu0 %vm131_vm0, %v87_v63  ;;  %3633 = vmatprep.subr.bf16.mxu1 %v5767_v60  ;;  %v479_v16 = vld [vmem:[#allocation6 + $0x138] sm:$0xff]  ;;  %v481_v24 = vld [vmem:[#allocation6 + $0x148] sm:$0xff]  ;;  %v89_v26 = vld [vmem:[%s6946_s0 + $0x20] sm:$0xff]  ;;  %v5812_v27 = vpack.c.bf16 %v476_v19, %v472_v18  ;;  %v5816_v32 = vpack.c.bf16 %v478_v22, %v474_v21 }
  0x5f   :  { %3469 = vmatmul.mubr.msk.f32.gmra.mrb[4].mxu1 %vm131_vm0, %v87_v63  ;;  %3603 = vmatpush1.bf16.msra.mxu0 %v5774_v1  ;;  %v5805_v23 = vpack.c.bf16 %v479_v16, %v475_v15  ;;  %v485_v25 = vld [vmem:[#allocation6 + $0x168] sm:$0xff]  ;;  %v483_v28 = vld [vmem:[#allocation6 + $0x158] sm:$0xff]  ;;  %v480_v33 = vld [vmem:[#allocation6 + $0x140] sm:$0xff] }
  0x60   :  { %3635 = vmatpush1.bf16.msra.mxu1 %v5778_v4  ;;  %238 = vmatprep.mubr.f32.mxu0 %v6955_v0  ;;  %v487_v31 = vld [vmem:[#allocation6 + $0x178] sm:$0xff]  ;;  %v484_v34 = vld [vmem:[#allocation6 + $0x160] sm:$0xff]  ;;  %v5820_v36 = vpack.c.bf16 %v485_v25, %v481_v24  ;;  %v482_v37 = vld [vmem:[#allocation6 + $0x150] sm:$0xff] }
  0x61   :  { %351 = vmatprep.mubr.f32.mxu1 %v6955_v0  ;;  %3605 = vmatprep.subr.bf16.mxu0 %v5782_v7  ;;  %v486_v39 = vld [vmem:[#allocation6 + $0x170] sm:$0xff]  ;;  %v5824_v40 = vpack.c.bf16 %v487_v31, %v483_v28  ;;  %v489_v41 = vld [vmem:[#allocation6 + $0x188] sm:$0xff]  ;;  %v5831_v45 = vpack.c.bf16 %v484_v34, %v480_v33  ;;  %v491_v46 = vld [vmem:[#allocation6 + $0x198] sm:$0xff] }
  0x62   :  { %3462 = vmatmul.mubr.msk.f32.gmra.mrb[6].mxu0 %vm131_vm0, %v88_v13  ;;  %3637 = vmatprep.subr.bf16.mxu1 %v5786_v10  ;;  %v493_v43 = vld [vmem:[#allocation6 + $0x1a8] sm:$0xff]  ;;  %v495_v48 = vld [vmem:[#allocation6 + $0x1b8] sm:$0xff]  ;;  %v5835_v49 = vpack.c.bf16 %v486_v39, %v482_v37  ;;  %v488_v51 = vld [vmem:[#allocation6 + $0x180] sm:$0xff] }
  0x63   :  { %3470 = vmatmul.mubr.msk.f32.gmra.mrb[6].mxu1 %vm131_vm0, %v88_v13  ;;  %3607 = vmatpush1.bf16.msra.mxu0 %v5793_v14  ;;  %v90_v44 = vld [vmem:[%s6946_s0 + $0x28] sm:$0xff]  ;;  %v492_v52 = vld [vmem:[#allocation6 + $0x1a0] sm:$0xff]  ;;  %v5839_v53 = vpack.c.bf16 %v493_v43, %v489_v41  ;;  %v490_v55 = vld [vmem:[#allocation6 + $0x190] sm:$0xff]  ;;  %v5843_v58 = vpack.c.bf16 %v495_v48, %v491_v46 }
  0x64   :  { %3639 = vmatpush1.bf16.msra.mxu1 %v5797_v17  ;;  %244 = vmatprep.mubr.f32.mxu0 %v6955_v0  ;;  %v494_v56 = vld [vmem:[#allocation6 + $0x1b0] sm:$0xff]  ;;  %v497_v59 = vld [vmem:[#allocation6 + $0x1c8] sm:$0xff]  ;;  %v5850_v63 = vpack.c.bf16 %v492_v52, %v488_v51  ;;  %v499_v2 = vld [vmem:[#allocation6 + $0x1d8] sm:$0xff] }
  0x65   :  { %357 = vmatprep.mubr.f32.mxu1 %v6955_v0  ;;  %3609 = vmatprep.subr.bf16.mxu0 %v5801_v20  ;;  %v501_v61 = vld [vmem:[#allocation6 + $0x1e8] sm:$0xff]  ;;  %v91_v62 = vld [vmem:[%s6946_s0 + $0x30] sm:$0xff]  ;;  %v503_v3 = vld [vmem:[#allocation6 + $0x1f8] sm:$0xff]  ;;  %v5854_v5 = vpack.c.bf16 %v494_v56, %v490_v55 }
  0x66   :  { %3463 = vmatmul.mubr.msk.f32.gmra.mrb[8].mxu0 %vm131_vm0, %v89_v26  ;;  %3641 = vmatprep.subr.bf16.mxu1 %v5805_v23  ;;  %v496_v6 = vld [vmem:[#allocation6 + $0x1c0] sm:$0xff]  ;;  %v5858_v9 = vpack.c.bf16 %v501_v61, %v497_v59  ;;  %v498_v11 = vld [vmem:[#allocation6 + $0x1d0] sm:$0xff]  ;;  %v5862_v13 = vpack.c.bf16 %v503_v3, %v499_v2  ;;  %v675_v15 = vld [vmem:[#allocation8 + $0x8] sm:$0xff] }
  0x67   :  { %3471 = vmatmul.mubr.msk.f32.gmra.mrb[8].mxu1 %vm131_vm0, %v89_v26  ;;  %3611 = vmatpush1.bf16.msra.mxu0 %v5812_v27  ;;  %v500_v8 = vld [vmem:[#allocation6 + $0x1e0] sm:$0xff]  ;;  %v502_v12 = vld [vmem:[#allocation6 + $0x1f0] sm:$0xff]  ;;  %v679_v16 = vld [vmem:[#allocation8 + $0x28] sm:$0xff] }
  0x68   :  { %3643 = vmatpush1.bf16.msra.mxu1 %v5816_v32  ;;  %250 = vmatprep.mubr.f32.mxu0 %v6955_v0  ;;  %v92_v18 = vld [vmem:[%s6946_s0 + $0x38] sm:$0xff]  ;;  %v5869_v19 = vpack.c.bf16 %v500_v8, %v496_v6  ;;  %v5873_v24 = vpack.c.bf16 %v502_v12, %v498_v11  ;;  %v674_v25 = vld [vmem:[#allocation8] sm:$0xff]  ;;  %v676_v28 = vld [vmem:[#allocation8 + $0x10] sm:$0xff]  ;;  %v5877_v31 = vpack.c.bf16 %v679_v16, %v675_v15 }
  0x69   :  { %363 = vmatprep.mubr.f32.mxu1 %v6955_v0  ;;  %3613 = vmatprep.subr.bf16.mxu0 %v5820_v36  ;;  %v677_v21 = vld [vmem:[#allocation8 + $0x18] sm:$0xff]  ;;  %v678_v26 = vld [vmem:[#allocation8 + $0x20] sm:$0xff]  ;;  %v680_v33 = vld [vmem:[#allocation8 + $0x30] sm:$0xff] }
  0x6a   :  { %3464 = vmatmul.mubr.msk.f32.gmra.mrb[10].mxu0 %vm131_vm0, %v90_v44  ;;  %3645 = vmatprep.subr.bf16.mxu1 %v5824_v40  ;;  %v681_v22 = vld [vmem:[#allocation8 + $0x38] sm:$0xff]  ;;  %v683_v34 = vld [vmem:[#allocation8 + $0x48] sm:$0xff]  ;;  %v5889_v46 = vpack.c.bf16 %v680_v33, %v676_v28  ;;  %v682_v51 = vld [vmem:[#allocation8 + $0x40] sm:$0xff] }
  0x6b   :  { %3472 = vmatmul.mubr.msk.f32.gmra.mrb[10].mxu1 %vm131_vm0, %v90_v44  ;;  %3615 = vmatpush1.bf16.msra.mxu0 %v5831_v45  ;;  %v687_v37 = vld [vmem:[#allocation8 + $0x68] sm:$0xff]  ;;  %v5881_v39 = vpack.c.bf16 %v681_v22, %v677_v21  ;;  %v685_v41 = vld [vmem:[#allocation8 + $0x58] sm:$0xff]  ;;  %v5885_v44 = vpack.c.bf16 %v678_v26, %v674_v25  ;;  %v686_v52 = vld [vmem:[#allocation8 + $0x60] sm:$0xff] }
  0x6c   :  { %3647 = vmatpush1.bf16.msra.mxu1 %v5835_v49  ;;  %256 = vmatprep.mubr.f32.mxu0 %v6955_v0  ;;  %v689_v43 = vld [vmem:[#allocation8 + $0x78] sm:$0xff]  ;;  %v5891_v48 = vpack.c.bf16 %v687_v37, %v683_v34  ;;  %v684_v55 = vld [vmem:[#allocation8 + $0x50] sm:$0xff]  ;;  %v691_v61 = vld [vmem:[#allocation8 + $0x88] sm:$0xff]  ;;  %v5901_v6 = vpack.c.bf16 %v686_v52, %v682_v51 }
  0x6d   :  { %369 = vmatprep.mubr.f32.mxu1 %v6955_v0  ;;  %3617 = vmatprep.subr.bf16.mxu0 %v5839_v53  ;;  %v5895_v56 = vpack.c.bf16 %v689_v43, %v685_v41  ;;  %v688_v59 = vld [vmem:[#allocation8 + $0x70] sm:$0xff]  ;;  %v693_v2 = vld [vmem:[#allocation8 + $0x98] sm:$0xff]  ;;  %v690_v12 = vld [vmem:[#allocation8 + $0x80] sm:$0xff] }
  0x6e   :  { %3465 = vmatmul.mubr.msk.f32.gmra.mrb[12].mxu0 %vm131_vm0, %v91_v62  ;;  %3649 = vmatprep.subr.bf16.mxu1 %v5843_v58  ;;  %v697_v3 = vld [vmem:[#allocation8 + $0xb8] sm:$0xff]  ;;  %v5905_v8 = vpack.c.bf16 %v688_v59, %v684_v55  ;;  %v694_v15 = vld [vmem:[#allocation8 + $0xa0] sm:$0xff]  ;;  %v692_v16 = vld [vmem:[#allocation8 + $0x90] sm:$0xff] }
  0x6f   :  { %3473 = vmatmul.mubr.msk.f32.gmra.mrb[12].mxu1 %vm131_vm0, %v91_v62  ;;  %3619 = vmatpush1.bf16.msra.mxu0 %v5850_v63  ;;  %v695_v62 = vld [vmem:[#allocation8 + $0xa8] sm:$0xff]  ;;  %v696_v21 = vld [vmem:[#allocation8 + $0xb0] sm:$0xff]  ;;  %v701_v26 = vld [vmem:[#allocation8 + $0xd8] sm:$0xff]  ;;  %v5915_v33 = vpack.c.bf16 %v694_v15, %v690_v12 }
  0x70   :  { %3651 = vmatpush1.bf16.msra.mxu1 %v5854_v5  ;;  %262 = vmatprep.mubr.f32.mxu0 %v6955_v0  ;;  %v5907_v11 = vpack.c.bf16 %v695_v62, %v691_v61  ;;  %v699_v22 = vld [vmem:[#allocation8 + $0xc8] sm:$0xff]  ;;  %v705_v28 = vld [vmem:[#allocation8 + $0xf8] sm:$0xff]  ;;  %v5919_v34 = vpack.c.bf16 %v696_v21, %v692_v16  ;;  %v698_v41 = vld [vmem:[#allocation8 + $0xc0] sm:$0xff] }
  0x71   :  { %375 = vmatprep.mubr.f32.mxu1 %v6955_v0  ;;  %3621 = vmatprep.subr.bf16.mxu0 %v5858_v9  ;;  %v703_v25 = vld [vmem:[#allocation8 + $0xe8] sm:$0xff]  ;;  %7091 = vst [vmem:[#allocation18_spill] sm:$0xff] %v5915_v33  ;;  %v702_v43 = vld [vmem:[#allocation8 + $0xe0] sm:$0xff]  ;;  %v700_v51 = vld [vmem:[#allocation8 + $0xd0] sm:$0xff]  ;;  %v5924_v52 = vpack.c.bf16 %v705_v28, %v701_v26 }
  0x72   :  { %3466 = vmatmul.mubr.msk.f32.gmra.mrb[14].mxu0 %vm131_vm0, %v92_v18  ;;  %3653 = vmatprep.subr.bf16.mxu1 %v5862_v13  ;;  %7092 = vst [vmem:[#allocation19_spill] sm:$0xff] %v5919_v34  ;;  %v5921_v37 = vpack.c.bf16 %v703_v25, %v699_v22  ;;  %v704_v55 = vld [vmem:[#allocation8 + $0xf0] sm:$0xff]  ;;  %v707_v59 = vld [vmem:[#allocation8 + $0x108] sm:$0xff]  ;;  %v709_v62 = vld [vmem:[#allocation8 + $0x118] sm:$0xff] }
  0x73   :  { %3474 = vmatmul.mubr.msk.f32.gmra.mrb[14].mxu1 %vm131_vm0, %v92_v18  ;;  %3623 = vmatpush1.bf16.msra.mxu0 %v5869_v19  ;;  %v5910_v18 = vpack.c.bf16 %v697_v3, %v693_v2  ;;  %7094 = vst [vmem:[#allocation21_spill] sm:$0xff] %v5924_v52  ;;  %v711_v61 = vld [vmem:[#allocation8 + $0x128] sm:$0xff]  ;;  %v713_v2 = vld [vmem:[#allocation8 + $0x138] sm:$0xff]  ;;  %v5927_v3 = vpack.c.bf16 %v702_v43, %v698_v41  ;;  %v706_v16 = vld [vmem:[#allocation8 + $0x100] sm:$0xff] }
  0x74   :  { %3655 = vmatpush1.bf16.msra.mxu1 %v5873_v24  ;;  %568 = vmatprep.mubr.f32.mxu0 %v6955_v0  ;;  %7093 = vst [vmem:[#allocation20_spill] sm:$0xff] %v5921_v37  ;;  %v5931_v12 = vpack.c.bf16 %v704_v55, %v700_v51  ;;  %v5933_v15 = vpack.c.bf16 %v711_v61, %v707_v59  ;;  %v710_v21 = vld [vmem:[#allocation8 + $0x120] sm:$0xff]  ;;  %v708_v25 = vld [vmem:[#allocation8 + $0x110] sm:$0xff]  ;;  %v715_v43 = vld [vmem:[#allocation8 + $0x148] sm:$0xff] }
  0x75   :  { %639 = vmatprep.mubr.f32.mxu1 %v6955_v0  ;;  %3657 = vmatprep.subr.bf16.mxu0 %v5877_v31  ;;  %7095 = vst [vmem:[#allocation22_spill] sm:$0xff] %v5927_v3  ;;  %v5936_v22 = vpack.c.bf16 %v713_v2, %v709_v62  ;;  %v712_v26 = vld [vmem:[#allocation8 + $0x130] sm:$0xff]  ;;  %v5939_v28 = vpack.c.bf16 %v710_v21, %v706_v16  ;;  %v719_v51 = vld [vmem:[#allocation8 + $0x168] sm:$0xff]  ;;  %v717_v55 = vld [vmem:[#allocation8 + $0x158] sm:$0xff] }
  0x76   :  { %569 = vmatmul.mubr.f32.vlgmr.msra.gmra.mrb[0].mxu0 %v6955_v0  ;;  %3721 = vmatprep.subr.bf16.mxu1 %v5881_v39  ;;  %7096 = vst [vmem:[#allocation23_spill] sm:$0xff] %v5931_v12  ;;  %7097 = vst [vmem:[#allocation24_spill] sm:$0xff] %v5933_v15  ;;  %v5943_v41 = vpack.c.bf16 %v712_v26, %v708_v25  ;;  %v5948_v59 = vpack.c.bf16 %v719_v51, %v715_v43  ;;  %v721_v61 = vld [vmem:[#allocation8 + $0x178] sm:$0xff]  ;;  %v714_v62 = vld [vmem:[#allocation8 + $0x140] sm:$0xff] }
  0x77   :  { %640 = vmatmul.mubr.f32.vlgmr.msra.gmra.mrb[0].mxu1 %v6955_v0  ;;  %3659 = vmatpush1.bf16.msra.mxu0 %v5885_v44  ;;  %7098 = vst [vmem:[#allocation25_spill] sm:$0xff] %v5936_v22  ;;  %7099 = vst [vmem:[#allocation26_spill] sm:$0xff] %v5939_v28  ;;  %v718_v2 = vld [vmem:[#allocation8 + $0x160] sm:$0xff]  ;;  %v5950_v16 = vpack.c.bf16 %v721_v61, %v717_v55  ;;  %v716_v25 = vld [vmem:[#allocation8 + $0x150] sm:$0xff] }
  0x78   :  { %3723 = vmatpush1.bf16.msra.mxu1 %v5889_v46  ;;  %3661 = vmatprep.subr.bf16.mxu0 %v5891_v48  ;;  %7100 = vst [vmem:[#allocation27_spill] sm:$0xff] %v5943_v41  ;;  %7101 = vst [vmem:[#allocation28_spill] sm:$0xff] %v5948_v59  ;;  %v5952_v21 = vpack.c.bf16 %v718_v2, %v714_v62  ;;  %v720_v26 = vld [vmem:[#allocation8 + $0x170] sm:$0xff]  ;;  %v727_v43 = vld [vmem:[#allocation8 + $0x1a8] sm:$0xff] }
  0x79   :  { %3725 = vmatprep.subr.bf16.mxu1 %v5895_v56  ;;  %866 = vmatprep.mubr.f32.mxu0 %v6955_v0  ;;  %7102 = vst [vmem:[#allocation29_spill] sm:$0xff] %v5950_v16  ;;  %v725_v51 = vld [vmem:[#allocation8 + $0x198] sm:$0xff]  ;;  %v722_v61 = vld [vmem:[#allocation8 + $0x180] sm:$0xff] }
  0x7a   :  { %937 = vmatprep.mubr.f32.mxu1 %v6955_v0  ;;  %7103 = vst [vmem:[#allocation30_spill] sm:$0xff] %v5952_v21  ;;  %v5955_v0 = vpack.c.bf16 %v720_v26, %v716_v25  ;;  %v729_v55 = vld [vmem:[#allocation8 + $0x1b8] sm:$0xff]  ;;  %v726_v62 = vld [vmem:[#allocation8 + $0x1a0] sm:$0xff]  ;;  %v724_v25 = vld [vmem:[#allocation8 + $0x190] sm:$0xff] }
  0x7b   :  { %3663 = vmatpush1.bf16.msra.mxu0 %v5901_v6  ;;  %v5962_v2 = vpack.c.bf16 %v729_v55, %v725_v51  ;;  %v728_v26 = vld [vmem:[#allocation8 + $0x1b0] sm:$0xff]  ;;  %v737_v51 = vld [vmem:[#allocation8 + $0x1f8] sm:$0xff]  ;;  %v730_v55 = vld [vmem:[#allocation8 + $0x1c0] sm:$0xff] }
  0x7c   :  { %3727 = vmatpush1.bf16.msra.mxu1 %v5905_v8  ;;  %3665 = vmatprep.subr.bf16.mxu0 %v5907_v11  ;;  %7104 = vst [vmem:[#allocation31_spill] sm:$0xff] %v5955_v0 }
  0x7d   :  { %3729 = vmatprep.subr.bf16.mxu1 %v5910_v18  ;;  %7106 = vst [vmem:[#allocation33_spill] sm:$0xff] %v5962_v2 }
  0x7f   :  { %3667 = vmatpush1.bf16.msra.mxu0 %v5915_v33 }
  0x80   :  { %3731 = vmatpush1.bf16.msra.mxu1 %v5919_v34  ;;  %3669 = vmatprep.subr.bf16.mxu0 %v5921_v37 }
  0x81   :  { %3733 = vmatprep.subr.bf16.mxu1 %v5924_v52 }
  0x83   :  { %3671 = vmatpush1.bf16.msra.mxu0 %v5927_v3 }
  0x84   :  { %3735 = vmatpush1.bf16.msra.mxu1 %v5931_v12  ;;  %3673 = vmatprep.subr.bf16.mxu0 %v5933_v15  ;;  %v789_v15 = vld [vmem:[#allocation8 + $0x398] sm:$0xff] }
  0x85   :  { %3737 = vmatprep.subr.bf16.mxu1 %v5936_v22  ;;  %v5964_v22 = vpack.c.bf16 %v726_v62, %v722_v61  ;;  %v734_v61 = vld [vmem:[#allocation8 + $0x1e0] sm:$0xff]  ;;  %v793_v12 = vld [vmem:[#allocation8 + $0x3b8] sm:$0xff] }
  0x87   :  { %3675 = vmatpush1.bf16.msra.mxu0 %v5939_v28  ;;  %7107 = vst [vmem:[#allocation34_spill] sm:$0xff] %v5964_v22 }
  0x88   :  { %3739 = vmatpush1.bf16.msra.mxu1 %v5943_v41  ;;  %3677 = vmatprep.subr.bf16.mxu0 %v5948_v59  ;;  %v723_v41 = vld [vmem:[#allocation8 + $0x188] sm:$0xff]  ;;  %v5976_v59 = vpack.c.bf16 %v734_v61, %v730_v55  ;;  %v742_v55 = vld [vmem:[#allocation8 + $0x220] sm:$0xff] }
  0x89   :  { %3741 = vmatprep.subr.bf16.mxu1 %v5950_v16  ;;  %v5960_v28 = vpack.c.bf16 %v727_v43, %v723_v41  ;;  %v5967_v16 = vpack.c.bf16 %v728_v26, %v724_v25  ;;  %v735_v41 = vld [vmem:[#allocation8 + $0x1e8] sm:$0xff]  ;;  %v733_v43 = vld [vmem:[#allocation8 + $0x1d8] sm:$0xff]  ;;  %v732_v25 = vld [vmem:[#allocation8 + $0x1d0] sm:$0xff] }
  0x8a   :  { %v5974_v62 = vpack.c.bf16 %v737_v51, %v733_v43  ;;  %7111 = vst [vmem:[#allocation38_spill] sm:$0xff] %v5976_v59  ;;  %v736_v26 = vld [vmem:[#allocation8 + $0x1f0] sm:$0xff]  ;;  %v745_v43 = vld [vmem:[#allocation8 + $0x238] sm:$0xff]  ;;  %v738_v51 = vld [vmem:[#allocation8 + $0x200] sm:$0xff] }
  0x8b   :  { %3679 = vmatpush1.bf16.msra.mxu0 %v5952_v21  ;;  %7105 = vst [vmem:[#allocation32_spill] sm:$0xff] %v5960_v28  ;;  %7108 = vst [vmem:[#allocation35_spill] sm:$0xff] %v5967_v16 }
  0x8c   :  { %3743 = vmatpush1.bf16.msra.mxu1 %v5955_v0  ;;  %3681 = vmatprep.subr.bf16.mxu0 %v5960_v28  ;;  %v731_v0 = vld [vmem:[#allocation8 + $0x1c8] sm:$0xff]  ;;  %7110 = vst [vmem:[#allocation37_spill] sm:$0xff] %v5974_v62  ;;  %v5988_v28 = vpack.c.bf16 %v742_v55, %v738_v51  ;;  %v750_v51 = vld [vmem:[#allocation8 + $0x260] sm:$0xff] }
  0x8d   :  { %3745 = vmatprep.subr.bf16.mxu1 %v5962_v2  ;;  %v5972_v21 = vpack.c.bf16 %v735_v41, %v731_v0  ;;  %v5979_v2 = vpack.c.bf16 %v736_v26, %v732_v25  ;;  %v743_v0 = vld [vmem:[#allocation8 + $0x228] sm:$0xff]  ;;  %v741_v41 = vld [vmem:[#allocation8 + $0x218] sm:$0xff]  ;;  %v740_v25 = vld [vmem:[#allocation8 + $0x210] sm:$0xff] }
  0x8e   :  { %v5986_v61 = vpack.c.bf16 %v745_v43, %v741_v41  ;;  %7115 = vst [vmem:[#allocation42_spill] sm:$0xff] %v5988_v28  ;;  %v744_v26 = vld [vmem:[#allocation8 + $0x230] sm:$0xff]  ;;  %v753_v41 = vld [vmem:[#allocation8 + $0x278] sm:$0xff]  ;;  %v746_v43 = vld [vmem:[#allocation8 + $0x240] sm:$0xff] }
  0x8f   :  { %3683 = vmatpush1.bf16.msra.mxu0 %v5964_v22  ;;  %7109 = vst [vmem:[#allocation36_spill] sm:$0xff] %v5972_v21  ;;  %7112 = vst [vmem:[#allocation39_spill] sm:$0xff] %v5979_v2 }
  0x90   :  { %3747 = vmatpush1.bf16.msra.mxu1 %v5967_v16  ;;  %3685 = vmatprep.subr.bf16.mxu0 %v5972_v21  ;;  %v739_v16 = vld [vmem:[#allocation8 + $0x208] sm:$0xff]  ;;  %7114 = vst [vmem:[#allocation41_spill] sm:$0xff] %v5986_v61  ;;  %v6000_v21 = vpack.c.bf16 %v750_v51, %v746_v43  ;;  %v758_v43 = vld [vmem:[#allocation8 + $0x2a0] sm:$0xff] }
  0x91   :  { %3749 = vmatprep.subr.bf16.mxu1 %v5974_v62  ;;  %v5984_v22 = vpack.c.bf16 %v743_v0, %v739_v16  ;;  %v5991_v62 = vpack.c.bf16 %v744_v26, %v740_v25  ;;  %v751_v16 = vld [vmem:[#allocation8 + $0x268] sm:$0xff]  ;;  %v749_v0 = vld [vmem:[#allocation8 + $0x258] sm:$0xff]  ;;  %v748_v25 = vld [vmem:[#allocation8 + $0x250] sm:$0xff] }
  0x92   :  { %v5998_v55 = vpack.c.bf16 %v753_v41, %v749_v0  ;;  %7119 = vst [vmem:[#allocation46_spill] sm:$0xff] %v6000_v21  ;;  %v752_v26 = vld [vmem:[#allocation8 + $0x270] sm:$0xff]  ;;  %v761_v0 = vld [vmem:[#allocation8 + $0x2b8] sm:$0xff]  ;;  %v754_v41 = vld [vmem:[#allocation8 + $0x280] sm:$0xff] }
  0x93   :  { %3687 = vmatpush1.bf16.msra.mxu0 %v5976_v59  ;;  %7113 = vst [vmem:[#allocation40_spill] sm:$0xff] %v5984_v22  ;;  %7116 = vst [vmem:[#allocation43_spill] sm:$0xff] %v5991_v62 }
  0x94   :  { %3751 = vmatpush1.bf16.msra.mxu1 %v5979_v2  ;;  %3689 = vmatprep.subr.bf16.mxu0 %v5984_v22  ;;  %v747_v2 = vld [vmem:[#allocation8 + $0x248] sm:$0xff]  ;;  %7118 = vst [vmem:[#allocation45_spill] sm:$0xff] %v5998_v55  ;;  %v6012_v22 = vpack.c.bf16 %v758_v43, %v754_v41  ;;  %v766_v41 = vld [vmem:[#allocation8 + $0x2e0] sm:$0xff] }
  0x95   :  { %3753 = vmatprep.subr.bf16.mxu1 %v5986_v61  ;;  %v5996_v59 = vpack.c.bf16 %v751_v16, %v747_v2  ;;  %v6003_v61 = vpack.c.bf16 %v752_v26, %v748_v25  ;;  %v759_v2 = vld [vmem:[#allocation8 + $0x2a8] sm:$0xff]  ;;  %v757_v16 = vld [vmem:[#allocation8 + $0x298] sm:$0xff]  ;;  %v756_v25 = vld [vmem:[#allocation8 + $0x290] sm:$0xff] }
  0x96   :  { %v6010_v51 = vpack.c.bf16 %v761_v0, %v757_v16  ;;  %7123 = vst [vmem:[#allocation50_spill] sm:$0xff] %v6012_v22  ;;  %v760_v26 = vld [vmem:[#allocation8 + $0x2b0] sm:$0xff]  ;;  %v769_v16 = vld [vmem:[#allocation8 + $0x2f8] sm:$0xff]  ;;  %v762_v0 = vld [vmem:[#allocation8 + $0x2c0] sm:$0xff] }
  0x97   :  { %3691 = vmatpush1.bf16.msra.mxu0 %v5988_v28  ;;  %7117 = vst [vmem:[#allocation44_spill] sm:$0xff] %v5996_v59  ;;  %7120 = vst [vmem:[#allocation47_spill] sm:$0xff] %v6003_v61 }
  0x98   :  { %3755 = vmatpush1.bf16.msra.mxu1 %v5991_v62  ;;  %3693 = vmatprep.subr.bf16.mxu0 %v5996_v59  ;;  %v755_v62 = vld [vmem:[#allocation8 + $0x288] sm:$0xff]  ;;  %7122 = vst [vmem:[#allocation49_spill] sm:$0xff] %v6010_v51  ;;  %v6024_v59 = vpack.c.bf16 %v766_v41, %v762_v0  ;;  %v774_v0 = vld [vmem:[#allocation8 + $0x320] sm:$0xff] }
  0x99   :  { %3757 = vmatprep.subr.bf16.mxu1 %v5998_v55  ;;  %v6008_v28 = vpack.c.bf16 %v759_v2, %v755_v62  ;;  %v6015_v55 = vpack.c.bf16 %v760_v26, %v756_v25  ;;  %v767_v62 = vld [vmem:[#allocation8 + $0x2e8] sm:$0xff]  ;;  %v765_v2 = vld [vmem:[#allocation8 + $0x2d8] sm:$0xff]  ;;  %v764_v25 = vld [vmem:[#allocation8 + $0x2d0] sm:$0xff] }
  0x9a   :  { %v6022_v43 = vpack.c.bf16 %v769_v16, %v765_v2  ;;  %7127 = vst [vmem:[#allocation54_spill] sm:$0xff] %v6024_v59  ;;  %v768_v26 = vld [vmem:[#allocation8 + $0x2f0] sm:$0xff]  ;;  %v777_v2 = vld [vmem:[#allocation8 + $0x338] sm:$0xff]  ;;  %v770_v16 = vld [vmem:[#allocation8 + $0x300] sm:$0xff] }
  0x9b   :  { %3695 = vmatpush1.bf16.msra.mxu0 %v6000_v21  ;;  %7121 = vst [vmem:[#allocation48_spill] sm:$0xff] %v6008_v28  ;;  %7124 = vst [vmem:[#allocation51_spill] sm:$0xff] %v6015_v55 }
  0x9c   :  { %3759 = vmatpush1.bf16.msra.mxu1 %v6003_v61  ;;  %3697 = vmatprep.subr.bf16.mxu0 %v6008_v28  ;;  %v763_v61 = vld [vmem:[#allocation8 + $0x2c8] sm:$0xff]  ;;  %7126 = vst [vmem:[#allocation53_spill] sm:$0xff] %v6022_v43  ;;  %v6036_v28 = vpack.c.bf16 %v774_v0, %v770_v16  ;;  %v782_v16 = vld [vmem:[#allocation8 + $0x360] sm:$0xff] }
  0x9d   :  { %3761 = vmatprep.subr.bf16.mxu1 %v6010_v51  ;;  %v6020_v21 = vpack.c.bf16 %v767_v62, %v763_v61  ;;  %v6027_v51 = vpack.c.bf16 %v768_v26, %v764_v25  ;;  %v775_v61 = vld [vmem:[#allocation8 + $0x328] sm:$0xff]  ;;  %v773_v62 = vld [vmem:[#allocation8 + $0x318] sm:$0xff]  ;;  %v772_v25 = vld [vmem:[#allocation8 + $0x310] sm:$0xff] }
  0x9e   :  { %v6034_v41 = vpack.c.bf16 %v777_v2, %v773_v62  ;;  %7131 = vst [vmem:[#allocation58_spill] sm:$0xff] %v6036_v28  ;;  %v776_v26 = vld [vmem:[#allocation8 + $0x330] sm:$0xff]  ;;  %v785_v62 = vld [vmem:[#allocation8 + $0x378] sm:$0xff]  ;;  %v778_v2 = vld [vmem:[#allocation8 + $0x340] sm:$0xff] }
  0x9f   :  { %3699 = vmatpush1.bf16.msra.mxu0 %v6012_v22  ;;  %7125 = vst [vmem:[#allocation52_spill] sm:$0xff] %v6020_v21  ;;  %7128 = vst [vmem:[#allocation55_spill] sm:$0xff] %v6027_v51 }
  0xa0   :  { %3763 = vmatpush1.bf16.msra.mxu1 %v6015_v55  ;;  %3701 = vmatprep.subr.bf16.mxu0 %v6020_v21  ;;  %v771_v55 = vld [vmem:[#allocation8 + $0x308] sm:$0xff]  ;;  %7130 = vst [vmem:[#allocation57_spill] sm:$0xff] %v6034_v41  ;;  %v6048_v21 = vpack.c.bf16 %v782_v16, %v778_v2  ;;  %v788_v2 = vld [vmem:[#allocation8 + $0x390] sm:$0xff] }
  0xa1   :  { %3765 = vmatprep.subr.bf16.mxu1 %v6022_v43  ;;  %v6032_v22 = vpack.c.bf16 %v775_v61, %v771_v55  ;;  %v6039_v43 = vpack.c.bf16 %v776_v26, %v772_v25  ;;  %v783_v55 = vld [vmem:[#allocation8 + $0x368] sm:$0xff]  ;;  %v781_v61 = vld [vmem:[#allocation8 + $0x358] sm:$0xff]  ;;  %v780_v25 = vld [vmem:[#allocation8 + $0x350] sm:$0xff] }
  0xa2   :  { %v6046_v0 = vpack.c.bf16 %v785_v62, %v781_v61  ;;  %7135 = vst [vmem:[#allocation62_spill] sm:$0xff] %v6048_v21  ;;  %v784_v26 = vld [vmem:[#allocation8 + $0x370] sm:$0xff]  ;;  %v786_v61 = vld [vmem:[#allocation8 + $0x380] sm:$0xff] }
  0xa3   :  { %3703 = vmatpush1.bf16.msra.mxu0 %v6024_v59  ;;  %7129 = vst [vmem:[#allocation56_spill] sm:$0xff] %v6032_v22  ;;  %7132 = vst [vmem:[#allocation59_spill] sm:$0xff] %v6039_v43  ;;  %v790_v62 = vld [vmem:[#allocation8 + $0x3a0] sm:$0xff] }
  0xa4   :  { %3767 = vmatpush1.bf16.msra.mxu1 %v6027_v51  ;;  %3705 = vmatprep.subr.bf16.mxu0 %v6032_v22  ;;  %v779_v51 = vld [vmem:[#allocation8 + $0x348] sm:$0xff]  ;;  %7134 = vst [vmem:[#allocation61_spill] sm:$0xff] %v6046_v0  ;;  %v6060_v16 = vpack.c.bf16 %v790_v62, %v786_v61  ;;  %v800_v61 = vld [vmem:[#allocation8 + $0x3f0] sm:$0xff] }
  0xa5   :  { %3769 = vmatprep.subr.bf16.mxu1 %v6034_v41  ;;  %v6044_v59 = vpack.c.bf16 %v783_v55, %v779_v51  ;;  %v787_v22 = vld [vmem:[#allocation8 + $0x388] sm:$0xff]  ;;  %v6057_v55 = vpack.c.bf16 %v793_v12, %v789_v15  ;;  %v797_v12 = vld [vmem:[#allocation8 + $0x3d8] sm:$0xff] }
  0xa6   :  { %v791_v41 = vld [vmem:[#allocation8 + $0x3a8] sm:$0xff]  ;;  %7139 = vst [vmem:[#allocation66_spill] sm:$0xff] %v6060_v16  ;;  %v801_v15 = vld [vmem:[#allocation8 + $0x3f8] sm:$0xff] }
  0xa7   :  { %3707 = vmatpush1.bf16.msra.mxu0 %v6036_v28  ;;  %7133 = vst [vmem:[#allocation60_spill] sm:$0xff] %v6044_v59  ;;  %v6051_v28 = vpack.c.bf16 %v784_v26, %v780_v25  ;;  %v6055_v51 = vpack.c.bf16 %v791_v41, %v787_v22  ;;  %7138 = vst [vmem:[#allocation65_spill] sm:$0xff] %v6057_v55  ;;  %v792_v25 = vld [vmem:[#allocation8 + $0x3b0] sm:$0xff]  ;;  %v795_v26 = vld [vmem:[#allocation8 + $0x3c8] sm:$0xff] }
  0xa8   :  { %3771 = vmatpush1.bf16.msra.mxu1 %v6039_v43  ;;  %3709 = vmatprep.subr.bf16.mxu0 %v6044_v59  ;;  %v799_v59 = vld [vmem:[#allocation8 + $0x3e8] sm:$0xff]  ;;  %v794_v41 = vld [vmem:[#allocation8 + $0x3c0] sm:$0xff] }
  0xa9   :  { %7136 = vst [vmem:[#allocation63_spill] sm:$0xff] %v6051_v28  ;;  %3773 = vmatprep.subr.bf16.mxu1 %v6046_v0  ;;  %7137 = vst [vmem:[#allocation64_spill] sm:$0xff] %v6055_v51  ;;  %v6064_v0 = vpack.c.bf16 %v792_v25, %v788_v2  ;;  %v6066_v22 = vpack.c.bf16 %v799_v59, %v795_v26  ;;  %v798_v43 = vld [vmem:[#allocation8 + $0x3e0] sm:$0xff]  ;;  %v111_v59 = vlaneseq }
  0xaa   :  { %v6071_v62 = vpack.c.bf16 %v798_v43, %v794_v41 }
  0xab   :  { %3711 = vmatpush1.bf16.msra.mxu0 %v6048_v21  ;;  %7140 = vst [vmem:[#allocation67_spill] sm:$0xff] %v6064_v0  ;;  %7141 = vst [vmem:[#allocation68_spill] sm:$0xff] %v6066_v22  ;;  %v6068_v21 = vpack.c.bf16 %v801_v15, %v797_v12  ;;  %v6082_v25 = vshrl.u32 %v111_v59, 7 }
  0xac   :  { %3775 = vmatpush1.bf16.msra.mxu1 %v6051_v28  ;;  %3713 = vmatprep.subr.bf16.mxu0 %v6055_v51  ;;  %v796_v28 = vld [vmem:[#allocation8 + $0x3d0] sm:$0xff]  ;;  %7143 = vst [vmem:[#allocation70_spill] sm:$0xff] %v6071_v62 }
  0xad   :  { %3777 = vmatprep.subr.bf16.mxu1 %v6057_v55  ;;  %7142 = vst [vmem:[#allocation69_spill] sm:$0xff] %v6068_v21  ;;  %v6075_v2 = vpack.c.bf16 %v800_v61, %v796_v28  ;;  %7145 = vst [vmem:[#allocation72_spill] sm:$0xff] %v6082_v25  ;;  %v7051_v43 = vsub.s32 0, %v6082_v25  ;;  %v109_v28 = vld [vmem:[%s6949_s3] sm:$0xf]  ;;  %v7052_v26 = vsub.s32 1, %v6082_v25 }
  0xae   :  { %v7059_v61 = vsub.s32 3, %v6082_v25 }
  0xaf   :  { %3715 = vmatpush1.bf16.msra.mxu0 %v6060_v16  ;;  %7144 = vst [vmem:[#allocation71_spill] sm:$0xff] %v6075_v2  ;;  %v6091_v12 = vrot.slane %v109_v28, %v7051_v43  ;;  %v6095_v15 = vrot.slane %v109_v28, %v7052_v26  ;;  %v7068_v26 = vsub.s32 2, %v6082_v25 }
  0xb0   :  { %3779 = vmatpush1.bf16.msra.mxu1 %v6064_v0  ;;  %3717 = vmatprep.subr.bf16.mxu0 %v6066_v22  ;;  %v6102_v43 = vrot.slane %v109_v28, %v7059_v61 }
  0xb1   :  { %3781 = vmatprep.subr.bf16.mxu1 %v6068_v21  ;;  %7146 = vst [vmem:[#allocation73_spill] sm:$0xff] %v6091_v12  ;;  %7147 = vst [vmem:[#allocation74_spill] sm:$0xff] %v6095_v15 }
  0xb2   :  { %7148 = vst [vmem:[#allocation75_spill] sm:$0xff] %v6102_v43 }
  0xb3   :  { %3719 = vmatpush1.bf16.msra.mxu0 %v6071_v62 }
  0xb4   :  { %3783 = vmatpush1.bf16.msra.mxu1 %v6075_v2  ;;  %3785 = vmatprep.subr.bf16.mxu0 %v5732_v29 }
  0xb5   :  { %3817 = vmatprep.subr.bf16.mxu1 %v5734_v30 }
 0x149   :  { %v570_v41 = vpop.f32.mrb[0].mxu0 }
 0x14a   :  { %v5152_v59 = vadd.f32 %v570_v41, %v6091_v12  ;;  %v641_v30 = vpop.f32.mrb[0].mxu1  ;;  %v572_v29 = vpop.f32.mrb[1].mxu0  ;;  %v6108_v41 = vrot.slane %v109_v28, %v7068_v26  ;;  %v7164_v26 = vld [vmem:[#allocation37_spill] sm:$0xff] }
 0x14b   :  { %v5153_v2 = vadd.f32 %v572_v29, %v6095_v15  ;;  %v643_v62 = vpop.f32.mrb[1].mxu1 }
 0x14c   :  { %v3475_v21 = vmul.f32 -1.442695, %v5152_v59  ;;  %v5169_v0 = vadd.f32 %v643_v62, %v6102_v43  ;;  %v5168_v29 = vadd.f32 %v641_v30, %v6108_v41 }
 0x14d   :  { %v3476_v22 = vmul.f32 -1.442695, %v5153_v2 }
 0x14e   :  { %5228 = vpow2.f32 %v3475_v21  ;;  %v3477_v12 = vmul.f32 -1.442695, %v5169_v0 }
 0x14f   :  { %5230 = vpow2.f32 %v3476_v22 }
 0x150   :  { %5232 = vpow2.f32 %v3477_v12  ;;  %v7153_v12 = vld [vmem:[#allocation26_spill] sm:$0xff] }
 0x151   :  { %5234 = vtanh.f32 %v5168_v29  ;;  %v7155_v29 = vld [vmem:[#allocation28_spill] sm:$0xff] }
 0x158   :  { %v5229_v15 = vpop.eup %5228 }
 0x159   :  { %v5231_v59 = vpop.eup %5230  ;;  %v653_v2 = vadd.f32 1.0, %v5229_v15 }
 0x15a   :  { %v659_v61 = vadd.f32 1.0, %v5231_v59  ;;  %v5233_v21 = vpop.eup %5232  ;;  %v7156_v59 = vld [vmem:[#allocation29_spill] sm:$0xff] }
 0x15b   :  { %5236 = vrcp.f32 %v653_v2  ;;  %v5235_v16 = vpop.eup %5234  ;;  %v666_v43 = vadd.f32 1.0, %v5233_v21  ;;  %v7157_v2 = vld [vmem:[#allocation30_spill] sm:$0xff]  ;;  %v7158_v21 = vld [vmem:[#allocation31_spill] sm:$0xff] }
 0x15c   :  { %5238 = vrcp.f32 %v659_v61  ;;  %v7154_v61 = vld [vmem:[#allocation27_spill] sm:$0xff] }
 0x15d   :  { %5240 = vrcp.f32 %v666_v43  ;;  %v7152_v43 = vld [vmem:[#allocation25_spill] sm:$0xff] }
 0x165   :  { %v5237_v22 = vpop.eup %5236 }
 0x166   :  { %v5239_v55 = vpop.eup %5238  ;;  %v670_v62 = vmul.f32 %v5237_v22, %v5235_v16  ;;  %v7149_v16 = vmov 0.0   ;;  %v7159_v22 = vld [vmem:[#allocation32_spill] sm:$0xff] }
 0x167   :  { %v669_v25 = vmul.f32 0.0, %v5239_v55  ;;  %v5241_v30 = vpop.eup %5240  ;;  %v7150_v55 = vld [vmem:[#allocation23_spill] sm:$0xff] }
 0x169   :  { %v6111_v28 = vadd.f32 %v670_v62, %v669_v25  ;;  %v7151_v25 = vld [vmem:[#allocation24_spill] sm:$0xff]  ;;  %v7160_v62 = vld [vmem:[#allocation33_spill] sm:$0xff] }
 0x16b   :  { %5242 = vtanh.f32 %v6111_v28 }
 0x175   :  { %v5243_v0 = vpop.eup %5242 }
 0x176   :  { %v673_v15 = vmul.f32 %v5243_v0, %v5241_v30  ;;  %v7161_v30 = vld [vmem:[#allocation34_spill] sm:$0xff]  ;;  %v7162_v0 = vld [vmem:[#allocation35_spill] sm:$0xff] }
 0x178   :  { %867 = vmatmul.mubr.f32.vlgmr.msra.gmra.mrb[16].mxu0 %v673_v15  ;;  %938 = vmatmul.mubr.f32.vlgmr.msra.gmra.mrb[16].mxu1 %v673_v15 }
 0x179   :  { %3787 = vmatpush1.bf16.msra.mxu0 %v5739_v35  ;;  %3819 = vmatpush1.bf16.msra.mxu1 %v5742_v38 }
 0x17a   :  { %3789 = vmatprep.subr.bf16.mxu0 %v5745_v42  ;;  %3821 = vmatprep.subr.bf16.mxu1 %v5751_v47 }
 0x17b   :  { %1036 = vmatprep.mubr.f32.mxu0 %v7149_v16  ;;  %1107 = vmatprep.mubr.f32.mxu1 %v7149_v16 }
 0x17d   :  { %3791 = vmatpush1.bf16.msra.mxu0 %v5755_v50  ;;  %3823 = vmatpush1.bf16.msra.mxu1 %v5759_v54 }
 0x17e   :  { %3793 = vmatprep.subr.bf16.mxu0 %v5763_v57  ;;  %3825 = vmatprep.subr.bf16.mxu1 %v5767_v60 }
 0x181   :  { %3795 = vmatpush1.bf16.msra.mxu0 %v5774_v1  ;;  %3827 = vmatpush1.bf16.msra.mxu1 %v5778_v4 }
 0x182   :  { %3797 = vmatprep.subr.bf16.mxu0 %v5782_v7  ;;  %3829 = vmatprep.subr.bf16.mxu1 %v5786_v10 }
 0x185   :  { %3799 = vmatpush1.bf16.msra.mxu0 %v5793_v14  ;;  %3831 = vmatpush1.bf16.msra.mxu1 %v5797_v17 }
 0x186   :  { %3801 = vmatprep.subr.bf16.mxu0 %v5801_v20  ;;  %3833 = vmatprep.subr.bf16.mxu1 %v5805_v23 }
 0x189   :  { %3803 = vmatpush1.bf16.msra.mxu0 %v5812_v27  ;;  %3835 = vmatpush1.bf16.msra.mxu1 %v5816_v32 }
 0x18a   :  { %3805 = vmatprep.subr.bf16.mxu0 %v5820_v36  ;;  %3837 = vmatprep.subr.bf16.mxu1 %v5824_v40 }
 0x18d   :  { %3807 = vmatpush1.bf16.msra.mxu0 %v5831_v45  ;;  %3839 = vmatpush1.bf16.msra.mxu1 %v5835_v49 }
 0x18e   :  { %3809 = vmatprep.subr.bf16.mxu0 %v5839_v53  ;;  %3841 = vmatprep.subr.bf16.mxu1 %v5843_v58 }
 0x191   :  { %3811 = vmatpush1.bf16.msra.mxu0 %v5850_v63  ;;  %3843 = vmatpush1.bf16.msra.mxu1 %v5854_v5 }
 0x192   :  { %3813 = vmatprep.subr.bf16.mxu0 %v5858_v9  ;;  %3845 = vmatprep.subr.bf16.mxu1 %v5862_v13 }
 0x195   :  { %3815 = vmatpush1.bf16.msra.mxu0 %v5869_v19  ;;  %3847 = vmatpush1.bf16.msra.mxu1 %v5873_v24 }
 0x196   :  { %3849 = vmatprep.subr.bf16.mxu0 %v5877_v31  ;;  %3913 = vmatprep.subr.bf16.mxu1 %v5881_v39 }
 0x198   :  { %1037 = vmatmul.mubr.f32.vlgmr.msra.gmra.mrb[2].mxu0 %v673_v15  ;;  %1108 = vmatmul.mubr.f32.vlgmr.msra.gmra.mrb[2].mxu1 %v673_v15  ;;  %v7163_v15 = vld [vmem:[#allocation36_spill] sm:$0xff] }
 0x199   :  { %3851 = vmatpush1.bf16.msra.mxu0 %v5885_v44  ;;  %3915 = vmatpush1.bf16.msra.mxu1 %v5889_v46 }
 0x19a   :  { %3853 = vmatprep.subr.bf16.mxu0 %v5891_v48  ;;  %3917 = vmatprep.subr.bf16.mxu1 %v5895_v56 }
 0x19d   :  { %3855 = vmatpush1.bf16.msra.mxu0 %v5901_v6  ;;  %3919 = vmatpush1.bf16.msra.mxu1 %v5905_v8 }
 0x19e   :  { %3857 = vmatprep.subr.bf16.mxu0 %v5907_v11  ;;  %3921 = vmatprep.subr.bf16.mxu1 %v5910_v18 }
 0x1a1   :  { %3859 = vmatpush1.bf16.msra.mxu0 %v5915_v33  ;;  %3923 = vmatpush1.bf16.msra.mxu1 %v5919_v34 }
 0x1a2   :  { %3861 = vmatprep.subr.bf16.mxu0 %v5921_v37  ;;  %3925 = vmatprep.subr.bf16.mxu1 %v5924_v52 }
 0x1a5   :  { %3863 = vmatpush1.bf16.msra.mxu0 %v5927_v3  ;;  %3927 = vmatpush1.bf16.msra.mxu1 %v7150_v55 }
 0x1a6   :  { %3865 = vmatprep.subr.bf16.mxu0 %v7151_v25  ;;  %3929 = vmatprep.subr.bf16.mxu1 %v7152_v43 }
 0x1a9   :  { %3867 = vmatpush1.bf16.msra.mxu0 %v7153_v12  ;;  %3931 = vmatpush1.bf16.msra.mxu1 %v7154_v61  ;;  %v7165_v61 = vld [vmem:[#allocation38_spill] sm:$0xff] }
 0x1aa   :  { %3869 = vmatprep.subr.bf16.mxu0 %v7155_v29  ;;  %3933 = vmatprep.subr.bf16.mxu1 %v7156_v59  ;;  %v7166_v29 = vld [vmem:[#allocation39_spill] sm:$0xff]  ;;  %v7167_v59 = vld [vmem:[#allocation40_spill] sm:$0xff] }
 0x1ad   :  { %3871 = vmatpush1.bf16.msra.mxu0 %v7157_v2  ;;  %3935 = vmatpush1.bf16.msra.mxu1 %v7158_v21  ;;  %v7168_v2 = vld [vmem:[#allocation41_spill] sm:$0xff]  ;;  %v7169_v21 = vld [vmem:[#allocation42_spill] sm:$0xff] }
 0x1ae   :  { %3873 = vmatprep.subr.bf16.mxu0 %v7159_v22  ;;  %3937 = vmatprep.subr.bf16.mxu1 %v7160_v62  ;;  %v7170_v22 = vld [vmem:[#allocation43_spill] sm:$0xff]  ;;  %v7171_v62 = vld [vmem:[#allocation44_spill] sm:$0xff] }
 0x1b1   :  { %3875 = vmatpush1.bf16.msra.mxu0 %v7161_v30  ;;  %3939 = vmatpush1.bf16.msra.mxu1 %v7162_v0  ;;  %v7172_v30 = vld [vmem:[#allocation45_spill] sm:$0xff]  ;;  %v7173_v0 = vld [vmem:[#allocation46_spill] sm:$0xff] }
 0x1b2   :  { %3877 = vmatprep.subr.bf16.mxu0 %v7163_v15  ;;  %3941 = vmatprep.subr.bf16.mxu1 %v7164_v26  ;;  %v7174_v15 = vld [vmem:[#allocation47_spill] sm:$0xff]  ;;  %v7175_v26 = vld [vmem:[#allocation48_spill] sm:$0xff] }
 0x1b5   :  { %3879 = vmatpush1.bf16.msra.mxu0 %v7165_v61  ;;  %3943 = vmatpush1.bf16.msra.mxu1 %v7166_v29  ;;  %v7176_v61 = vld [vmem:[#allocation49_spill] sm:$0xff]  ;;  %v7177_v29 = vld [vmem:[#allocation50_spill] sm:$0xff] }
 0x1b6   :  { %3881 = vmatprep.subr.bf16.mxu0 %v7167_v59  ;;  %3945 = vmatprep.subr.bf16.mxu1 %v7168_v2  ;;  %v7178_v59 = vld [vmem:[#allocation51_spill] sm:$0xff]  ;;  %v7179_v2 = vld [vmem:[#allocation52_spill] sm:$0xff] }
 0x1b9   :  { %3883 = vmatpush1.bf16.msra.mxu0 %v7169_v21  ;;  %3947 = vmatpush1.bf16.msra.mxu1 %v7170_v22  ;;  %v7180_v21 = vld [vmem:[#allocation53_spill] sm:$0xff]  ;;  %v7181_v22 = vld [vmem:[#allocation54_spill] sm:$0xff] }
 0x1ba   :  { %3885 = vmatprep.subr.bf16.mxu0 %v7171_v62  ;;  %3949 = vmatprep.subr.bf16.mxu1 %v7172_v30  ;;  %v7182_v62 = vld [vmem:[#allocation55_spill] sm:$0xff]  ;;  %v7183_v30 = vld [vmem:[#allocation56_spill] sm:$0xff] }
 0x1bd   :  { %3887 = vmatpush1.bf16.msra.mxu0 %v7173_v0  ;;  %3951 = vmatpush1.bf16.msra.mxu1 %v7174_v15  ;;  %v7184_v0 = vld [vmem:[#allocation57_spill] sm:$0xff]  ;;  %v7185_v15 = vld [vmem:[#allocation58_spill] sm:$0xff] }
 0x1be   :  { %3889 = vmatprep.subr.bf16.mxu0 %v7175_v26  ;;  %3953 = vmatprep.subr.bf16.mxu1 %v7176_v61  ;;  %v7186_v26 = vld [vmem:[#allocation59_spill] sm:$0xff]  ;;  %v7187_v61 = vld [vmem:[#allocation60_spill] sm:$0xff] }
 0x1c1   :  { %3891 = vmatpush1.bf16.msra.mxu0 %v7177_v29  ;;  %3955 = vmatpush1.bf16.msra.mxu1 %v7178_v59  ;;  %v7188_v29 = vld [vmem:[#allocation61_spill] sm:$0xff]  ;;  %v7189_v59 = vld [vmem:[#allocation62_spill] sm:$0xff] }
 0x1c2   :  { %3893 = vmatprep.subr.bf16.mxu0 %v7179_v2  ;;  %3957 = vmatprep.subr.bf16.mxu1 %v7180_v21  ;;  %v7190_v2 = vld [vmem:[#allocation63_spill] sm:$0xff] }
 0x1c5   :  { %3895 = vmatpush1.bf16.msra.mxu0 %v7181_v22  ;;  %3959 = vmatpush1.bf16.msra.mxu1 %v7182_v62  ;;  %v7191_v22 = vld [vmem:[#allocation65_spill] sm:$0xff]  ;;  %v7192_v62 = vld [vmem:[#allocation66_spill] sm:$0xff] }
 0x1c6   :  { %3897 = vmatprep.subr.bf16.mxu0 %v7183_v30  ;;  %3961 = vmatprep.subr.bf16.mxu1 %v7184_v0  ;;  %v7193_v30 = vld [vmem:[#allocation67_spill] sm:$0xff]  ;;  %v7194_v0 = vld [vmem:[#allocation68_spill] sm:$0xff] }
 0x1c9   :  { %3899 = vmatpush1.bf16.msra.mxu0 %v7185_v15  ;;  %3963 = vmatpush1.bf16.msra.mxu1 %v7186_v26  ;;  %v7195_v15 = vld [vmem:[#allocation69_spill] sm:$0xff]  ;;  %v7196_v26 = vld [vmem:[#allocation70_spill] sm:$0xff] }
 0x1ca   :  { %3901 = vmatprep.subr.bf16.mxu0 %v7187_v61  ;;  %3965 = vmatprep.subr.bf16.mxu1 %v7188_v29  ;;  %v7197_v61 = vld [vmem:[#allocation71_spill] sm:$0xff]  ;;  %v7198_v29 = vld [vmem:[#allocation16_spill] sm:$0xff] }
 0x1cd   :  { %3903 = vmatpush1.bf16.msra.mxu0 %v7189_v59  ;;  %3967 = vmatpush1.bf16.msra.mxu1 %v7190_v2  ;;  %v7199_v59 = vld [vmem:[#allocation17_spill] sm:$0xff] }
 0x1ce   :  { %3905 = vmatprep.subr.bf16.mxu0 %v6055_v51  ;;  %3969 = vmatprep.subr.bf16.mxu1 %v7191_v22  ;;  %v414_v22 = vld [vmem:[%s6951_s5] sm:$0xf]  ;;  %v7200_v51 = vld [vmem:[#allocation72_spill] sm:$0xff] }
 0x1cf   :  { %v7205_v25 = vsub.s32 3, %v7200_v51 }
 0x1d1   :  { %3907 = vmatpush1.bf16.msra.mxu0 %v7192_v62  ;;  %3971 = vmatpush1.bf16.msra.mxu1 %v7193_v30  ;;  %v7201_v62 = vsub.s32 0, %v7200_v51  ;;  %v6227_v55 = vrot.slane %v414_v22, %v7205_v25 }
 0x1d2   :  { %3909 = vmatprep.subr.bf16.mxu0 %v7194_v0  ;;  %3973 = vmatprep.subr.bf16.mxu1 %v7195_v15  ;;  %v7203_v0 = vsub.s32 1, %v7200_v51 }
 0x1d3   :  { %v6217_v2 = vrot.slane %v414_v22, %v7201_v62  ;;  %7206 = vst [vmem:[#allocation77_spill] sm:$0xff] %v6227_v55 }
 0x1d4   :  { %v6221_v30 = vrot.slane %v414_v22, %v7203_v0  ;;  %v7207_v0 = vsub.s32 2, %v7200_v51 }
 0x1d5   :  { %3911 = vmatpush1.bf16.msra.mxu0 %v7196_v26  ;;  %3975 = vmatpush1.bf16.msra.mxu1 %v7197_v61  ;;  %7202 = vst [vmem:[#allocation72_spill] sm:$0xff] %v6217_v2 }
 0x1d6   :  { %3977 = vmatprep.subr.bf16.mxu0 %v7198_v29  ;;  %4009 = vmatprep.subr.bf16.mxu1 %v7199_v59  ;;  %7204 = vst [vmem:[#allocation76_spill] sm:$0xff] %v6221_v30  ;;  %v6232_v3 = vrot.slane %v414_v22, %v7207_v0 }
 0x1d8   :  { %7208 = vst [vmem:[#allocation78_spill] sm:$0xff] %v6232_v3 }
 0x24b   :  { %v868_v15 = vpop.f32.mrb[16].mxu0  ;;  %v939_v26 = vpop.f32.mrb[16].mxu1 }
 0x24c   :  { %v869_v61 = vadd.f32 %v868_v15, %v6217_v2  ;;  %v870_v21 = vpop.f32.mrb[17].mxu0  ;;  %v941_v29 = vpop.f32.mrb[17].mxu1  ;;  %v940_v15 = vadd.f32 %v939_v26, %v6232_v3  ;;  %v7209_v26 = vld [vmem:[#allocation73_spill] sm:$0xff] }
 0x24d   :  { %v871_v59 = vadd.f32 %v870_v21, %v6221_v30  ;;  %v942_v62 = vadd.f32 %v941_v29, %v6227_v55 }
 0x24e   :  { %v3478_v12 = vmul.f32 -1.442695, %v869_v61 }
 0x24f   :  { %v3479_v43 = vmul.f32 -1.442695, %v871_v59  ;;  %v3480_v52 = vmul.f32 -1.442695, %v942_v62 }
 0x250   :  { %5244 = vpow2.f32 %v3478_v12 }
 0x251   :  { %5246 = vpow2.f32 %v3479_v43 }
 0x252   :  { %5248 = vpow2.f32 %v3480_v52 }
 0x253   :  { %5250 = vtanh.f32 %v940_v15 }
 0x25a   :  { %v5245_v2 = vpop.eup %5244 }
 0x25b   :  { %v5247_v37 = vpop.eup %5246  ;;  %v947_v21 = vadd.f32 1.0, %v5245_v2 }
 0x25c   :  { %v953_v61 = vadd.f32 1.0, %v5247_v37  ;;  %v5249_v25 = vpop.eup %5248  ;;  %v7210_v37 = vld [vmem:[#allocation74_spill] sm:$0xff] }
 0x25d   :  { %5252 = vrcp.f32 %v947_v21  ;;  %v5251_v12 = vpop.eup %5250  ;;  %v960_v55 = vadd.f32 1.0, %v5249_v25 }
 0x25e   :  { %5254 = vrcp.f32 %v953_v61 }
 0x25f   :  { %5256 = vrcp.f32 %v960_v55 }
 0x267   :  { %v5253_v43 = vpop.eup %5252 }
 0x268   :  { %v5255_v59 = vpop.eup %5254  ;;  %v964_v29 = vmul.f32 %v5253_v43, %v5251_v12  ;;  %v7211_v12 = vld [vmem:[#allocation75_spill] sm:$0xff] }
 0x269   :  { %v963_v51 = vmul.f32 0.0, %v5255_v59  ;;  %v5257_v43 = vpop.eup %5256 }
 0x26b   :  { %v6235_v22 = vadd.f32 %v964_v29, %v963_v51  ;;  %v1038_v62 = vpop.f32.mrb[2].mxu0  ;;  %v1109_v0 = vpop.f32.mrb[2].mxu1 }
 0x26c   :  { %v5154_v3 = vadd.f32 %v1038_v62, %v7209_v26  ;;  %v1040_v2 = vpop.f32.mrb[3].mxu0  ;;  %v1111_v52 = vpop.f32.mrb[3].mxu1  ;;  %v5170_v51 = vadd.f32 %v1109_v0, %v6108_v41 }
 0x26d   :  { %5258 = vtanh.f32 %v6235_v22  ;;  %v5155_v15 = vadd.f32 %v1040_v2, %v7210_v37  ;;  %v5171_v25 = vadd.f32 %v1111_v52, %v7211_v12 }
 0x26e   :  { %v3481_v21 = vmul.f32 -1.442695, %v5154_v3 }
 0x26f   :  { %v3482_v61 = vmul.f32 -1.442695, %v5155_v15  ;;  %v3483_v29 = vmul.f32 -1.442695, %v5171_v25 }
 0x270   :  { %5260 = vpow2.f32 %v3481_v21 }
 0x271   :  { %5262 = vpow2.f32 %v3482_v61 }
 0x272   :  { %5264 = vpow2.f32 %v3483_v29  ;;  %v7215_v29 = vld [vmem:[#allocation23_spill] sm:$0xff] }
 0x273   :  { %5266 = vtanh.f32 %v5170_v51  ;;  %v7216_v51 = vld [vmem:[#allocation24_spill] sm:$0xff] }
 0x277   :  { %v5259_v59 = vpop.eup %5258 }
 0x278   :  { %v967_v55 = vmul.f32 %v5259_v59, %v5257_v43 }
 0x27a   :  { %v5261_v30 = vpop.eup %5260  ;;  %1206 = vmatprep.mubr.f32.mxu0 %v967_v55  ;;  %1277 = vmatprep.mubr.f32.mxu1 %v967_v55  ;;  %v7217_v55 = vld [vmem:[#allocation25_spill] sm:$0xff] }
 0x27b   :  { %v5263_v62 = vpop.eup %5262  ;;  %v1121_v26 = vadd.f32 1.0, %v5261_v30 }
 0x27c   :  { %v1127_v2 = vadd.f32 1.0, %v5263_v62  ;;  %v5265_v3 = vpop.eup %5264  ;;  %v7218_v62 = vld [vmem:[#allocation26_spill] sm:$0xff] }
 0x27d   :  { %5268 = vrcp.f32 %v1121_v26  ;;  %v5267_v15 = vpop.eup %5266  ;;  %v1134_v12 = vadd.f32 1.0, %v5265_v3  ;;  %v7213_v26 = vld [vmem:[#allocation21_spill] sm:$0xff]  ;;  %v7220_v3 = vld [vmem:[#allocation28_spill] sm:$0xff] }
 0x27e   :  { %5270 = vrcp.f32 %v1127_v2  ;;  %v7219_v2 = vld [vmem:[#allocation27_spill] sm:$0xff] }
 0x27f   :  { %5272 = vrcp.f32 %v1134_v12  ;;  %v7214_v12 = vld [vmem:[#allocation22_spill] sm:$0xff] }
 0x287   :  { %v5269_v21 = vpop.eup %5268 }
 0x288   :  { %v5271_v52 = vpop.eup %5270  ;;  %v1138_v61 = vmul.f32 %v5269_v21, %v5267_v15  ;;  %v7221_v15 = vld [vmem:[#allocation29_spill] sm:$0xff]  ;;  %v7222_v21 = vld [vmem:[#allocation30_spill] sm:$0xff] }
 0x289   :  { %v1137_v25 = vmul.f32 %v5271_v52, %v6111_v28  ;;  %v5273_v43 = vpop.eup %5272  ;;  %v7212_v28 = vld [vmem:[#allocation20_spill] sm:$0xff]  ;;  %v7223_v52 = vld [vmem:[#allocation31_spill] sm:$0xff] }
 0x28b   :  { %v6243_v0 = vadd.f32 %v1138_v61, %v1137_v25  ;;  %v7224_v61 = vld [vmem:[#allocation32_spill] sm:$0xff]  ;;  %v7225_v25 = vld [vmem:[#allocation33_spill] sm:$0xff] }
 0x28d   :  { %5274 = vtanh.f32 %v6243_v0 }
 0x297   :  { %v5275_v30 = vpop.eup %5274 }
 0x298   :  { %v1141_v59 = vmul.f32 %v5275_v30, %v5273_v43  ;;  %v7226_v43 = vld [vmem:[#allocation34_spill] sm:$0xff]  ;;  %v7227_v30 = vld [vmem:[#allocation35_spill] sm:$0xff] }
 0x29a   :  { %1207 = vmatmul.mubr.f32.vlgmr.msra.gmra.mrb[18].mxu0 %v1141_v59  ;;  %1278 = vmatmul.mubr.f32.vlgmr.msra.gmra.mrb[18].mxu1 %v1141_v59 }
 0x29b   :  { %3979 = vmatpush1.bf16.msra.mxu0 %v5739_v35  ;;  %4011 = vmatpush1.bf16.msra.mxu1 %v5742_v38 }
 0x29c   :  { %3981 = vmatprep.subr.bf16.mxu0 %v5745_v42  ;;  %4013 = vmatprep.subr.bf16.mxu1 %v5751_v47 }
 0x29d   :  { %1376 = vmatprep.mubr.f32.mxu0 %v7149_v16  ;;  %1447 = vmatprep.mubr.f32.mxu1 %v7149_v16 }
 0x29f   :  { %3983 = vmatpush1.bf16.msra.mxu0 %v5755_v50  ;;  %4015 = vmatpush1.bf16.msra.mxu1 %v5759_v54 }
 0x2a0   :  { %3985 = vmatprep.subr.bf16.mxu0 %v5763_v57  ;;  %4017 = vmatprep.subr.bf16.mxu1 %v5767_v60 }
 0x2a3   :  { %3987 = vmatpush1.bf16.msra.mxu0 %v5774_v1  ;;  %4019 = vmatpush1.bf16.msra.mxu1 %v5778_v4 }
 0x2a4   :  { %3989 = vmatprep.subr.bf16.mxu0 %v5782_v7  ;;  %4021 = vmatprep.subr.bf16.mxu1 %v5786_v10 }
 0x2a7   :  { %3991 = vmatpush1.bf16.msra.mxu0 %v5793_v14  ;;  %4023 = vmatpush1.bf16.msra.mxu1 %v5797_v17 }
 0x2a8   :  { %3993 = vmatprep.subr.bf16.mxu0 %v5801_v20  ;;  %4025 = vmatprep.subr.bf16.mxu1 %v5805_v23 }
 0x2ab   :  { %3995 = vmatpush1.bf16.msra.mxu0 %v5812_v27  ;;  %4027 = vmatpush1.bf16.msra.mxu1 %v5816_v32 }
 0x2ac   :  { %3997 = vmatprep.subr.bf16.mxu0 %v5820_v36  ;;  %4029 = vmatprep.subr.bf16.mxu1 %v5824_v40 }
 0x2af   :  { %3999 = vmatpush1.bf16.msra.mxu0 %v5831_v45  ;;  %4031 = vmatpush1.bf16.msra.mxu1 %v5835_v49 }
 0x2b0   :  { %4001 = vmatprep.subr.bf16.mxu0 %v5839_v53  ;;  %4033 = vmatprep.subr.bf16.mxu1 %v5843_v58 }
 0x2b3   :  { %4003 = vmatpush1.bf16.msra.mxu0 %v5850_v63  ;;  %4035 = vmatpush1.bf16.msra.mxu1 %v5854_v5 }
 0x2b4   :  { %4005 = vmatprep.subr.bf16.mxu0 %v5858_v9  ;;  %4037 = vmatprep.subr.bf16.mxu1 %v5862_v13 }
 0x2b7   :  { %4007 = vmatpush1.bf16.msra.mxu0 %v5869_v19  ;;  %4039 = vmatpush1.bf16.msra.mxu1 %v5873_v24 }
 0x2b8   :  { %4041 = vmatprep.subr.bf16.mxu0 %v5877_v31  ;;  %4105 = vmatprep.subr.bf16.mxu1 %v5881_v39 }
 0x2ba   :  { %1377 = vmatmul.mubr.f32.vlgmr.msra.gmra.mrb[4].mxu0 %v1141_v59  ;;  %1448 = vmatmul.mubr.f32.vlgmr.msra.gmra.mrb[4].mxu1 %v1141_v59  ;;  %v7228_v59 = vld [vmem:[#allocation36_spill] sm:$0xff] }
 0x2bb   :  { %4043 = vmatpush1.bf16.msra.mxu0 %v5885_v44  ;;  %4107 = vmatpush1.bf16.msra.mxu1 %v5889_v46 }
 0x2bc   :  { %4045 = vmatprep.subr.bf16.mxu0 %v5891_v48  ;;  %4109 = vmatprep.subr.bf16.mxu1 %v5895_v56 }
 0x2bf   :  { %4047 = vmatpush1.bf16.msra.mxu0 %v5901_v6  ;;  %4111 = vmatpush1.bf16.msra.mxu1 %v5905_v8 }
 0x2c0   :  { %4049 = vmatprep.subr.bf16.mxu0 %v5907_v11  ;;  %4113 = vmatprep.subr.bf16.mxu1 %v5910_v18 }
 0x2c3   :  { %4051 = vmatpush1.bf16.msra.mxu0 %v5915_v33  ;;  %4115 = vmatpush1.bf16.msra.mxu1 %v5919_v34 }
 0x2c4   :  { %4053 = vmatprep.subr.bf16.mxu0 %v7212_v28  ;;  %4117 = vmatprep.subr.bf16.mxu1 %v7213_v26 }
 0x2c7   :  { %4055 = vmatpush1.bf16.msra.mxu0 %v7214_v12  ;;  %4119 = vmatpush1.bf16.msra.mxu1 %v7215_v29  ;;  %v7267_v29 = vld [vmem:[#allocation76_spill] sm:$0xff] }
 0x2c8   :  { %4057 = vmatprep.subr.bf16.mxu0 %v7216_v51  ;;  %4121 = vmatprep.subr.bf16.mxu1 %v7217_v55  ;;  %v7266_v55 = vld [vmem:[#allocation72_spill] sm:$0xff] }
 0x2cb   :  { %4059 = vmatpush1.bf16.msra.mxu0 %v7218_v62  ;;  %4123 = vmatpush1.bf16.msra.mxu1 %v7219_v2  ;;  %v7229_v62 = vld [vmem:[#allocation37_spill] sm:$0xff]  ;;  %v7230_v2 = vld [vmem:[#allocation38_spill] sm:$0xff] }
 0x2cc   :  { %4061 = vmatprep.subr.bf16.mxu0 %v7220_v3  ;;  %4125 = vmatprep.subr.bf16.mxu1 %v7221_v15  ;;  %v7231_v3 = vld [vmem:[#allocation39_spill] sm:$0xff]  ;;  %v7232_v15 = vld [vmem:[#allocation40_spill] sm:$0xff] }
 0x2cf   :  { %4063 = vmatpush1.bf16.msra.mxu0 %v7222_v21  ;;  %4127 = vmatpush1.bf16.msra.mxu1 %v7223_v52  ;;  %v7233_v21 = vld [vmem:[#allocation41_spill] sm:$0xff]  ;;  %v7234_v52 = vld [vmem:[#allocation42_spill] sm:$0xff] }
 0x2d0   :  { %4065 = vmatprep.subr.bf16.mxu0 %v7224_v61  ;;  %4129 = vmatprep.subr.bf16.mxu1 %v7225_v25  ;;  %v7235_v61 = vld [vmem:[#allocation43_spill] sm:$0xff]  ;;  %v7236_v25 = vld [vmem:[#allocation44_spill] sm:$0xff] }
 0x2d3   :  { %4067 = vmatpush1.bf16.msra.mxu0 %v7226_v43  ;;  %4131 = vmatpush1.bf16.msra.mxu1 %v7227_v30  ;;  %v7237_v43 = vld [vmem:[#allocation45_spill] sm:$0xff]  ;;  %v7238_v30 = vld [vmem:[#allocation46_spill] sm:$0xff] }
 0x2d4   :  { %4069 = vmatprep.subr.bf16.mxu0 %v7228_v59  ;;  %4133 = vmatprep.subr.bf16.mxu1 %v7229_v62  ;;  %v7239_v59 = vld [vmem:[#allocation47_spill] sm:$0xff]  ;;  %v7240_v62 = vld [vmem:[#allocation48_spill] sm:$0xff] }
 0x2d7   :  { %4071 = vmatpush1.bf16.msra.mxu0 %v7230_v2  ;;  %4135 = vmatpush1.bf16.msra.mxu1 %v7231_v3  ;;  %v7241_v2 = vld [vmem:[#allocation49_spill] sm:$0xff]  ;;  %v7242_v3 = vld [vmem:[#allocation50_spill] sm:$0xff] }
 0x2d8   :  { %4073 = vmatprep.subr.bf16.mxu0 %v7232_v15  ;;  %4137 = vmatprep.subr.bf16.mxu1 %v7233_v21  ;;  %v7243_v15 = vld [vmem:[#allocation51_spill] sm:$0xff]  ;;  %v7244_v21 = vld [vmem:[#allocation52_spill] sm:$0xff] }
 0x2db   :  { %4075 = vmatpush1.bf16.msra.mxu0 %v7234_v52  ;;  %4139 = vmatpush1.bf16.msra.mxu1 %v7235_v61  ;;  %v7245_v52 = vld [vmem:[#allocation53_spill] sm:$0xff]  ;;  %v7246_v61 = vld [vmem:[#allocation54_spill] sm:$0xff] }
 0x2dc   :  { %4077 = vmatprep.subr.bf16.mxu0 %v7236_v25  ;;  %4141 = vmatprep.subr.bf16.mxu1 %v7237_v43  ;;  %v7247_v25 = vld [vmem:[#allocation55_spill] sm:$0xff]  ;;  %v7248_v43 = vld [vmem:[#allocation56_spill] sm:$0xff] }
 0x2df   :  { %4079 = vmatpush1.bf16.msra.mxu0 %v7238_v30  ;;  %4143 = vmatpush1.bf16.msra.mxu1 %v7239_v59  ;;  %v7249_v30 = vld [vmem:[#allocation57_spill] sm:$0xff]  ;;  %v7250_v59 = vld [vmem:[#allocation58_spill] sm:$0xff] }
 0x2e0   :  { %4081 = vmatprep.subr.bf16.mxu0 %v7240_v62  ;;  %4145 = vmatprep.subr.bf16.mxu1 %v7241_v2  ;;  %v7251_v62 = vld [vmem:[#allocation59_spill] sm:$0xff]  ;;  %v7252_v2 = vld [vmem:[#allocation60_spill] sm:$0xff] }
 0x2e3   :  { %4083 = vmatpush1.bf16.msra.mxu0 %v7242_v3  ;;  %4147 = vmatpush1.bf16.msra.mxu1 %v7243_v15  ;;  %v7253_v3 = vld [vmem:[#allocation61_spill] sm:$0xff]  ;;  %v7254_v15 = vld [vmem:[#allocation62_spill] sm:$0xff] }
 0x2e4   :  { %4085 = vmatprep.subr.bf16.mxu0 %v7244_v21  ;;  %4149 = vmatprep.subr.bf16.mxu1 %v7245_v52  ;;  %v7255_v21 = vld [vmem:[#allocation63_spill] sm:$0xff]  ;;  %v7256_v52 = vld [vmem:[#allocation64_spill] sm:$0xff] }
 0x2e7   :  { %4087 = vmatpush1.bf16.msra.mxu0 %v7246_v61  ;;  %4151 = vmatpush1.bf16.msra.mxu1 %v7247_v25  ;;  %v7257_v61 = vld [vmem:[#allocation65_spill] sm:$0xff]  ;;  %v7258_v25 = vld [vmem:[#allocation66_spill] sm:$0xff] }
 0x2e8   :  { %4089 = vmatprep.subr.bf16.mxu0 %v7248_v43  ;;  %4153 = vmatprep.subr.bf16.mxu1 %v7249_v30  ;;  %v7259_v43 = vld [vmem:[#allocation67_spill] sm:$0xff]  ;;  %v7260_v30 = vld [vmem:[#allocation68_spill] sm:$0xff] }
 0x2eb   :  { %4091 = vmatpush1.bf16.msra.mxu0 %v7250_v59  ;;  %4155 = vmatpush1.bf16.msra.mxu1 %v7251_v62  ;;  %v7261_v59 = vld [vmem:[#allocation69_spill] sm:$0xff]  ;;  %v7262_v62 = vld [vmem:[#allocation70_spill] sm:$0xff] }
 0x2ec   :  { %4093 = vmatprep.subr.bf16.mxu0 %v7252_v2  ;;  %4157 = vmatprep.subr.bf16.mxu1 %v7253_v3  ;;  %v7263_v2 = vld [vmem:[#allocation71_spill] sm:$0xff]  ;;  %v7264_v3 = vld [vmem:[#allocation16_spill] sm:$0xff] }
 0x2ef   :  { %4095 = vmatpush1.bf16.msra.mxu0 %v7254_v15  ;;  %4159 = vmatpush1.bf16.msra.mxu1 %v7255_v21  ;;  %v7265_v15 = vld [vmem:[#allocation17_spill] sm:$0xff] }
 0x2f0   :  { %4097 = vmatprep.subr.bf16.mxu0 %v7256_v52  ;;  %4161 = vmatprep.subr.bf16.mxu1 %v7257_v61 }
 0x2f3   :  { %4099 = vmatpush1.bf16.msra.mxu0 %v7258_v25  ;;  %4163 = vmatpush1.bf16.msra.mxu1 %v7259_v43 }
 0x2f4   :  { %4101 = vmatprep.subr.bf16.mxu0 %v7260_v30  ;;  %4165 = vmatprep.subr.bf16.mxu1 %v7261_v59  ;;  %v7268_v59 = vld [vmem:[#allocation77_spill] sm:$0xff] }
 0x2f7   :  { %4103 = vmatpush1.bf16.msra.mxu0 %v7262_v62  ;;  %4167 = vmatpush1.bf16.msra.mxu1 %v7263_v2  ;;  %v7269_v2 = vld [vmem:[#allocation78_spill] sm:$0xff] }
 0x2f8   :  { %4169 = vmatprep.subr.bf16.mxu0 %v7264_v3  ;;  %4201 = vmatprep.subr.bf16.mxu1 %v7265_v15 }
 0x36d   :  { %v1208_v21 = vpop.f32.mrb[18].mxu0  ;;  %v1279_v52 = vpop.f32.mrb[18].mxu1 }
 0x36e   :  { %v1209_v61 = vadd.f32 %v1208_v21, %v7266_v55  ;;  %v1210_v51 = vpop.f32.mrb[19].mxu0  ;;  %v1281_v25 = vpop.f32.mrb[19].mxu1  ;;  %v1280_v28 = vadd.f32 %v1279_v52, %v7269_v2  ;;  %v7270_v52 = vld [vmem:[#allocation73_spill] sm:$0xff] }
 0x36f   :  { %v1211_v43 = vadd.f32 %v1210_v51, %v7267_v29  ;;  %v1282_v62 = vadd.f32 %v1281_v25, %v7268_v59 }
 0x370   :  { %v3484_v12 = vmul.f32 -1.442695, %v1209_v61 }
 0x371   :  { %v3485_v30 = vmul.f32 -1.442695, %v1211_v43  ;;  %v3486_v26 = vmul.f32 -1.442695, %v1282_v62 }
 0x372   :  { %5276 = vpow2.f32 %v3484_v12 }
 0x373   :  { %5278 = vpow2.f32 %v3485_v30 }
 0x374   :  { %5280 = vpow2.f32 %v3486_v26 }
 0x375   :  { %5282 = vtanh.f32 %v1280_v28 }
 0x37c   :  { %v5277_v3 = vpop.eup %5276 }
 0x37d   :  { %v5279_v34 = vpop.eup %5278  ;;  %v1287_v15 = vadd.f32 1.0, %v5277_v3 }
 0x37e   :  { %v1293_v33 = vadd.f32 1.0, %v5279_v34  ;;  %v5281_v21 = vpop.eup %5280 }
 0x37f   :  { %5284 = vrcp.f32 %v1287_v15  ;;  %v5283_v55 = vpop.eup %5282  ;;  %v1300_v12 = vadd.f32 1.0, %v5281_v21 }
 0x380   :  { %5286 = vrcp.f32 %v1293_v33 }
 0x381   :  { %5288 = vrcp.f32 %v1300_v12 }
 0x389   :  { %v5285_v51 = vpop.eup %5284 }
 0x38a   :  { %v5287_v61 = vpop.eup %5286  ;;  %v1304_v43 = vmul.f32 %v5285_v51, %v5283_v55  ;;  %v7271_v55 = vld [vmem:[#allocation75_spill] sm:$0xff] }
 0x38b   :  { %v1303_v30 = vmul.f32 %v5287_v61, %v6235_v22  ;;  %v5289_v22 = vpop.eup %5288 }
 0x38d   :  { %v1378_v25 = vpop.f32.mrb[4].mxu0  ;;  %v1449_v62 = vpop.f32.mrb[4].mxu1  ;;  %v6349_v59 = vadd.f32 %v1304_v43, %v1303_v30 }
 0x38e   :  { %v5156_v3 = vadd.f32 %v1378_v25, %v7270_v52  ;;  %v1380_v26 = vpop.f32.mrb[5].mxu0  ;;  %v1451_v28 = vpop.f32.mrb[5].mxu1  ;;  %v5172_v43 = vadd.f32 %v1449_v62, %v6108_v41 }
 0x38f   :  { %v5157_v34 = vadd.f32 %v1380_v26, %v7210_v37  ;;  %5290 = vtanh.f32 %v6349_v59  ;;  %v5173_v21 = vadd.f32 %v1451_v28, %v7271_v55 }
 0x390   :  { %v3487_v33 = vmul.f32 -1.442695, %v5156_v3 }
 0x391   :  { %v3488_v15 = vmul.f32 -1.442695, %v5157_v34  ;;  %v3489_v61 = vmul.f32 -1.442695, %v5173_v21 }
 0x392   :  { %5292 = vpow2.f32 %v3487_v33 }
 0x393   :  { %5294 = vpow2.f32 %v3488_v15 }
 0x394   :  { %5296 = vpow2.f32 %v3489_v61 }
 0x395   :  { %5298 = vtanh.f32 %v5172_v43  ;;  %v7275_v43 = vld [vmem:[#allocation21_spill] sm:$0xff] }
 0x399   :  { %v5291_v51 = vpop.eup %5290 }
 0x39a   :  { %v1307_v12 = vmul.f32 %v5291_v51, %v5289_v22 }
 0x39c   :  { %v5293_v30 = vpop.eup %5292  ;;  %1546 = vmatprep.mubr.f32.mxu0 %v1307_v12  ;;  %1617 = vmatprep.mubr.f32.mxu1 %v1307_v12  ;;  %v7276_v12 = vld [vmem:[#allocation22_spill] sm:$0xff] }
 0x39d   :  { %v5295_v25 = vpop.eup %5294  ;;  %v1461_v52 = vadd.f32 1.0, %v5293_v30  ;;  %v7277_v30 = vld [vmem:[#allocation23_spill] sm:$0xff] }
 0x39e   :  { %v1467_v26 = vadd.f32 1.0, %v5295_v25  ;;  %v5297_v3 = vpop.eup %5296  ;;  %v7278_v25 = vld [vmem:[#allocation24_spill] sm:$0xff] }
 0x39f   :  { %5300 = vrcp.f32 %v1461_v52  ;;  %v5299_v34 = vpop.eup %5298  ;;  %v1474_v55 = vadd.f32 1.0, %v5297_v3  ;;  %v7273_v52 = vld [vmem:[#allocation19_spill] sm:$0xff]  ;;  %v7280_v3 = vld [vmem:[#allocation26_spill] sm:$0xff] }
 0x3a0   :  { %5302 = vrcp.f32 %v1467_v26  ;;  %v7279_v26 = vld [vmem:[#allocation25_spill] sm:$0xff] }
 0x3a1   :  { %5304 = vrcp.f32 %v1474_v55  ;;  %v7274_v55 = vld [vmem:[#allocation20_spill] sm:$0xff] }
 0x3a9   :  { %v5301_v33 = vpop.eup %5300 }
 0x3aa   :  { %v5303_v28 = vpop.eup %5302  ;;  %v1478_v15 = vmul.f32 %v5301_v33, %v5299_v34  ;;  %v7281_v34 = vld [vmem:[#allocation27_spill] sm:$0xff]  ;;  %v7282_v33 = vld [vmem:[#allocation28_spill] sm:$0xff] }
 0x3ab   :  { %v1477_v21 = vmul.f32 %v5303_v28, %v6243_v0  ;;  %v5305_v22 = vpop.eup %5304  ;;  %v7272_v0 = vld [vmem:[#allocation18_spill] sm:$0xff]  ;;  %v7283_v28 = vld [vmem:[#allocation29_spill] sm:$0xff] }
 0x3ad   :  { %v6357_v62 = vadd.f32 %v1478_v15, %v1477_v21  ;;  %v7284_v15 = vld [vmem:[#allocation30_spill] sm:$0xff]  ;;  %v7285_v21 = vld [vmem:[#allocation31_spill] sm:$0xff] }
 0x3af   :  { %5306 = vtanh.f32 %v6357_v62 }
 0x3b9   :  { %v5307_v51 = vpop.eup %5306 }
 0x3ba   :  { %v1481_v61 = vmul.f32 %v5307_v51, %v5305_v22  ;;  %v7286_v22 = vld [vmem:[#allocation32_spill] sm:$0xff]  ;;  %v7287_v51 = vld [vmem:[#allocation33_spill] sm:$0xff] }
 0x3bc   :  { %1547 = vmatmul.mubr.f32.vlgmr.msra.gmra.mrb[20].mxu0 %v1481_v61  ;;  %1618 = vmatmul.mubr.f32.vlgmr.msra.gmra.mrb[20].mxu1 %v1481_v61 }
 0x3bd   :  { %4171 = vmatpush1.bf16.msra.mxu0 %v5739_v35  ;;  %4203 = vmatpush1.bf16.msra.mxu1 %v5742_v38 }
 0x3be   :  { %4173 = vmatprep.subr.bf16.mxu0 %v5745_v42  ;;  %4205 = vmatprep.subr.bf16.mxu1 %v5751_v47 }
 0x3bf   :  { %1716 = vmatprep.mubr.f32.mxu0 %v7149_v16  ;;  %1787 = vmatprep.mubr.f32.mxu1 %v7149_v16 }
 0x3c1   :  { %4175 = vmatpush1.bf16.msra.mxu0 %v5755_v50  ;;  %4207 = vmatpush1.bf16.msra.mxu1 %v5759_v54 }
 0x3c2   :  { %4177 = vmatprep.subr.bf16.mxu0 %v5763_v57  ;;  %4209 = vmatprep.subr.bf16.mxu1 %v5767_v60 }
 0x3c5   :  { %4179 = vmatpush1.bf16.msra.mxu0 %v5774_v1  ;;  %4211 = vmatpush1.bf16.msra.mxu1 %v5778_v4 }
 0x3c6   :  { %4181 = vmatprep.subr.bf16.mxu0 %v5782_v7  ;;  %4213 = vmatprep.subr.bf16.mxu1 %v5786_v10 }
 0x3c9   :  { %4183 = vmatpush1.bf16.msra.mxu0 %v5793_v14  ;;  %4215 = vmatpush1.bf16.msra.mxu1 %v5797_v17 }
 0x3ca   :  { %4185 = vmatprep.subr.bf16.mxu0 %v5801_v20  ;;  %4217 = vmatprep.subr.bf16.mxu1 %v5805_v23 }
 0x3cd   :  { %4187 = vmatpush1.bf16.msra.mxu0 %v5812_v27  ;;  %4219 = vmatpush1.bf16.msra.mxu1 %v5816_v32 }
 0x3ce   :  { %4189 = vmatprep.subr.bf16.mxu0 %v5820_v36  ;;  %4221 = vmatprep.subr.bf16.mxu1 %v5824_v40 }
 0x3d1   :  { %4191 = vmatpush1.bf16.msra.mxu0 %v5831_v45  ;;  %4223 = vmatpush1.bf16.msra.mxu1 %v5835_v49 }
 0x3d2   :  { %4193 = vmatprep.subr.bf16.mxu0 %v5839_v53  ;;  %4225 = vmatprep.subr.bf16.mxu1 %v5843_v58 }
 0x3d5   :  { %4195 = vmatpush1.bf16.msra.mxu0 %v5850_v63  ;;  %4227 = vmatpush1.bf16.msra.mxu1 %v5854_v5 }
 0x3d6   :  { %4197 = vmatprep.subr.bf16.mxu0 %v5858_v9  ;;  %4229 = vmatprep.subr.bf16.mxu1 %v5862_v13 }
 0x3d9   :  { %4199 = vmatpush1.bf16.msra.mxu0 %v5869_v19  ;;  %4231 = vmatpush1.bf16.msra.mxu1 %v5873_v24 }
 0x3da   :  { %4233 = vmatprep.subr.bf16.mxu0 %v5877_v31  ;;  %4297 = vmatprep.subr.bf16.mxu1 %v5881_v39 }
 0x3dc   :  { %1717 = vmatmul.mubr.f32.vlgmr.msra.gmra.mrb[6].mxu0 %v1481_v61  ;;  %1788 = vmatmul.mubr.f32.vlgmr.msra.gmra.mrb[6].mxu1 %v1481_v61  ;;  %v7288_v61 = vld [vmem:[#allocation34_spill] sm:$0xff] }
 0x3dd   :  { %4235 = vmatpush1.bf16.msra.mxu0 %v5885_v44  ;;  %4299 = vmatpush1.bf16.msra.mxu1 %v5889_v46 }
 0x3de   :  { %4237 = vmatprep.subr.bf16.mxu0 %v5891_v48  ;;  %4301 = vmatprep.subr.bf16.mxu1 %v5895_v56 }
 0x3e1   :  { %4239 = vmatpush1.bf16.msra.mxu0 %v5901_v6  ;;  %4303 = vmatpush1.bf16.msra.mxu1 %v5905_v8 }
 0x3e2   :  { %4241 = vmatprep.subr.bf16.mxu0 %v5907_v11  ;;  %4305 = vmatprep.subr.bf16.mxu1 %v5910_v18 }
 0x3e5   :  { %4243 = vmatpush1.bf16.msra.mxu0 %v7272_v0  ;;  %4307 = vmatpush1.bf16.msra.mxu1 %v7273_v52 }
 0x3e6   :  { %4245 = vmatprep.subr.bf16.mxu0 %v7274_v55  ;;  %4309 = vmatprep.subr.bf16.mxu1 %v7275_v43 }
 0x3e9   :  { %4247 = vmatpush1.bf16.msra.mxu0 %v7276_v12  ;;  %4311 = vmatpush1.bf16.msra.mxu1 %v7277_v30  ;;  %v7328_v30 = vld [vmem:[#allocation72_spill] sm:$0xff] }
 0x3ea   :  { %4249 = vmatprep.subr.bf16.mxu0 %v7278_v25  ;;  %4313 = vmatprep.subr.bf16.mxu1 %v7279_v26  ;;  %v7289_v25 = vld [vmem:[#allocation35_spill] sm:$0xff]  ;;  %v7290_v26 = vld [vmem:[#allocation36_spill] sm:$0xff] }
 0x3ed   :  { %4251 = vmatpush1.bf16.msra.mxu0 %v7280_v3  ;;  %4315 = vmatpush1.bf16.msra.mxu1 %v7281_v34  ;;  %v7291_v3 = vld [vmem:[#allocation37_spill] sm:$0xff]  ;;  %v7292_v34 = vld [vmem:[#allocation38_spill] sm:$0xff] }
 0x3ee   :  { %4253 = vmatprep.subr.bf16.mxu0 %v7282_v33  ;;  %4317 = vmatprep.subr.bf16.mxu1 %v7283_v28  ;;  %v7293_v33 = vld [vmem:[#allocation39_spill] sm:$0xff]  ;;  %v7294_v28 = vld [vmem:[#allocation40_spill] sm:$0xff] }
 0x3f1   :  { %4255 = vmatpush1.bf16.msra.mxu0 %v7284_v15  ;;  %4319 = vmatpush1.bf16.msra.mxu1 %v7285_v21  ;;  %v7295_v15 = vld [vmem:[#allocation41_spill] sm:$0xff]  ;;  %v7296_v21 = vld [vmem:[#allocation42_spill] sm:$0xff] }
 0x3f2   :  { %4257 = vmatprep.subr.bf16.mxu0 %v7286_v22  ;;  %4321 = vmatprep.subr.bf16.mxu1 %v7287_v51  ;;  %v7297_v22 = vld [vmem:[#allocation43_spill] sm:$0xff]  ;;  %v7298_v51 = vld [vmem:[#allocation44_spill] sm:$0xff] }
 0x3f5   :  { %4259 = vmatpush1.bf16.msra.mxu0 %v7288_v61  ;;  %4323 = vmatpush1.bf16.msra.mxu1 %v7289_v25  ;;  %v7299_v61 = vld [vmem:[#allocation45_spill] sm:$0xff]  ;;  %v7300_v25 = vld [vmem:[#allocation46_spill] sm:$0xff] }
 0x3f6   :  { %4261 = vmatprep.subr.bf16.mxu0 %v7290_v26  ;;  %4325 = vmatprep.subr.bf16.mxu1 %v7291_v3  ;;  %v7301_v26 = vld [vmem:[#allocation47_spill] sm:$0xff]  ;;  %v7302_v3 = vld [vmem:[#allocation48_spill] sm:$0xff] }
 0x3f9   :  { %4263 = vmatpush1.bf16.msra.mxu0 %v7292_v34  ;;  %4327 = vmatpush1.bf16.msra.mxu1 %v7293_v33  ;;  %v7303_v34 = vld [vmem:[#allocation49_spill] sm:$0xff]  ;;  %v7304_v33 = vld [vmem:[#allocation50_spill] sm:$0xff] }
 0x3fa   :  { %4265 = vmatprep.subr.bf16.mxu0 %v7294_v28  ;;  %4329 = vmatprep.subr.bf16.mxu1 %v7295_v15  ;;  %v7305_v28 = vld [vmem:[#allocation51_spill] sm:$0xff]  ;;  %v7306_v15 = vld [vmem:[#allocation52_spill] sm:$0xff] }
 0x3fd   :  { %4267 = vmatpush1.bf16.msra.mxu0 %v7296_v21  ;;  %4331 = vmatpush1.bf16.msra.mxu1 %v7297_v22  ;;  %v7307_v21 = vld [vmem:[#allocation53_spill] sm:$0xff]  ;;  %v7308_v22 = vld [vmem:[#allocation54_spill] sm:$0xff] }
 0x3fe   :  { %4269 = vmatprep.subr.bf16.mxu0 %v7298_v51  ;;  %4333 = vmatprep.subr.bf16.mxu1 %v7299_v61  ;;  %v7309_v51 = vld [vmem:[#allocation55_spill] sm:$0xff]  ;;  %v7310_v61 = vld [vmem:[#allocation56_spill] sm:$0xff] }
 0x401   :  { %4271 = vmatpush1.bf16.msra.mxu0 %v7300_v25  ;;  %4335 = vmatpush1.bf16.msra.mxu1 %v7301_v26  ;;  %v7311_v25 = vld [vmem:[#allocation57_spill] sm:$0xff]  ;;  %v7312_v26 = vld [vmem:[#allocation58_spill] sm:$0xff] }
 0x402   :  { %4273 = vmatprep.subr.bf16.mxu0 %v7302_v3  ;;  %4337 = vmatprep.subr.bf16.mxu1 %v7303_v34  ;;  %v7313_v3 = vld [vmem:[#allocation59_spill] sm:$0xff]  ;;  %v7314_v34 = vld [vmem:[#allocation60_spill] sm:$0xff] }
 0x405   :  { %4275 = vmatpush1.bf16.msra.mxu0 %v7304_v33  ;;  %4339 = vmatpush1.bf16.msra.mxu1 %v7305_v28  ;;  %v7315_v33 = vld [vmem:[#allocation61_spill] sm:$0xff]  ;;  %v7316_v28 = vld [vmem:[#allocation62_spill] sm:$0xff] }
 0x406   :  { %4277 = vmatprep.subr.bf16.mxu0 %v7306_v15  ;;  %4341 = vmatprep.subr.bf16.mxu1 %v7307_v21  ;;  %v7317_v15 = vld [vmem:[#allocation63_spill] sm:$0xff]  ;;  %v7318_v21 = vld [vmem:[#allocation64_spill] sm:$0xff] }
 0x409   :  { %4279 = vmatpush1.bf16.msra.mxu0 %v7308_v22  ;;  %4343 = vmatpush1.bf16.msra.mxu1 %v7309_v51  ;;  %v7319_v22 = vld [vmem:[#allocation65_spill] sm:$0xff]  ;;  %v7320_v51 = vld [vmem:[#allocation66_spill] sm:$0xff] }
 0x40a   :  { %4281 = vmatprep.subr.bf16.mxu0 %v7310_v61  ;;  %4345 = vmatprep.subr.bf16.mxu1 %v7311_v25  ;;  %v7321_v61 = vld [vmem:[#allocation67_spill] sm:$0xff]  ;;  %v7322_v25 = vld [vmem:[#allocation68_spill] sm:$0xff] }
 0x40d   :  { %4283 = vmatpush1.bf16.msra.mxu0 %v7312_v26  ;;  %4347 = vmatpush1.bf16.msra.mxu1 %v7313_v3  ;;  %v7323_v26 = vld [vmem:[#allocation69_spill] sm:$0xff]  ;;  %v7324_v3 = vld [vmem:[#allocation70_spill] sm:$0xff] }
 0x40e   :  { %4285 = vmatprep.subr.bf16.mxu0 %v7314_v34  ;;  %4349 = vmatprep.subr.bf16.mxu1 %v7315_v33  ;;  %v7325_v34 = vld [vmem:[#allocation71_spill] sm:$0xff]  ;;  %v7326_v33 = vld [vmem:[#allocation16_spill] sm:$0xff] }
 0x411   :  { %4287 = vmatpush1.bf16.msra.mxu0 %v7316_v28  ;;  %4351 = vmatpush1.bf16.msra.mxu1 %v7317_v15  ;;  %v7327_v28 = vld [vmem:[#allocation17_spill] sm:$0xff] }
 0x412   :  { %4289 = vmatprep.subr.bf16.mxu0 %v7318_v21  ;;  %4353 = vmatprep.subr.bf16.mxu1 %v7319_v22 }
 0x415   :  { %4291 = vmatpush1.bf16.msra.mxu0 %v7320_v51  ;;  %4355 = vmatpush1.bf16.msra.mxu1 %v7321_v61 }
 0x416   :  { %4293 = vmatprep.subr.bf16.mxu0 %v7322_v25  ;;  %4357 = vmatprep.subr.bf16.mxu1 %v7323_v26  ;;  %v7329_v26 = vld [vmem:[#allocation77_spill] sm:$0xff] }
 0x419   :  { %4295 = vmatpush1.bf16.msra.mxu0 %v7324_v3  ;;  %4359 = vmatpush1.bf16.msra.mxu1 %v7325_v34 }
 0x41a   :  { %4361 = vmatprep.subr.bf16.mxu0 %v7326_v33  ;;  %4393 = vmatprep.subr.bf16.mxu1 %v7327_v28 }
 0x48f   :  { %v1548_v15 = vpop.f32.mrb[20].mxu0  ;;  %v1619_v21 = vpop.f32.mrb[20].mxu1 }
 0x490   :  { %v1549_v22 = vadd.f32 %v1548_v15, %v7328_v30  ;;  %v1550_v12 = vpop.f32.mrb[21].mxu0  ;;  %v1621_v51 = vpop.f32.mrb[21].mxu1  ;;  %v1620_v34 = vadd.f32 %v1619_v21, %v7269_v2  ;;  %v7330_v21 = vld [vmem:[#allocation73_spill] sm:$0xff] }
 0x491   :  { %v1551_v61 = vadd.f32 %v1550_v12, %v7267_v29  ;;  %v1622_v3 = vadd.f32 %v1621_v51, %v7329_v26 }
 0x492   :  { %v3490_v43 = vmul.f32 -1.442695, %v1549_v22 }
 0x493   :  { %v3491_v25 = vmul.f32 -1.442695, %v1551_v61  ;;  %v3492_v55 = vmul.f32 -1.442695, %v1622_v3 }
 0x494   :  { %5308 = vpow2.f32 %v3490_v43 }
 0x495   :  { %5310 = vpow2.f32 %v3491_v25 }
 0x496   :  { %5312 = vpow2.f32 %v3492_v55 }
 0x497   :  { %5314 = vtanh.f32 %v1620_v34 }
 0x49e   :  { %v5309_v33 = vpop.eup %5308 }
 0x49f   :  { %v5311_v52 = vpop.eup %5310  ;;  %v1627_v28 = vadd.f32 1.0, %v5309_v33 }
 0x4a0   :  { %v1633_v0 = vadd.f32 1.0, %v5311_v52  ;;  %v5313_v15 = vpop.eup %5312 }
 0x4a1   :  { %5316 = vrcp.f32 %v1627_v28  ;;  %v5315_v30 = vpop.eup %5314  ;;  %v1640_v43 = vadd.f32 1.0, %v5313_v15 }
 0x4a2   :  { %5318 = vrcp.f32 %v1633_v0 }
 0x4a3   :  { %5320 = vrcp.f32 %v1640_v43 }
 0x4ab   :  { %v5317_v12 = vpop.eup %5316 }
 0x4ac   :  { %v5319_v22 = vpop.eup %5318  ;;  %v1644_v61 = vmul.f32 %v5317_v12, %v5315_v30  ;;  %v7331_v30 = vld [vmem:[#allocation75_spill] sm:$0xff] }
 0x4ad   :  { %v1643_v25 = vmul.f32 %v5319_v22, %v6349_v59  ;;  %v5321_v59 = vpop.eup %5320 }
 0x4af   :  { %v1718_v51 = vpop.f32.mrb[6].mxu0  ;;  %v1789_v3 = vpop.f32.mrb[6].mxu1  ;;  %v6463_v26 = vadd.f32 %v1644_v61, %v1643_v25 }
 0x4b0   :  { %v5158_v33 = vadd.f32 %v1718_v51, %v7330_v21  ;;  %v1720_v55 = vpop.f32.mrb[7].mxu0  ;;  %v1791_v34 = vpop.f32.mrb[7].mxu1  ;;  %v5174_v61 = vadd.f32 %v1789_v3, %v6108_v41 }
 0x4b1   :  { %v5159_v52 = vadd.f32 %v1720_v55, %v7210_v37  ;;  %5322 = vtanh.f32 %v6463_v26  ;;  %v5175_v15 = vadd.f32 %v1791_v34, %v7331_v30 }
 0x4b2   :  { %v3493_v0 = vmul.f32 -1.442695, %v5158_v33 }
 0x4b3   :  { %v3494_v28 = vmul.f32 -1.442695, %v5159_v52  ;;  %v3495_v22 = vmul.f32 -1.442695, %v5175_v15 }
 0x4b4   :  { %5324 = vpow2.f32 %v3493_v0 }
 0x4b5   :  { %5326 = vpow2.f32 %v3494_v28 }
 0x4b6   :  { %5328 = vpow2.f32 %v3495_v22 }
 0x4b7   :  { %5330 = vtanh.f32 %v5174_v61  ;;  %v7335_v61 = vld [vmem:[#allocation21_spill] sm:$0xff] }
 0x4bb   :  { %v5323_v12 = vpop.eup %5322 }
 0x4bc   :  { %v1647_v43 = vmul.f32 %v5323_v12, %v5321_v59 }
 0x4be   :  { %v5325_v25 = vpop.eup %5324  ;;  %1886 = vmatprep.mubr.f32.mxu0 %v1647_v43  ;;  %1957 = vmatprep.mubr.f32.mxu1 %v1647_v43  ;;  %v7336_v43 = vld [vmem:[#allocation22_spill] sm:$0xff] }
 0x4bf   :  { %v5327_v51 = vpop.eup %5326  ;;  %v1801_v21 = vadd.f32 1.0, %v5325_v25  ;;  %v7337_v25 = vld [vmem:[#allocation23_spill] sm:$0xff] }
 0x4c0   :  { %v1807_v55 = vadd.f32 1.0, %v5327_v51  ;;  %v5329_v33 = vpop.eup %5328  ;;  %v7338_v51 = vld [vmem:[#allocation24_spill] sm:$0xff] }
 0x4c1   :  { %5332 = vrcp.f32 %v1801_v21  ;;  %v5331_v52 = vpop.eup %5330  ;;  %v1814_v30 = vadd.f32 1.0, %v5329_v33  ;;  %v7333_v21 = vld [vmem:[#allocation19_spill] sm:$0xff]  ;;  %v7340_v33 = vld [vmem:[#allocation26_spill] sm:$0xff] }
 0x4c2   :  { %5334 = vrcp.f32 %v1807_v55  ;;  %v7339_v55 = vld [vmem:[#allocation25_spill] sm:$0xff] }
 0x4c3   :  { %5336 = vrcp.f32 %v1814_v30  ;;  %v7334_v30 = vld [vmem:[#allocation20_spill] sm:$0xff] }
 0x4cb   :  { %v5333_v0 = vpop.eup %5332 }
 0x4cc   :  { %v5335_v34 = vpop.eup %5334  ;;  %v1818_v28 = vmul.f32 %v5333_v0, %v5331_v52  ;;  %v7341_v52 = vld [vmem:[#allocation27_spill] sm:$0xff]  ;;  %v7342_v0 = vld [vmem:[#allocation28_spill] sm:$0xff] }
 0x4cd   :  { %v1817_v15 = vmul.f32 %v5335_v34, %v6357_v62  ;;  %v5337_v59 = vpop.eup %5336  ;;  %v7332_v62 = vld [vmem:[#allocation18_spill] sm:$0xff]  ;;  %v7343_v34 = vld [vmem:[#allocation29_spill] sm:$0xff] }
 0x4cf   :  { %v6471_v3 = vadd.f32 %v1818_v28, %v1817_v15  ;;  %v7344_v28 = vld [vmem:[#allocation30_spill] sm:$0xff]  ;;  %v7345_v15 = vld [vmem:[#allocation31_spill] sm:$0xff] }
 0x4d1   :  { %5338 = vtanh.f32 %v6471_v3 }
 0x4db   :  { %v5339_v12 = vpop.eup %5338 }
 0x4dc   :  { %v1821_v22 = vmul.f32 %v5339_v12, %v5337_v59  ;;  %v7346_v59 = vld [vmem:[#allocation32_spill] sm:$0xff]  ;;  %v7347_v12 = vld [vmem:[#allocation33_spill] sm:$0xff] }
 0x4de   :  { %1887 = vmatmul.mubr.f32.vlgmr.msra.gmra.mrb[22].mxu0 %v1821_v22  ;;  %1958 = vmatmul.mubr.f32.vlgmr.msra.gmra.mrb[22].mxu1 %v1821_v22 }
 0x4df   :  { %4363 = vmatpush1.bf16.msra.mxu0 %v5739_v35  ;;  %4395 = vmatpush1.bf16.msra.mxu1 %v5742_v38 }
 0x4e0   :  { %4365 = vmatprep.subr.bf16.mxu0 %v5745_v42  ;;  %4397 = vmatprep.subr.bf16.mxu1 %v5751_v47 }
 0x4e1   :  { %2056 = vmatprep.mubr.f32.mxu0 %v7149_v16  ;;  %2127 = vmatprep.mubr.f32.mxu1 %v7149_v16 }
 0x4e3   :  { %4367 = vmatpush1.bf16.msra.mxu0 %v5755_v50  ;;  %4399 = vmatpush1.bf16.msra.mxu1 %v5759_v54 }
 0x4e4   :  { %4369 = vmatprep.subr.bf16.mxu0 %v5763_v57  ;;  %4401 = vmatprep.subr.bf16.mxu1 %v5767_v60 }
 0x4e7   :  { %4371 = vmatpush1.bf16.msra.mxu0 %v5774_v1  ;;  %4403 = vmatpush1.bf16.msra.mxu1 %v5778_v4 }
 0x4e8   :  { %4373 = vmatprep.subr.bf16.mxu0 %v5782_v7  ;;  %4405 = vmatprep.subr.bf16.mxu1 %v5786_v10 }
 0x4eb   :  { %4375 = vmatpush1.bf16.msra.mxu0 %v5793_v14  ;;  %4407 = vmatpush1.bf16.msra.mxu1 %v5797_v17 }
 0x4ec   :  { %4377 = vmatprep.subr.bf16.mxu0 %v5801_v20  ;;  %4409 = vmatprep.subr.bf16.mxu1 %v5805_v23 }
 0x4ef   :  { %4379 = vmatpush1.bf16.msra.mxu0 %v5812_v27  ;;  %4411 = vmatpush1.bf16.msra.mxu1 %v5816_v32 }
 0x4f0   :  { %4381 = vmatprep.subr.bf16.mxu0 %v5820_v36  ;;  %4413 = vmatprep.subr.bf16.mxu1 %v5824_v40 }
 0x4f3   :  { %4383 = vmatpush1.bf16.msra.mxu0 %v5831_v45  ;;  %4415 = vmatpush1.bf16.msra.mxu1 %v5835_v49 }
 0x4f4   :  { %4385 = vmatprep.subr.bf16.mxu0 %v5839_v53  ;;  %4417 = vmatprep.subr.bf16.mxu1 %v5843_v58 }
 0x4f7   :  { %4387 = vmatpush1.bf16.msra.mxu0 %v5850_v63  ;;  %4419 = vmatpush1.bf16.msra.mxu1 %v5854_v5 }
 0x4f8   :  { %4389 = vmatprep.subr.bf16.mxu0 %v5858_v9  ;;  %4421 = vmatprep.subr.bf16.mxu1 %v5862_v13 }
 0x4fb   :  { %4391 = vmatpush1.bf16.msra.mxu0 %v5869_v19  ;;  %4423 = vmatpush1.bf16.msra.mxu1 %v5873_v24 }
 0x4fc   :  { %4425 = vmatprep.subr.bf16.mxu0 %v5877_v31  ;;  %4489 = vmatprep.subr.bf16.mxu1 %v5881_v39 }
 0x4fe   :  { %2057 = vmatmul.mubr.f32.vlgmr.msra.gmra.mrb[8].mxu0 %v1821_v22  ;;  %2128 = vmatmul.mubr.f32.vlgmr.msra.gmra.mrb[8].mxu1 %v1821_v22  ;;  %v7348_v22 = vld [vmem:[#allocation34_spill] sm:$0xff] }
 0x4ff   :  { %4427 = vmatpush1.bf16.msra.mxu0 %v5885_v44  ;;  %4491 = vmatpush1.bf16.msra.mxu1 %v5889_v46 }
 0x500   :  { %4429 = vmatprep.subr.bf16.mxu0 %v5891_v48  ;;  %4493 = vmatprep.subr.bf16.mxu1 %v5895_v56 }
 0x503   :  { %4431 = vmatpush1.bf16.msra.mxu0 %v5901_v6  ;;  %4495 = vmatpush1.bf16.msra.mxu1 %v5905_v8 }
 0x504   :  { %4433 = vmatprep.subr.bf16.mxu0 %v5907_v11  ;;  %4497 = vmatprep.subr.bf16.mxu1 %v5910_v18 }
 0x507   :  { %4435 = vmatpush1.bf16.msra.mxu0 %v7332_v62  ;;  %4499 = vmatpush1.bf16.msra.mxu1 %v7333_v21 }
 0x508   :  { %4437 = vmatprep.subr.bf16.mxu0 %v7334_v30  ;;  %4501 = vmatprep.subr.bf16.mxu1 %v7335_v61 }
 0x50b   :  { %4439 = vmatpush1.bf16.msra.mxu0 %v7336_v43  ;;  %4503 = vmatpush1.bf16.msra.mxu1 %v7337_v25  ;;  %v7388_v25 = vld [vmem:[#allocation72_spill] sm:$0xff] }
 0x50c   :  { %4441 = vmatprep.subr.bf16.mxu0 %v7338_v51  ;;  %4505 = vmatprep.subr.bf16.mxu1 %v7339_v55  ;;  %v7349_v51 = vld [vmem:[#allocation35_spill] sm:$0xff]  ;;  %v7350_v55 = vld [vmem:[#allocation36_spill] sm:$0xff] }
 0x50f   :  { %4443 = vmatpush1.bf16.msra.mxu0 %v7340_v33  ;;  %4507 = vmatpush1.bf16.msra.mxu1 %v7341_v52  ;;  %v7351_v33 = vld [vmem:[#allocation37_spill] sm:$0xff]  ;;  %v7352_v52 = vld [vmem:[#allocation38_spill] sm:$0xff] }
 0x510   :  { %4445 = vmatprep.subr.bf16.mxu0 %v7342_v0  ;;  %4509 = vmatprep.subr.bf16.mxu1 %v7343_v34  ;;  %v7353_v0 = vld [vmem:[#allocation39_spill] sm:$0xff]  ;;  %v7354_v34 = vld [vmem:[#allocation40_spill] sm:$0xff] }
 0x513   :  { %4447 = vmatpush1.bf16.msra.mxu0 %v7344_v28  ;;  %4511 = vmatpush1.bf16.msra.mxu1 %v7345_v15  ;;  %v7355_v28 = vld [vmem:[#allocation41_spill] sm:$0xff]  ;;  %v7356_v15 = vld [vmem:[#allocation42_spill] sm:$0xff] }
 0x514   :  { %4449 = vmatprep.subr.bf16.mxu0 %v7346_v59  ;;  %4513 = vmatprep.subr.bf16.mxu1 %v7347_v12  ;;  %v7357_v59 = vld [vmem:[#allocation43_spill] sm:$0xff]  ;;  %v7358_v12 = vld [vmem:[#allocation44_spill] sm:$0xff] }
 0x517   :  { %4451 = vmatpush1.bf16.msra.mxu0 %v7348_v22  ;;  %4515 = vmatpush1.bf16.msra.mxu1 %v7349_v51  ;;  %v7359_v22 = vld [vmem:[#allocation45_spill] sm:$0xff]  ;;  %v7360_v51 = vld [vmem:[#allocation46_spill] sm:$0xff] }
 0x518   :  { %4453 = vmatprep.subr.bf16.mxu0 %v7350_v55  ;;  %4517 = vmatprep.subr.bf16.mxu1 %v7351_v33  ;;  %v7361_v55 = vld [vmem:[#allocation47_spill] sm:$0xff]  ;;  %v7362_v33 = vld [vmem:[#allocation48_spill] sm:$0xff] }
 0x51b   :  { %4455 = vmatpush1.bf16.msra.mxu0 %v7352_v52  ;;  %4519 = vmatpush1.bf16.msra.mxu1 %v7353_v0  ;;  %v7363_v52 = vld [vmem:[#allocation49_spill] sm:$0xff]  ;;  %v7364_v0 = vld [vmem:[#allocation50_spill] sm:$0xff] }
 0x51c   :  { %4457 = vmatprep.subr.bf16.mxu0 %v7354_v34  ;;  %4521 = vmatprep.subr.bf16.mxu1 %v7355_v28  ;;  %v7365_v34 = vld [vmem:[#allocation51_spill] sm:$0xff]  ;;  %v7366_v28 = vld [vmem:[#allocation52_spill] sm:$0xff] }
 0x51f   :  { %4459 = vmatpush1.bf16.msra.mxu0 %v7356_v15  ;;  %4523 = vmatpush1.bf16.msra.mxu1 %v7357_v59  ;;  %v7367_v15 = vld [vmem:[#allocation53_spill] sm:$0xff]  ;;  %v7368_v59 = vld [vmem:[#allocation54_spill] sm:$0xff] }
 0x520   :  { %4461 = vmatprep.subr.bf16.mxu0 %v7358_v12  ;;  %4525 = vmatprep.subr.bf16.mxu1 %v7359_v22  ;;  %v7369_v12 = vld [vmem:[#allocation55_spill] sm:$0xff]  ;;  %v7370_v22 = vld [vmem:[#allocation56_spill] sm:$0xff] }
 0x523   :  { %4463 = vmatpush1.bf16.msra.mxu0 %v7360_v51  ;;  %4527 = vmatpush1.bf16.msra.mxu1 %v7361_v55  ;;  %v7371_v51 = vld [vmem:[#allocation57_spill] sm:$0xff]  ;;  %v7372_v55 = vld [vmem:[#allocation58_spill] sm:$0xff] }
 0x524   :  { %4465 = vmatprep.subr.bf16.mxu0 %v7362_v33  ;;  %4529 = vmatprep.subr.bf16.mxu1 %v7363_v52  ;;  %v7373_v33 = vld [vmem:[#allocation59_spill] sm:$0xff]  ;;  %v7374_v52 = vld [vmem:[#allocation60_spill] sm:$0xff] }
 0x527   :  { %4467 = vmatpush1.bf16.msra.mxu0 %v7364_v0  ;;  %4531 = vmatpush1.bf16.msra.mxu1 %v7365_v34  ;;  %v7375_v0 = vld [vmem:[#allocation61_spill] sm:$0xff]  ;;  %v7376_v34 = vld [vmem:[#allocation62_spill] sm:$0xff] }
 0x528   :  { %4469 = vmatprep.subr.bf16.mxu0 %v7366_v28  ;;  %4533 = vmatprep.subr.bf16.mxu1 %v7367_v15  ;;  %v7377_v28 = vld [vmem:[#allocation63_spill] sm:$0xff]  ;;  %v7378_v15 = vld [vmem:[#allocation64_spill] sm:$0xff] }
 0x52b   :  { %4471 = vmatpush1.bf16.msra.mxu0 %v7368_v59  ;;  %4535 = vmatpush1.bf16.msra.mxu1 %v7369_v12  ;;  %v7379_v59 = vld [vmem:[#allocation65_spill] sm:$0xff]  ;;  %v7380_v12 = vld [vmem:[#allocation66_spill] sm:$0xff] }
 0x52c   :  { %4473 = vmatprep.subr.bf16.mxu0 %v7370_v22  ;;  %4537 = vmatprep.subr.bf16.mxu1 %v7371_v51  ;;  %v7381_v22 = vld [vmem:[#allocation67_spill] sm:$0xff]  ;;  %v7382_v51 = vld [vmem:[#allocation68_spill] sm:$0xff] }
 0x52f   :  { %4475 = vmatpush1.bf16.msra.mxu0 %v7372_v55  ;;  %4539 = vmatpush1.bf16.msra.mxu1 %v7373_v33  ;;  %v7383_v55 = vld [vmem:[#allocation69_spill] sm:$0xff]  ;;  %v7384_v33 = vld [vmem:[#allocation70_spill] sm:$0xff] }
 0x530   :  { %4477 = vmatprep.subr.bf16.mxu0 %v7374_v52  ;;  %4541 = vmatprep.subr.bf16.mxu1 %v7375_v0  ;;  %v7385_v52 = vld [vmem:[#allocation71_spill] sm:$0xff]  ;;  %v7386_v0 = vld [vmem:[#allocation16_spill] sm:$0xff] }
 0x533   :  { %4479 = vmatpush1.bf16.msra.mxu0 %v7376_v34  ;;  %4543 = vmatpush1.bf16.msra.mxu1 %v7377_v28  ;;  %v7387_v34 = vld [vmem:[#allocation17_spill] sm:$0xff] }
 0x534   :  { %4481 = vmatprep.subr.bf16.mxu0 %v7378_v15  ;;  %4545 = vmatprep.subr.bf16.mxu1 %v7379_v59 }
 0x537   :  { %4483 = vmatpush1.bf16.msra.mxu0 %v7380_v12  ;;  %4547 = vmatpush1.bf16.msra.mxu1 %v7381_v22 }
 0x538   :  { %4485 = vmatprep.subr.bf16.mxu0 %v7382_v51  ;;  %4549 = vmatprep.subr.bf16.mxu1 %v7383_v55  ;;  %v7389_v55 = vld [vmem:[#allocation77_spill] sm:$0xff] }
 0x53b   :  { %4487 = vmatpush1.bf16.msra.mxu0 %v7384_v33  ;;  %4551 = vmatpush1.bf16.msra.mxu1 %v7385_v52 }
 0x53c   :  { %4553 = vmatprep.subr.bf16.mxu0 %v7386_v0  ;;  %4585 = vmatprep.subr.bf16.mxu1 %v7387_v34 }
 0x5b1   :  { %v1888_v28 = vpop.f32.mrb[22].mxu0  ;;  %v1959_v15 = vpop.f32.mrb[22].mxu1 }
 0x5b2   :  { %v1889_v59 = vadd.f32 %v1888_v28, %v7388_v25  ;;  %v1890_v43 = vpop.f32.mrb[23].mxu0  ;;  %v1961_v12 = vpop.f32.mrb[23].mxu1  ;;  %v1960_v52 = vadd.f32 %v1959_v15, %v7269_v2  ;;  %v7390_v15 = vld [vmem:[#allocation73_spill] sm:$0xff] }
 0x5b3   :  { %v1891_v22 = vadd.f32 %v1890_v43, %v7267_v29  ;;  %v1962_v33 = vadd.f32 %v1961_v12, %v7389_v55 }
 0x5b4   :  { %v3496_v61 = vmul.f32 -1.442695, %v1889_v59 }
 0x5b5   :  { %v3497_v51 = vmul.f32 -1.442695, %v1891_v22  ;;  %v3498_v30 = vmul.f32 -1.442695, %v1962_v33 }
 0x5b6   :  { %5340 = vpow2.f32 %v3496_v61 }
 0x5b7   :  { %5342 = vpow2.f32 %v3497_v51 }
 0x5b8   :  { %5344 = vpow2.f32 %v3498_v30 }
 0x5b9   :  { %5346 = vtanh.f32 %v1960_v52 }
 0x5c0   :  { %v5341_v0 = vpop.eup %5340 }
 0x5c1   :  { %v5343_v21 = vpop.eup %5342  ;;  %v1967_v34 = vadd.f32 1.0, %v5341_v0 }
 0x5c2   :  { %v1973_v62 = vadd.f32 1.0, %v5343_v21  ;;  %v5345_v28 = vpop.eup %5344 }
 0x5c3   :  { %5348 = vrcp.f32 %v1967_v34  ;;  %v5347_v25 = vpop.eup %5346  ;;  %v1980_v61 = vadd.f32 1.0, %v5345_v28 }
 0x5c4   :  { %5350 = vrcp.f32 %v1973_v62 }
 0x5c5   :  { %5352 = vrcp.f32 %v1980_v61 }
 0x5cd   :  { %v5349_v43 = vpop.eup %5348 }
 0x5ce   :  { %v5351_v59 = vpop.eup %5350  ;;  %v1984_v22 = vmul.f32 %v5349_v43, %v5347_v25  ;;  %v7391_v25 = vld [vmem:[#allocation75_spill] sm:$0xff] }
 0x5cf   :  { %v1983_v51 = vmul.f32 %v5351_v59, %v6463_v26  ;;  %v5353_v26 = vpop.eup %5352 }
 0x5d1   :  { %v2058_v12 = vpop.f32.mrb[8].mxu0  ;;  %v2129_v33 = vpop.f32.mrb[8].mxu1  ;;  %v6577_v55 = vadd.f32 %v1984_v22, %v1983_v51 }
 0x5d2   :  { %v5160_v0 = vadd.f32 %v2058_v12, %v7390_v15  ;;  %v2060_v30 = vpop.f32.mrb[9].mxu0  ;;  %v2131_v52 = vpop.f32.mrb[9].mxu1  ;;  %v5176_v22 = vadd.f32 %v2129_v33, %v6108_v41 }
 0x5d3   :  { %v5161_v21 = vadd.f32 %v2060_v30, %v7210_v37  ;;  %5354 = vtanh.f32 %v6577_v55  ;;  %v5177_v28 = vadd.f32 %v2131_v52, %v7391_v25 }
 0x5d4   :  { %v3499_v62 = vmul.f32 -1.442695, %v5160_v0 }
 0x5d5   :  { %v3500_v34 = vmul.f32 -1.442695, %v5161_v21  ;;  %v3501_v59 = vmul.f32 -1.442695, %v5177_v28 }
 0x5d6   :  { %5356 = vpow2.f32 %v3499_v62 }
 0x5d7   :  { %5358 = vpow2.f32 %v3500_v34 }
 0x5d8   :  { %5360 = vpow2.f32 %v3501_v59 }
 0x5d9   :  { %5362 = vtanh.f32 %v5176_v22  ;;  %v7395_v22 = vld [vmem:[#allocation21_spill] sm:$0xff] }
 0x5dd   :  { %v5355_v43 = vpop.eup %5354 }
 0x5de   :  { %v1987_v61 = vmul.f32 %v5355_v43, %v5353_v26 }
 0x5e0   :  { %v5357_v51 = vpop.eup %5356  ;;  %2226 = vmatprep.mubr.f32.mxu0 %v1987_v61  ;;  %2297 = vmatprep.mubr.f32.mxu1 %v1987_v61  ;;  %v7396_v61 = vld [vmem:[#allocation22_spill] sm:$0xff] }
 0x5e1   :  { %v5359_v12 = vpop.eup %5358  ;;  %v2141_v15 = vadd.f32 1.0, %v5357_v51  ;;  %v7397_v51 = vld [vmem:[#allocation23_spill] sm:$0xff] }
 0x5e2   :  { %v2147_v30 = vadd.f32 1.0, %v5359_v12  ;;  %v5361_v0 = vpop.eup %5360  ;;  %v7398_v12 = vld [vmem:[#allocation24_spill] sm:$0xff] }
 0x5e3   :  { %5364 = vrcp.f32 %v2141_v15  ;;  %v5363_v21 = vpop.eup %5362  ;;  %v2154_v25 = vadd.f32 1.0, %v5361_v0  ;;  %v7393_v15 = vld [vmem:[#allocation19_spill] sm:$0xff]  ;;  %v7400_v0 = vld [vmem:[#allocation26_spill] sm:$0xff] }
 0x5e4   :  { %5366 = vrcp.f32 %v2147_v30  ;;  %v7399_v30 = vld [vmem:[#allocation25_spill] sm:$0xff] }
 0x5e5   :  { %5368 = vrcp.f32 %v2154_v25  ;;  %v7394_v25 = vld [vmem:[#allocation20_spill] sm:$0xff] }
 0x5ed   :  { %v5365_v62 = vpop.eup %5364 }
 0x5ee   :  { %v5367_v52 = vpop.eup %5366  ;;  %v2158_v34 = vmul.f32 %v5365_v62, %v5363_v21  ;;  %v7401_v21 = vld [vmem:[#allocation27_spill] sm:$0xff]  ;;  %v7402_v62 = vld [vmem:[#allocation28_spill] sm:$0xff] }
 0x5ef   :  { %v2157_v28 = vmul.f32 %v5367_v52, %v6471_v3  ;;  %v5369_v26 = vpop.eup %5368  ;;  %v7392_v3 = vld [vmem:[#allocation18_spill] sm:$0xff]  ;;  %v7403_v52 = vld [vmem:[#allocation29_spill] sm:$0xff] }
 0x5f1   :  { %v6585_v33 = vadd.f32 %v2158_v34, %v2157_v28  ;;  %v7404_v34 = vld [vmem:[#allocation30_spill] sm:$0xff]  ;;  %v7405_v28 = vld [vmem:[#allocation31_spill] sm:$0xff] }
 0x5f3   :  { %5370 = vtanh.f32 %v6585_v33 }
 0x5fd   :  { %v5371_v43 = vpop.eup %5370 }
 0x5fe   :  { %v2161_v59 = vmul.f32 %v5371_v43, %v5369_v26  ;;  %v7406_v26 = vld [vmem:[#allocation32_spill] sm:$0xff]  ;;  %v7407_v43 = vld [vmem:[#allocation33_spill] sm:$0xff] }
 0x600   :  { %2227 = vmatmul.mubr.f32.vlgmr.msra.gmra.mrb[24].mxu0 %v2161_v59  ;;  %2298 = vmatmul.mubr.f32.vlgmr.msra.gmra.mrb[24].mxu1 %v2161_v59 }
 0x601   :  { %4555 = vmatpush1.bf16.msra.mxu0 %v5739_v35  ;;  %4587 = vmatpush1.bf16.msra.mxu1 %v5742_v38 }
 0x602   :  { %4557 = vmatprep.subr.bf16.mxu0 %v5745_v42  ;;  %4589 = vmatprep.subr.bf16.mxu1 %v5751_v47 }
 0x603   :  { %2396 = vmatprep.mubr.f32.mxu0 %v7149_v16  ;;  %2467 = vmatprep.mubr.f32.mxu1 %v7149_v16 }
 0x605   :  { %4559 = vmatpush1.bf16.msra.mxu0 %v5755_v50  ;;  %4591 = vmatpush1.bf16.msra.mxu1 %v5759_v54 }
 0x606   :  { %4561 = vmatprep.subr.bf16.mxu0 %v5763_v57  ;;  %4593 = vmatprep.subr.bf16.mxu1 %v5767_v60 }
 0x609   :  { %4563 = vmatpush1.bf16.msra.mxu0 %v5774_v1  ;;  %4595 = vmatpush1.bf16.msra.mxu1 %v5778_v4 }
 0x60a   :  { %4565 = vmatprep.subr.bf16.mxu0 %v5782_v7  ;;  %4597 = vmatprep.subr.bf16.mxu1 %v5786_v10 }
 0x60d   :  { %4567 = vmatpush1.bf16.msra.mxu0 %v5793_v14  ;;  %4599 = vmatpush1.bf16.msra.mxu1 %v5797_v17 }
 0x60e   :  { %4569 = vmatprep.subr.bf16.mxu0 %v5801_v20  ;;  %4601 = vmatprep.subr.bf16.mxu1 %v5805_v23 }
 0x611   :  { %4571 = vmatpush1.bf16.msra.mxu0 %v5812_v27  ;;  %4603 = vmatpush1.bf16.msra.mxu1 %v5816_v32 }
 0x612   :  { %4573 = vmatprep.subr.bf16.mxu0 %v5820_v36  ;;  %4605 = vmatprep.subr.bf16.mxu1 %v5824_v40 }
 0x615   :  { %4575 = vmatpush1.bf16.msra.mxu0 %v5831_v45  ;;  %4607 = vmatpush1.bf16.msra.mxu1 %v5835_v49 }
 0x616   :  { %4577 = vmatprep.subr.bf16.mxu0 %v5839_v53  ;;  %4609 = vmatprep.subr.bf16.mxu1 %v5843_v58 }
 0x619   :  { %4579 = vmatpush1.bf16.msra.mxu0 %v5850_v63  ;;  %4611 = vmatpush1.bf16.msra.mxu1 %v5854_v5 }
 0x61a   :  { %4581 = vmatprep.subr.bf16.mxu0 %v5858_v9  ;;  %4613 = vmatprep.subr.bf16.mxu1 %v5862_v13 }
 0x61d   :  { %4583 = vmatpush1.bf16.msra.mxu0 %v5869_v19  ;;  %4615 = vmatpush1.bf16.msra.mxu1 %v5873_v24 }
 0x61e   :  { %4617 = vmatprep.subr.bf16.mxu0 %v5877_v31  ;;  %4681 = vmatprep.subr.bf16.mxu1 %v5881_v39 }
 0x620   :  { %2397 = vmatmul.mubr.f32.vlgmr.msra.gmra.mrb[10].mxu0 %v2161_v59  ;;  %2468 = vmatmul.mubr.f32.vlgmr.msra.gmra.mrb[10].mxu1 %v2161_v59  ;;  %v7408_v59 = vld [vmem:[#allocation34_spill] sm:$0xff] }
 0x621   :  { %4619 = vmatpush1.bf16.msra.mxu0 %v5885_v44  ;;  %4683 = vmatpush1.bf16.msra.mxu1 %v5889_v46 }
 0x622   :  { %4621 = vmatprep.subr.bf16.mxu0 %v5891_v48  ;;  %4685 = vmatprep.subr.bf16.mxu1 %v5895_v56 }
 0x625   :  { %4623 = vmatpush1.bf16.msra.mxu0 %v5901_v6  ;;  %4687 = vmatpush1.bf16.msra.mxu1 %v5905_v8 }
 0x626   :  { %4625 = vmatprep.subr.bf16.mxu0 %v5907_v11  ;;  %4689 = vmatprep.subr.bf16.mxu1 %v5910_v18 }
 0x629   :  { %4627 = vmatpush1.bf16.msra.mxu0 %v7392_v3  ;;  %4691 = vmatpush1.bf16.msra.mxu1 %v7393_v15 }
 0x62a   :  { %4629 = vmatprep.subr.bf16.mxu0 %v7394_v25  ;;  %4693 = vmatprep.subr.bf16.mxu1 %v7395_v22 }
 0x62d   :  { %4631 = vmatpush1.bf16.msra.mxu0 %v7396_v61  ;;  %4695 = vmatpush1.bf16.msra.mxu1 %v7397_v51  ;;  %v7448_v51 = vld [vmem:[#allocation72_spill] sm:$0xff] }
 0x62e   :  { %4633 = vmatprep.subr.bf16.mxu0 %v7398_v12  ;;  %4697 = vmatprep.subr.bf16.mxu1 %v7399_v30  ;;  %v7409_v12 = vld [vmem:[#allocation35_spill] sm:$0xff]  ;;  %v7410_v30 = vld [vmem:[#allocation36_spill] sm:$0xff] }
 0x631   :  { %4635 = vmatpush1.bf16.msra.mxu0 %v7400_v0  ;;  %4699 = vmatpush1.bf16.msra.mxu1 %v7401_v21  ;;  %v7411_v0 = vld [vmem:[#allocation37_spill] sm:$0xff]  ;;  %v7412_v21 = vld [vmem:[#allocation38_spill] sm:$0xff] }
 0x632   :  { %4637 = vmatprep.subr.bf16.mxu0 %v7402_v62  ;;  %4701 = vmatprep.subr.bf16.mxu1 %v7403_v52  ;;  %v7413_v62 = vld [vmem:[#allocation39_spill] sm:$0xff]  ;;  %v7414_v52 = vld [vmem:[#allocation40_spill] sm:$0xff] }
 0x635   :  { %4639 = vmatpush1.bf16.msra.mxu0 %v7404_v34  ;;  %4703 = vmatpush1.bf16.msra.mxu1 %v7405_v28  ;;  %v7415_v34 = vld [vmem:[#allocation41_spill] sm:$0xff]  ;;  %v7416_v28 = vld [vmem:[#allocation42_spill] sm:$0xff] }
 0x636   :  { %4641 = vmatprep.subr.bf16.mxu0 %v7406_v26  ;;  %4705 = vmatprep.subr.bf16.mxu1 %v7407_v43  ;;  %v7417_v26 = vld [vmem:[#allocation43_spill] sm:$0xff]  ;;  %v7418_v43 = vld [vmem:[#allocation44_spill] sm:$0xff] }
 0x639   :  { %4643 = vmatpush1.bf16.msra.mxu0 %v7408_v59  ;;  %4707 = vmatpush1.bf16.msra.mxu1 %v7409_v12  ;;  %v7419_v59 = vld [vmem:[#allocation45_spill] sm:$0xff]  ;;  %v7420_v12 = vld [vmem:[#allocation46_spill] sm:$0xff] }
 0x63a   :  { %4645 = vmatprep.subr.bf16.mxu0 %v7410_v30  ;;  %4709 = vmatprep.subr.bf16.mxu1 %v7411_v0  ;;  %v7421_v30 = vld [vmem:[#allocation47_spill] sm:$0xff]  ;;  %v7422_v0 = vld [vmem:[#allocation48_spill] sm:$0xff] }
 0x63d   :  { %4647 = vmatpush1.bf16.msra.mxu0 %v7412_v21  ;;  %4711 = vmatpush1.bf16.msra.mxu1 %v7413_v62  ;;  %v7423_v21 = vld [vmem:[#allocation49_spill] sm:$0xff]  ;;  %v7424_v62 = vld [vmem:[#allocation50_spill] sm:$0xff] }
 0x63e   :  { %4649 = vmatprep.subr.bf16.mxu0 %v7414_v52  ;;  %4713 = vmatprep.subr.bf16.mxu1 %v7415_v34  ;;  %v7425_v52 = vld [vmem:[#allocation51_spill] sm:$0xff]  ;;  %v7426_v34 = vld [vmem:[#allocation52_spill] sm:$0xff] }
 0x641   :  { %4651 = vmatpush1.bf16.msra.mxu0 %v7416_v28  ;;  %4715 = vmatpush1.bf16.msra.mxu1 %v7417_v26  ;;  %v7427_v28 = vld [vmem:[#allocation53_spill] sm:$0xff]  ;;  %v7428_v26 = vld [vmem:[#allocation54_spill] sm:$0xff] }
 0x642   :  { %4653 = vmatprep.subr.bf16.mxu0 %v7418_v43  ;;  %4717 = vmatprep.subr.bf16.mxu1 %v7419_v59  ;;  %v7429_v43 = vld [vmem:[#allocation55_spill] sm:$0xff]  ;;  %v7430_v59 = vld [vmem:[#allocation56_spill] sm:$0xff] }
 0x645   :  { %4655 = vmatpush1.bf16.msra.mxu0 %v7420_v12  ;;  %4719 = vmatpush1.bf16.msra.mxu1 %v7421_v30  ;;  %v7431_v12 = vld [vmem:[#allocation57_spill] sm:$0xff]  ;;  %v7432_v30 = vld [vmem:[#allocation58_spill] sm:$0xff] }
 0x646   :  { %4657 = vmatprep.subr.bf16.mxu0 %v7422_v0  ;;  %4721 = vmatprep.subr.bf16.mxu1 %v7423_v21  ;;  %v7433_v0 = vld [vmem:[#allocation59_spill] sm:$0xff]  ;;  %v7434_v21 = vld [vmem:[#allocation60_spill] sm:$0xff] }
 0x649   :  { %4659 = vmatpush1.bf16.msra.mxu0 %v7424_v62  ;;  %4723 = vmatpush1.bf16.msra.mxu1 %v7425_v52  ;;  %v7435_v62 = vld [vmem:[#allocation61_spill] sm:$0xff]  ;;  %v7436_v52 = vld [vmem:[#allocation62_spill] sm:$0xff] }
 0x64a   :  { %4661 = vmatprep.subr.bf16.mxu0 %v7426_v34  ;;  %4725 = vmatprep.subr.bf16.mxu1 %v7427_v28  ;;  %v7437_v34 = vld [vmem:[#allocation63_spill] sm:$0xff]  ;;  %v7438_v28 = vld [vmem:[#allocation64_spill] sm:$0xff] }
 0x64d   :  { %4663 = vmatpush1.bf16.msra.mxu0 %v7428_v26  ;;  %4727 = vmatpush1.bf16.msra.mxu1 %v7429_v43  ;;  %v7439_v26 = vld [vmem:[#allocation65_spill] sm:$0xff]  ;;  %v7440_v43 = vld [vmem:[#allocation66_spill] sm:$0xff] }
 0x64e   :  { %4665 = vmatprep.subr.bf16.mxu0 %v7430_v59  ;;  %4729 = vmatprep.subr.bf16.mxu1 %v7431_v12  ;;  %v7441_v59 = vld [vmem:[#allocation67_spill] sm:$0xff]  ;;  %v7442_v12 = vld [vmem:[#allocation68_spill] sm:$0xff] }
 0x651   :  { %4667 = vmatpush1.bf16.msra.mxu0 %v7432_v30  ;;  %4731 = vmatpush1.bf16.msra.mxu1 %v7433_v0  ;;  %v7443_v30 = vld [vmem:[#allocation69_spill] sm:$0xff]  ;;  %v7444_v0 = vld [vmem:[#allocation70_spill] sm:$0xff] }
 0x652   :  { %4669 = vmatprep.subr.bf16.mxu0 %v7434_v21  ;;  %4733 = vmatprep.subr.bf16.mxu1 %v7435_v62  ;;  %v7445_v21 = vld [vmem:[#allocation71_spill] sm:$0xff]  ;;  %v7446_v62 = vld [vmem:[#allocation16_spill] sm:$0xff] }
 0x655   :  { %4671 = vmatpush1.bf16.msra.mxu0 %v7436_v52  ;;  %4735 = vmatpush1.bf16.msra.mxu1 %v7437_v34  ;;  %v7447_v52 = vld [vmem:[#allocation17_spill] sm:$0xff] }
 0x656   :  { %4673 = vmatprep.subr.bf16.mxu0 %v7438_v28  ;;  %4737 = vmatprep.subr.bf16.mxu1 %v7439_v26 }
 0x659   :  { %4675 = vmatpush1.bf16.msra.mxu0 %v7440_v43  ;;  %4739 = vmatpush1.bf16.msra.mxu1 %v7441_v59 }
 0x65a   :  { %4677 = vmatprep.subr.bf16.mxu0 %v7442_v12  ;;  %4741 = vmatprep.subr.bf16.mxu1 %v7443_v30  ;;  %v7449_v30 = vld [vmem:[#allocation77_spill] sm:$0xff] }
 0x65d   :  { %4679 = vmatpush1.bf16.msra.mxu0 %v7444_v0  ;;  %4743 = vmatpush1.bf16.msra.mxu1 %v7445_v21 }
 0x65e   :  { %4745 = vmatprep.subr.bf16.mxu0 %v7446_v62  ;;  %4777 = vmatprep.subr.bf16.mxu1 %v7447_v52 }
 0x6d3   :  { %v2228_v34 = vpop.f32.mrb[24].mxu0  ;;  %v2299_v28 = vpop.f32.mrb[24].mxu1 }
 0x6d4   :  { %v2229_v26 = vadd.f32 %v2228_v34, %v7448_v51  ;;  %v2230_v61 = vpop.f32.mrb[25].mxu0  ;;  %v2301_v43 = vpop.f32.mrb[25].mxu1  ;;  %v2300_v21 = vadd.f32 %v2299_v28, %v7269_v2  ;;  %v7450_v28 = vld [vmem:[#allocation73_spill] sm:$0xff] }
 0x6d5   :  { %v2231_v59 = vadd.f32 %v2230_v61, %v7267_v29  ;;  %v2302_v0 = vadd.f32 %v2301_v43, %v7449_v30 }
 0x6d6   :  { %v3502_v22 = vmul.f32 -1.442695, %v2229_v26 }
 0x6d7   :  { %v3503_v12 = vmul.f32 -1.442695, %v2231_v59  ;;  %v3504_v25 = vmul.f32 -1.442695, %v2302_v0 }
 0x6d8   :  { %5372 = vpow2.f32 %v3502_v22 }
 0x6d9   :  { %5374 = vpow2.f32 %v3503_v12 }
 0x6da   :  { %5376 = vpow2.f32 %v3504_v25 }
 0x6db   :  { %5378 = vtanh.f32 %v2300_v21 }
 0x6e2   :  { %v5373_v62 = vpop.eup %5372 }
 0x6e3   :  { %v5375_v15 = vpop.eup %5374  ;;  %v2307_v52 = vadd.f32 1.0, %v5373_v62 }
 0x6e4   :  { %v2313_v3 = vadd.f32 1.0, %v5375_v15  ;;  %v5377_v34 = vpop.eup %5376 }
 0x6e5   :  { %5380 = vrcp.f32 %v2307_v52  ;;  %v5379_v51 = vpop.eup %5378  ;;  %v2320_v22 = vadd.f32 1.0, %v5377_v34 }
 0x6e6   :  { %5382 = vrcp.f32 %v2313_v3 }
 0x6e7   :  { %5384 = vrcp.f32 %v2320_v22 }
 0x6ef   :  { %v5381_v61 = vpop.eup %5380 }
 0x6f0   :  { %v5383_v26 = vpop.eup %5382  ;;  %v2324_v59 = vmul.f32 %v5381_v61, %v5379_v51  ;;  %v7451_v51 = vld [vmem:[#allocation75_spill] sm:$0xff] }
 0x6f1   :  { %v2323_v12 = vmul.f32 %v5383_v26, %v6577_v55  ;;  %v5385_v55 = vpop.eup %5384 }
 0x6f3   :  { %v2398_v43 = vpop.f32.mrb[10].mxu0  ;;  %v2469_v0 = vpop.f32.mrb[10].mxu1  ;;  %v6691_v30 = vadd.f32 %v2324_v59, %v2323_v12 }
 0x6f4   :  { %v5162_v62 = vadd.f32 %v2398_v43, %v7450_v28  ;;  %v2400_v25 = vpop.f32.mrb[11].mxu0  ;;  %v2471_v21 = vpop.f32.mrb[11].mxu1  ;;  %v5178_v59 = vadd.f32 %v2469_v0, %v6108_v41 }
 0x6f5   :  { %v5163_v15 = vadd.f32 %v2400_v25, %v7210_v37  ;;  %5386 = vtanh.f32 %v6691_v30  ;;  %v5179_v34 = vadd.f32 %v2471_v21, %v7451_v51 }
 0x6f6   :  { %v3505_v3 = vmul.f32 -1.442695, %v5162_v62 }
 0x6f7   :  { %v3506_v52 = vmul.f32 -1.442695, %v5163_v15  ;;  %v3507_v26 = vmul.f32 -1.442695, %v5179_v34 }
 0x6f8   :  { %5388 = vpow2.f32 %v3505_v3 }
 0x6f9   :  { %5390 = vpow2.f32 %v3506_v52 }
 0x6fa   :  { %5392 = vpow2.f32 %v3507_v26 }
 0x6fb   :  { %5394 = vtanh.f32 %v5178_v59  ;;  %v7455_v59 = vld [vmem:[#allocation21_spill] sm:$0xff] }
 0x6ff   :  { %v5387_v61 = vpop.eup %5386 }
 0x700   :  { %v2327_v22 = vmul.f32 %v5387_v61, %v5385_v55 }
 0x702   :  { %v5389_v12 = vpop.eup %5388  ;;  %2566 = vmatprep.mubr.f32.mxu0 %v2327_v22  ;;  %2637 = vmatprep.mubr.f32.mxu1 %v2327_v22  ;;  %v7456_v22 = vld [vmem:[#allocation22_spill] sm:$0xff] }
 0x703   :  { %v5391_v43 = vpop.eup %5390  ;;  %v2481_v28 = vadd.f32 1.0, %v5389_v12  ;;  %v7457_v12 = vld [vmem:[#allocation23_spill] sm:$0xff] }
 0x704   :  { %v2487_v25 = vadd.f32 1.0, %v5391_v43  ;;  %v5393_v62 = vpop.eup %5392  ;;  %v7458_v43 = vld [vmem:[#allocation24_spill] sm:$0xff] }
 0x705   :  { %5396 = vrcp.f32 %v2481_v28  ;;  %v5395_v15 = vpop.eup %5394  ;;  %v2494_v51 = vadd.f32 1.0, %v5393_v62  ;;  %v7453_v28 = vld [vmem:[#allocation19_spill] sm:$0xff]  ;;  %v7460_v62 = vld [vmem:[#allocation26_spill] sm:$0xff] }
 0x706   :  { %5398 = vrcp.f32 %v2487_v25  ;;  %v7459_v25 = vld [vmem:[#allocation25_spill] sm:$0xff] }
 0x707   :  { %5400 = vrcp.f32 %v2494_v51  ;;  %v7454_v51 = vld [vmem:[#allocation20_spill] sm:$0xff] }
 0x70f   :  { %v5397_v3 = vpop.eup %5396 }
 0x710   :  { %v5399_v21 = vpop.eup %5398  ;;  %v2498_v52 = vmul.f32 %v5397_v3, %v5395_v15  ;;  %v7461_v15 = vld [vmem:[#allocation27_spill] sm:$0xff]  ;;  %v7462_v3 = vld [vmem:[#allocation28_spill] sm:$0xff] }
 0x711   :  { %v2497_v34 = vmul.f32 %v5399_v21, %v6585_v33  ;;  %v5401_v55 = vpop.eup %5400  ;;  %v7452_v33 = vld [vmem:[#allocation18_spill] sm:$0xff]  ;;  %v7463_v21 = vld [vmem:[#allocation29_spill] sm:$0xff] }
 0x713   :  { %v6699_v0 = vadd.f32 %v2498_v52, %v2497_v34  ;;  %v7464_v52 = vld [vmem:[#allocation30_spill] sm:$0xff]  ;;  %v7465_v34 = vld [vmem:[#allocation31_spill] sm:$0xff] }
 0x715   :  { %5402 = vtanh.f32 %v6699_v0 }
 0x71f   :  { %v5403_v61 = vpop.eup %5402 }
 0x720   :  { %v2501_v26 = vmul.f32 %v5403_v61, %v5401_v55  ;;  %v7466_v55 = vld [vmem:[#allocation32_spill] sm:$0xff]  ;;  %v7467_v61 = vld [vmem:[#allocation33_spill] sm:$0xff] }
 0x722   :  { %2567 = vmatmul.mubr.f32.vlgmr.msra.gmra.mrb[26].mxu0 %v2501_v26  ;;  %2638 = vmatmul.mubr.f32.vlgmr.msra.gmra.mrb[26].mxu1 %v2501_v26 }
 0x723   :  { %4747 = vmatpush1.bf16.msra.mxu0 %v5739_v35  ;;  %4779 = vmatpush1.bf16.msra.mxu1 %v5742_v38 }
 0x724   :  { %4749 = vmatprep.subr.bf16.mxu0 %v5745_v42  ;;  %4781 = vmatprep.subr.bf16.mxu1 %v5751_v47 }
 0x725   :  { %2736 = vmatprep.mubr.f32.mxu0 %v7149_v16  ;;  %2807 = vmatprep.mubr.f32.mxu1 %v7149_v16 }
 0x727   :  { %4751 = vmatpush1.bf16.msra.mxu0 %v5755_v50  ;;  %4783 = vmatpush1.bf16.msra.mxu1 %v5759_v54 }
 0x728   :  { %4753 = vmatprep.subr.bf16.mxu0 %v5763_v57  ;;  %4785 = vmatprep.subr.bf16.mxu1 %v5767_v60 }
 0x72b   :  { %4755 = vmatpush1.bf16.msra.mxu0 %v5774_v1  ;;  %4787 = vmatpush1.bf16.msra.mxu1 %v5778_v4 }
 0x72c   :  { %4757 = vmatprep.subr.bf16.mxu0 %v5782_v7  ;;  %4789 = vmatprep.subr.bf16.mxu1 %v5786_v10 }
 0x72f   :  { %4759 = vmatpush1.bf16.msra.mxu0 %v5793_v14  ;;  %4791 = vmatpush1.bf16.msra.mxu1 %v5797_v17 }
 0x730   :  { %4761 = vmatprep.subr.bf16.mxu0 %v5801_v20  ;;  %4793 = vmatprep.subr.bf16.mxu1 %v5805_v23 }
 0x733   :  { %4763 = vmatpush1.bf16.msra.mxu0 %v5812_v27  ;;  %4795 = vmatpush1.bf16.msra.mxu1 %v5816_v32 }
 0x734   :  { %4765 = vmatprep.subr.bf16.mxu0 %v5820_v36  ;;  %4797 = vmatprep.subr.bf16.mxu1 %v5824_v40 }
 0x737   :  { %4767 = vmatpush1.bf16.msra.mxu0 %v5831_v45  ;;  %4799 = vmatpush1.bf16.msra.mxu1 %v5835_v49 }
 0x738   :  { %4769 = vmatprep.subr.bf16.mxu0 %v5839_v53  ;;  %4801 = vmatprep.subr.bf16.mxu1 %v5843_v58 }
 0x73b   :  { %4771 = vmatpush1.bf16.msra.mxu0 %v5850_v63  ;;  %4803 = vmatpush1.bf16.msra.mxu1 %v5854_v5 }
 0x73c   :  { %4773 = vmatprep.subr.bf16.mxu0 %v5858_v9  ;;  %4805 = vmatprep.subr.bf16.mxu1 %v5862_v13 }
 0x73f   :  { %4775 = vmatpush1.bf16.msra.mxu0 %v5869_v19  ;;  %4807 = vmatpush1.bf16.msra.mxu1 %v5873_v24 }
 0x740   :  { %4809 = vmatprep.subr.bf16.mxu0 %v5877_v31  ;;  %4873 = vmatprep.subr.bf16.mxu1 %v5881_v39 }
 0x742   :  { %2737 = vmatmul.mubr.f32.vlgmr.msra.gmra.mrb[12].mxu0 %v2501_v26  ;;  %2808 = vmatmul.mubr.f32.vlgmr.msra.gmra.mrb[12].mxu1 %v2501_v26  ;;  %v7468_v26 = vld [vmem:[#allocation34_spill] sm:$0xff] }
 0x743   :  { %4811 = vmatpush1.bf16.msra.mxu0 %v5885_v44  ;;  %4875 = vmatpush1.bf16.msra.mxu1 %v5889_v46 }
 0x744   :  { %4813 = vmatprep.subr.bf16.mxu0 %v5891_v48  ;;  %4877 = vmatprep.subr.bf16.mxu1 %v5895_v56 }
 0x747   :  { %4815 = vmatpush1.bf16.msra.mxu0 %v5901_v6  ;;  %4879 = vmatpush1.bf16.msra.mxu1 %v5905_v8 }
 0x748   :  { %4817 = vmatprep.subr.bf16.mxu0 %v5907_v11  ;;  %4881 = vmatprep.subr.bf16.mxu1 %v5910_v18 }
 0x74b   :  { %4819 = vmatpush1.bf16.msra.mxu0 %v7452_v33  ;;  %4883 = vmatpush1.bf16.msra.mxu1 %v7453_v28 }
 0x74c   :  { %4821 = vmatprep.subr.bf16.mxu0 %v7454_v51  ;;  %4885 = vmatprep.subr.bf16.mxu1 %v7455_v59 }
 0x74f   :  { %4823 = vmatpush1.bf16.msra.mxu0 %v7456_v22  ;;  %4887 = vmatpush1.bf16.msra.mxu1 %v7457_v12  ;;  %v7508_v12 = vld [vmem:[#allocation72_spill] sm:$0xff] }
 0x750   :  { %4825 = vmatprep.subr.bf16.mxu0 %v7458_v43  ;;  %4889 = vmatprep.subr.bf16.mxu1 %v7459_v25  ;;  %v7469_v43 = vld [vmem:[#allocation35_spill] sm:$0xff]  ;;  %v7470_v25 = vld [vmem:[#allocation36_spill] sm:$0xff] }
 0x753   :  { %4827 = vmatpush1.bf16.msra.mxu0 %v7460_v62  ;;  %4891 = vmatpush1.bf16.msra.mxu1 %v7461_v15  ;;  %v7471_v62 = vld [vmem:[#allocation37_spill] sm:$0xff]  ;;  %v7472_v15 = vld [vmem:[#allocation38_spill] sm:$0xff] }
 0x754   :  { %4829 = vmatprep.subr.bf16.mxu0 %v7462_v3  ;;  %4893 = vmatprep.subr.bf16.mxu1 %v7463_v21  ;;  %v7473_v3 = vld [vmem:[#allocation39_spill] sm:$0xff]  ;;  %v7474_v21 = vld [vmem:[#allocation40_spill] sm:$0xff] }
 0x757   :  { %4831 = vmatpush1.bf16.msra.mxu0 %v7464_v52  ;;  %4895 = vmatpush1.bf16.msra.mxu1 %v7465_v34  ;;  %v7475_v52 = vld [vmem:[#allocation41_spill] sm:$0xff]  ;;  %v7476_v34 = vld [vmem:[#allocation42_spill] sm:$0xff] }
 0x758   :  { %4833 = vmatprep.subr.bf16.mxu0 %v7466_v55  ;;  %4897 = vmatprep.subr.bf16.mxu1 %v7467_v61  ;;  %v7477_v55 = vld [vmem:[#allocation43_spill] sm:$0xff]  ;;  %v7478_v61 = vld [vmem:[#allocation44_spill] sm:$0xff] }
 0x75b   :  { %4835 = vmatpush1.bf16.msra.mxu0 %v7468_v26  ;;  %4899 = vmatpush1.bf16.msra.mxu1 %v7469_v43  ;;  %v7479_v26 = vld [vmem:[#allocation45_spill] sm:$0xff]  ;;  %v7480_v43 = vld [vmem:[#allocation46_spill] sm:$0xff] }
 0x75c   :  { %4837 = vmatprep.subr.bf16.mxu0 %v7470_v25  ;;  %4901 = vmatprep.subr.bf16.mxu1 %v7471_v62  ;;  %v7481_v25 = vld [vmem:[#allocation47_spill] sm:$0xff]  ;;  %v7482_v62 = vld [vmem:[#allocation48_spill] sm:$0xff] }
 0x75f   :  { %4839 = vmatpush1.bf16.msra.mxu0 %v7472_v15  ;;  %4903 = vmatpush1.bf16.msra.mxu1 %v7473_v3  ;;  %v7483_v15 = vld [vmem:[#allocation49_spill] sm:$0xff]  ;;  %v7484_v3 = vld [vmem:[#allocation50_spill] sm:$0xff] }
 0x760   :  { %4841 = vmatprep.subr.bf16.mxu0 %v7474_v21  ;;  %4905 = vmatprep.subr.bf16.mxu1 %v7475_v52  ;;  %v7485_v21 = vld [vmem:[#allocation51_spill] sm:$0xff]  ;;  %v7486_v52 = vld [vmem:[#allocation52_spill] sm:$0xff] }
 0x763   :  { %4843 = vmatpush1.bf16.msra.mxu0 %v7476_v34  ;;  %4907 = vmatpush1.bf16.msra.mxu1 %v7477_v55  ;;  %v7487_v34 = vld [vmem:[#allocation53_spill] sm:$0xff]  ;;  %v7488_v55 = vld [vmem:[#allocation54_spill] sm:$0xff] }
 0x764   :  { %4845 = vmatprep.subr.bf16.mxu0 %v7478_v61  ;;  %4909 = vmatprep.subr.bf16.mxu1 %v7479_v26  ;;  %v7489_v61 = vld [vmem:[#allocation55_spill] sm:$0xff]  ;;  %v7490_v26 = vld [vmem:[#allocation56_spill] sm:$0xff] }
 0x767   :  { %4847 = vmatpush1.bf16.msra.mxu0 %v7480_v43  ;;  %4911 = vmatpush1.bf16.msra.mxu1 %v7481_v25  ;;  %v7491_v43 = vld [vmem:[#allocation57_spill] sm:$0xff]  ;;  %v7492_v25 = vld [vmem:[#allocation58_spill] sm:$0xff] }
 0x768   :  { %4849 = vmatprep.subr.bf16.mxu0 %v7482_v62  ;;  %4913 = vmatprep.subr.bf16.mxu1 %v7483_v15  ;;  %v7493_v62 = vld [vmem:[#allocation59_spill] sm:$0xff]  ;;  %v7494_v15 = vld [vmem:[#allocation60_spill] sm:$0xff] }
 0x76b   :  { %4851 = vmatpush1.bf16.msra.mxu0 %v7484_v3  ;;  %4915 = vmatpush1.bf16.msra.mxu1 %v7485_v21  ;;  %v7495_v3 = vld [vmem:[#allocation61_spill] sm:$0xff]  ;;  %v7496_v21 = vld [vmem:[#allocation62_spill] sm:$0xff] }
 0x76c   :  { %4853 = vmatprep.subr.bf16.mxu0 %v7486_v52  ;;  %4917 = vmatprep.subr.bf16.mxu1 %v7487_v34  ;;  %v7497_v52 = vld [vmem:[#allocation63_spill] sm:$0xff]  ;;  %v7498_v34 = vld [vmem:[#allocation64_spill] sm:$0xff] }
 0x76f   :  { %4855 = vmatpush1.bf16.msra.mxu0 %v7488_v55  ;;  %4919 = vmatpush1.bf16.msra.mxu1 %v7489_v61  ;;  %v7499_v55 = vld [vmem:[#allocation65_spill] sm:$0xff]  ;;  %v7500_v61 = vld [vmem:[#allocation66_spill] sm:$0xff] }
 0x770   :  { %4857 = vmatprep.subr.bf16.mxu0 %v7490_v26  ;;  %4921 = vmatprep.subr.bf16.mxu1 %v7491_v43  ;;  %v7501_v26 = vld [vmem:[#allocation67_spill] sm:$0xff]  ;;  %v7502_v43 = vld [vmem:[#allocation68_spill] sm:$0xff] }
 0x773   :  { %4859 = vmatpush1.bf16.msra.mxu0 %v7492_v25  ;;  %4923 = vmatpush1.bf16.msra.mxu1 %v7493_v62  ;;  %v7503_v25 = vld [vmem:[#allocation69_spill] sm:$0xff]  ;;  %v7504_v62 = vld [vmem:[#allocation70_spill] sm:$0xff] }
 0x774   :  { %4861 = vmatprep.subr.bf16.mxu0 %v7494_v15  ;;  %4925 = vmatprep.subr.bf16.mxu1 %v7495_v3  ;;  %v7505_v15 = vld [vmem:[#allocation71_spill] sm:$0xff]  ;;  %v7506_v3 = vld [vmem:[#allocation16_spill] sm:$0xff] }
 0x777   :  { %4863 = vmatpush1.bf16.msra.mxu0 %v7496_v21  ;;  %4927 = vmatpush1.bf16.msra.mxu1 %v7497_v52  ;;  %v7507_v21 = vld [vmem:[#allocation17_spill] sm:$0xff] }
 0x778   :  { %4865 = vmatprep.subr.bf16.mxu0 %v7498_v34  ;;  %4929 = vmatprep.subr.bf16.mxu1 %v7499_v55 }
 0x77b   :  { %4867 = vmatpush1.bf16.msra.mxu0 %v7500_v61  ;;  %4931 = vmatpush1.bf16.msra.mxu1 %v7501_v26 }
 0x77c   :  { %4869 = vmatprep.subr.bf16.mxu0 %v7502_v43  ;;  %4933 = vmatprep.subr.bf16.mxu1 %v7503_v25  ;;  %v7509_v25 = vld [vmem:[#allocation77_spill] sm:$0xff] }
 0x77f   :  { %4871 = vmatpush1.bf16.msra.mxu0 %v7504_v62  ;;  %4935 = vmatpush1.bf16.msra.mxu1 %v7505_v15 }
 0x780   :  { %4937 = vmatprep.subr.bf16.mxu0 %v7506_v3  ;;  %4969 = vmatprep.subr.bf16.mxu1 %v7507_v21 }
 0x7f5   :  { %v2568_v52 = vpop.f32.mrb[26].mxu0  ;;  %v2639_v34 = vpop.f32.mrb[26].mxu1 }
 0x7f6   :  { %v2569_v55 = vadd.f32 %v2568_v52, %v7508_v12  ;;  %v2570_v22 = vpop.f32.mrb[27].mxu0  ;;  %v2641_v61 = vpop.f32.mrb[27].mxu1  ;;  %v2640_v15 = vadd.f32 %v2639_v34, %v7269_v2  ;;  %v7510_v34 = vld [vmem:[#allocation73_spill] sm:$0xff] }
 0x7f7   :  { %v2571_v26 = vadd.f32 %v2570_v22, %v7267_v29  ;;  %v2642_v62 = vadd.f32 %v2641_v61, %v7509_v25 }
 0x7f8   :  { %v3508_v59 = vmul.f32 -1.442695, %v2569_v55 }
 0x7f9   :  { %v3509_v43 = vmul.f32 -1.442695, %v2571_v26  ;;  %v3510_v51 = vmul.f32 -1.442695, %v2642_v62 }
 0x7fa   :  { %5404 = vpow2.f32 %v3508_v59 }
 0x7fb   :  { %5406 = vpow2.f32 %v3509_v43 }
 0x7fc   :  { %5408 = vpow2.f32 %v3510_v51 }
 0x7fd   :  { %5410 = vtanh.f32 %v2640_v15 }
 0x804   :  { %v5405_v3 = vpop.eup %5404 }
 0x805   :  { %v5407_v28 = vpop.eup %5406  ;;  %v2647_v21 = vadd.f32 1.0, %v5405_v3 }
 0x806   :  { %v2653_v33 = vadd.f32 1.0, %v5407_v28  ;;  %v5409_v52 = vpop.eup %5408 }
 0x807   :  { %5412 = vrcp.f32 %v2647_v21  ;;  %v5411_v12 = vpop.eup %5410  ;;  %v2660_v59 = vadd.f32 1.0, %v5409_v52 }
 0x808   :  { %5414 = vrcp.f32 %v2653_v33 }
 0x809   :  { %5416 = vrcp.f32 %v2660_v59 }
 0x811   :  { %v5413_v22 = vpop.eup %5412 }
 0x812   :  { %v5415_v55 = vpop.eup %5414  ;;  %v2664_v26 = vmul.f32 %v5413_v22, %v5411_v12  ;;  %v7511_v12 = vld [vmem:[#allocation75_spill] sm:$0xff] }
 0x813   :  { %v2663_v43 = vmul.f32 %v5415_v55, %v6691_v30  ;;  %v5417_v30 = vpop.eup %5416 }
 0x815   :  { %v2738_v61 = vpop.f32.mrb[12].mxu0  ;;  %v2809_v62 = vpop.f32.mrb[12].mxu1  ;;  %v6805_v25 = vadd.f32 %v2664_v26, %v2663_v43 }
 0x816   :  { %v5164_v3 = vadd.f32 %v2738_v61, %v7510_v34  ;;  %v2740_v51 = vpop.f32.mrb[13].mxu0  ;;  %v2811_v15 = vpop.f32.mrb[13].mxu1  ;;  %v5180_v26 = vadd.f32 %v2809_v62, %v6108_v41 }
 0x817   :  { %v5165_v28 = vadd.f32 %v2740_v51, %v7210_v37  ;;  %5418 = vtanh.f32 %v6805_v25  ;;  %v5181_v52 = vadd.f32 %v2811_v15, %v7511_v12 }
 0x818   :  { %v3511_v33 = vmul.f32 -1.442695, %v5164_v3 }
 0x819   :  { %v3512_v21 = vmul.f32 -1.442695, %v5165_v28  ;;  %v3513_v55 = vmul.f32 -1.442695, %v5181_v52 }
 0x81a   :  { %5420 = vpow2.f32 %v3511_v33 }
 0x81b   :  { %5422 = vpow2.f32 %v3512_v21 }
 0x81c   :  { %5424 = vpow2.f32 %v3513_v55 }
 0x81d   :  { %5426 = vtanh.f32 %v5180_v26  ;;  %v7555_v26 = vld [vmem:[#allocation61_spill] sm:$0xff] }
 0x821   :  { %v5419_v22 = vpop.eup %5418 }
 0x822   :  { %v2667_v59 = vmul.f32 %v5419_v22, %v5417_v30 }
 0x824   :  { %v5421_v43 = vpop.eup %5420  ;;  %2906 = vmatprep.mubr.f32.mxu0 %v2667_v59  ;;  %2977 = vmatprep.mubr.f32.mxu1 %v2667_v59  ;;  %v7556_v59 = vld [vmem:[#allocation62_spill] sm:$0xff] }
 0x825   :  { %v5423_v61 = vpop.eup %5422  ;;  %v2821_v34 = vadd.f32 1.0, %v5421_v43  ;;  %v7557_v43 = vld [vmem:[#allocation63_spill] sm:$0xff] }
 0x826   :  { %v2827_v51 = vadd.f32 1.0, %v5423_v61  ;;  %v5425_v3 = vpop.eup %5424  ;;  %v7558_v61 = vld [vmem:[#allocation64_spill] sm:$0xff] }
 0x827   :  { %5428 = vrcp.f32 %v2821_v34  ;;  %v5427_v28 = vpop.eup %5426  ;;  %v2834_v12 = vadd.f32 1.0, %v5425_v3  ;;  %v7553_v34 = vld [vmem:[#allocation59_spill] sm:$0xff]  ;;  %v7560_v3 = vld [vmem:[#allocation66_spill] sm:$0xff] }
 0x828   :  { %5430 = vrcp.f32 %v2827_v51  ;;  %v7559_v51 = vld [vmem:[#allocation65_spill] sm:$0xff] }
 0x829   :  { %5432 = vrcp.f32 %v2834_v12  ;;  %v7554_v12 = vld [vmem:[#allocation60_spill] sm:$0xff] }
 0x831   :  { %v5429_v33 = vpop.eup %5428 }
 0x832   :  { %v5431_v15 = vpop.eup %5430  ;;  %v2838_v21 = vmul.f32 %v5429_v33, %v5427_v28  ;;  %v7561_v28 = vld [vmem:[#allocation67_spill] sm:$0xff]  ;;  %v7562_v33 = vld [vmem:[#allocation68_spill] sm:$0xff] }
 0x833   :  { %v2837_v52 = vmul.f32 %v5431_v15, %v6699_v0  ;;  %v5433_v30 = vpop.eup %5432  ;;  %v7552_v0 = vld [vmem:[#allocation58_spill] sm:$0xff]  ;;  %v7563_v15 = vld [vmem:[#allocation69_spill] sm:$0xff] }
 0x835   :  { %v6813_v62 = vadd.f32 %v2838_v21, %v2837_v52  ;;  %v7564_v21 = vld [vmem:[#allocation70_spill] sm:$0xff]  ;;  %v7565_v52 = vld [vmem:[#allocation71_spill] sm:$0xff] }
 0x837   :  { %5434 = vtanh.f32 %v6813_v62 }
 0x841   :  { %v5435_v22 = vpop.eup %5434 }
 0x842   :  { %v2841_v55 = vmul.f32 %v5435_v22, %v5433_v30 }
 0x844   :  { %2907 = vmatmul.mubr.f32.vlgmr.msra.gmra.mrb[28].mxu0 %v2841_v55  ;;  %2978 = vmatmul.mubr.f32.vlgmr.msra.gmra.mrb[28].mxu1 %v2841_v55 }
 0x845   :  { %4939 = vmatpush1.bf16.msra.mxu0 %v5739_v35  ;;  %4971 = vmatpush1.bf16.msra.mxu1 %v5742_v38  ;;  %v7512_v35 = vld [vmem:[#allocation18_spill] sm:$0xff]  ;;  %v7513_v38 = vld [vmem:[#allocation19_spill] sm:$0xff] }
 0x846   :  { %4941 = vmatprep.subr.bf16.mxu0 %v5745_v42  ;;  %4973 = vmatprep.subr.bf16.mxu1 %v5751_v47  ;;  %v7514_v42 = vld [vmem:[#allocation20_spill] sm:$0xff]  ;;  %v7515_v47 = vld [vmem:[#allocation21_spill] sm:$0xff] }
 0x847   :  { %3076 = vmatprep.mubr.f32.mxu0 %v7149_v16  ;;  %3147 = vmatprep.mubr.f32.mxu1 %v7149_v16 }
 0x849   :  { %4943 = vmatpush1.bf16.msra.mxu0 %v5755_v50  ;;  %4975 = vmatpush1.bf16.msra.mxu1 %v5759_v54  ;;  %v7516_v50 = vld [vmem:[#allocation22_spill] sm:$0xff]  ;;  %v7517_v54 = vld [vmem:[#allocation23_spill] sm:$0xff] }
 0x84a   :  { %4945 = vmatprep.subr.bf16.mxu0 %v5763_v57  ;;  %4977 = vmatprep.subr.bf16.mxu1 %v5767_v60  ;;  %v7518_v57 = vld [vmem:[#allocation24_spill] sm:$0xff]  ;;  %v7519_v60 = vld [vmem:[#allocation25_spill] sm:$0xff] }
 0x84d   :  { %4947 = vmatpush1.bf16.msra.mxu0 %v5774_v1  ;;  %4979 = vmatpush1.bf16.msra.mxu1 %v5778_v4  ;;  %v7520_v1 = vld [vmem:[#allocation26_spill] sm:$0xff]  ;;  %v7521_v4 = vld [vmem:[#allocation27_spill] sm:$0xff] }
 0x84e   :  { %4949 = vmatprep.subr.bf16.mxu0 %v5782_v7  ;;  %4981 = vmatprep.subr.bf16.mxu1 %v5786_v10  ;;  %v7522_v7 = vld [vmem:[#allocation28_spill] sm:$0xff]  ;;  %v7523_v10 = vld [vmem:[#allocation29_spill] sm:$0xff] }
 0x851   :  { %4951 = vmatpush1.bf16.msra.mxu0 %v5793_v14  ;;  %4983 = vmatpush1.bf16.msra.mxu1 %v5797_v17  ;;  %v7524_v14 = vld [vmem:[#allocation30_spill] sm:$0xff]  ;;  %v7525_v17 = vld [vmem:[#allocation31_spill] sm:$0xff] }
 0x852   :  { %4953 = vmatprep.subr.bf16.mxu0 %v5801_v20  ;;  %4985 = vmatprep.subr.bf16.mxu1 %v5805_v23  ;;  %v7526_v20 = vld [vmem:[#allocation32_spill] sm:$0xff]  ;;  %v7527_v23 = vld [vmem:[#allocation33_spill] sm:$0xff] }
 0x855   :  { %4955 = vmatpush1.bf16.msra.mxu0 %v5812_v27  ;;  %4987 = vmatpush1.bf16.msra.mxu1 %v5816_v32  ;;  %v7528_v27 = vld [vmem:[#allocation34_spill] sm:$0xff]  ;;  %v7529_v32 = vld [vmem:[#allocation35_spill] sm:$0xff] }
 0x856   :  { %4957 = vmatprep.subr.bf16.mxu0 %v5820_v36  ;;  %4989 = vmatprep.subr.bf16.mxu1 %v5824_v40  ;;  %v7530_v36 = vld [vmem:[#allocation36_spill] sm:$0xff]  ;;  %v7531_v40 = vld [vmem:[#allocation37_spill] sm:$0xff] }
 0x859   :  { %4959 = vmatpush1.bf16.msra.mxu0 %v5831_v45  ;;  %4991 = vmatpush1.bf16.msra.mxu1 %v5835_v49  ;;  %v7532_v45 = vld [vmem:[#allocation38_spill] sm:$0xff]  ;;  %v7533_v49 = vld [vmem:[#allocation39_spill] sm:$0xff] }
 0x85a   :  { %4961 = vmatprep.subr.bf16.mxu0 %v5839_v53  ;;  %4993 = vmatprep.subr.bf16.mxu1 %v5843_v58  ;;  %v7534_v53 = vld [vmem:[#allocation40_spill] sm:$0xff]  ;;  %v7535_v58 = vld [vmem:[#allocation41_spill] sm:$0xff] }
 0x85d   :  { %4963 = vmatpush1.bf16.msra.mxu0 %v5850_v63  ;;  %4995 = vmatpush1.bf16.msra.mxu1 %v5854_v5  ;;  %v7536_v63 = vld [vmem:[#allocation42_spill] sm:$0xff]  ;;  %v7537_v5 = vld [vmem:[#allocation43_spill] sm:$0xff] }
 0x85e   :  { %4965 = vmatprep.subr.bf16.mxu0 %v5858_v9  ;;  %4997 = vmatprep.subr.bf16.mxu1 %v5862_v13  ;;  %v7538_v9 = vld [vmem:[#allocation44_spill] sm:$0xff]  ;;  %v7539_v13 = vld [vmem:[#allocation45_spill] sm:$0xff] }
 0x861   :  { %4967 = vmatpush1.bf16.msra.mxu0 %v5869_v19  ;;  %4999 = vmatpush1.bf16.msra.mxu1 %v5873_v24  ;;  %v7540_v19 = vld [vmem:[#allocation46_spill] sm:$0xff]  ;;  %v7541_v24 = vld [vmem:[#allocation47_spill] sm:$0xff] }
 0x862   :  { %5001 = vmatprep.subr.bf16.mxu0 %v5877_v31  ;;  %5065 = vmatprep.subr.bf16.mxu1 %v5881_v39  ;;  %v7542_v31 = vld [vmem:[#allocation48_spill] sm:$0xff]  ;;  %v7543_v39 = vld [vmem:[#allocation49_spill] sm:$0xff] }
 0x864   :  { %3077 = vmatmul.mubr.f32.vlgmr.msra.gmra.mrb[14].mxu0 %v2841_v55  ;;  %3148 = vmatmul.mubr.f32.vlgmr.msra.gmra.mrb[14].mxu1 %v2841_v55  ;;  %v7566_v55 = vld [vmem:[#allocation72_spill] sm:$0xff] }
 0x865   :  { %5003 = vmatpush1.bf16.msra.mxu0 %v5885_v44  ;;  %5067 = vmatpush1.bf16.msra.mxu1 %v5889_v46  ;;  %v7544_v44 = vld [vmem:[#allocation50_spill] sm:$0xff]  ;;  %v7545_v46 = vld [vmem:[#allocation51_spill] sm:$0xff] }
 0x866   :  { %5005 = vmatprep.subr.bf16.mxu0 %v5891_v48  ;;  %5069 = vmatprep.subr.bf16.mxu1 %v5895_v56  ;;  %v7546_v48 = vld [vmem:[#allocation52_spill] sm:$0xff]  ;;  %v7547_v56 = vld [vmem:[#allocation53_spill] sm:$0xff] }
 0x869   :  { %5007 = vmatpush1.bf16.msra.mxu0 %v5901_v6  ;;  %5071 = vmatpush1.bf16.msra.mxu1 %v5905_v8  ;;  %v7548_v6 = vld [vmem:[#allocation54_spill] sm:$0xff]  ;;  %v7549_v8 = vld [vmem:[#allocation55_spill] sm:$0xff] }
 0x86a   :  { %5009 = vmatprep.subr.bf16.mxu0 %v5907_v11  ;;  %5073 = vmatprep.subr.bf16.mxu1 %v5910_v18  ;;  %v7550_v11 = vld [vmem:[#allocation56_spill] sm:$0xff]  ;;  %v7551_v18 = vld [vmem:[#allocation57_spill] sm:$0xff] }
 0x86d   :  { %5011 = vmatpush1.bf16.msra.mxu0 %v7512_v35  ;;  %5075 = vmatpush1.bf16.msra.mxu1 %v7513_v38 }
 0x86e   :  { %5013 = vmatprep.subr.bf16.mxu0 %v7514_v42  ;;  %5077 = vmatprep.subr.bf16.mxu1 %v7515_v47 }
 0x871   :  { %5015 = vmatpush1.bf16.msra.mxu0 %v7516_v50  ;;  %5079 = vmatpush1.bf16.msra.mxu1 %v7517_v54 }
 0x872   :  { %5017 = vmatprep.subr.bf16.mxu0 %v7518_v57  ;;  %5081 = vmatprep.subr.bf16.mxu1 %v7519_v60  ;;  %v7567_v57 = vld [vmem:[#allocation77_spill] sm:$0xff] }
 0x875   :  { %5019 = vmatpush1.bf16.msra.mxu0 %v7520_v1  ;;  %5083 = vmatpush1.bf16.msra.mxu1 %v7521_v4 }
 0x876   :  { %5021 = vmatprep.subr.bf16.mxu0 %v7522_v7  ;;  %5085 = vmatprep.subr.bf16.mxu1 %v7523_v10 }
 0x879   :  { %5023 = vmatpush1.bf16.msra.mxu0 %v7524_v14  ;;  %5087 = vmatpush1.bf16.msra.mxu1 %v7525_v17 }
 0x87a   :  { %5025 = vmatprep.subr.bf16.mxu0 %v7526_v20  ;;  %5089 = vmatprep.subr.bf16.mxu1 %v7527_v23 }
 0x87d   :  { %5027 = vmatpush1.bf16.msra.mxu0 %v7528_v27  ;;  %5091 = vmatpush1.bf16.msra.mxu1 %v7529_v32 }
 0x87e   :  { %5029 = vmatprep.subr.bf16.mxu0 %v7530_v36  ;;  %5093 = vmatprep.subr.bf16.mxu1 %v7531_v40 }
 0x881   :  { %5031 = vmatpush1.bf16.msra.mxu0 %v7532_v45  ;;  %5095 = vmatpush1.bf16.msra.mxu1 %v7533_v49 }
 0x882   :  { %5033 = vmatprep.subr.bf16.mxu0 %v7534_v53  ;;  %5097 = vmatprep.subr.bf16.mxu1 %v7535_v58 }
 0x885   :  { %5035 = vmatpush1.bf16.msra.mxu0 %v7536_v63  ;;  %5099 = vmatpush1.bf16.msra.mxu1 %v7537_v5  ;;  %v7568_v63 = vld [vmem:[#allocation73_spill] sm:$0xff] }
 0x886   :  { %5037 = vmatprep.subr.bf16.mxu0 %v7538_v9  ;;  %5101 = vmatprep.subr.bf16.mxu1 %v7539_v13 }
 0x889   :  { %5039 = vmatpush1.bf16.msra.mxu0 %v7540_v19  ;;  %5103 = vmatpush1.bf16.msra.mxu1 %v7541_v24 }
 0x88a   :  { %5041 = vmatprep.subr.bf16.mxu0 %v7542_v31  ;;  %5105 = vmatprep.subr.bf16.mxu1 %v7543_v39  ;;  %v7569_v39 = vld [vmem:[#allocation75_spill] sm:$0xff] }
 0x88d   :  { %5043 = vmatpush1.bf16.msra.mxu0 %v7544_v44  ;;  %5107 = vmatpush1.bf16.msra.mxu1 %v7545_v46 }
 0x88e   :  { %5045 = vmatprep.subr.bf16.mxu0 %v7546_v48  ;;  %5109 = vmatprep.subr.bf16.mxu1 %v7547_v56 }
 0x891   :  { %5047 = vmatpush1.bf16.msra.mxu0 %v7548_v6  ;;  %5111 = vmatpush1.bf16.msra.mxu1 %v7549_v8 }
 0x892   :  { %5049 = vmatprep.subr.bf16.mxu0 %v7550_v11  ;;  %5113 = vmatprep.subr.bf16.mxu1 %v7551_v18 }
 0x895   :  { %5051 = vmatpush1.bf16.msra.mxu0 %v7552_v0  ;;  %5115 = vmatpush1.bf16.msra.mxu1 %v7553_v34 }
 0x896   :  { %5053 = vmatprep.subr.bf16.mxu0 %v7554_v12  ;;  %5117 = vmatprep.subr.bf16.mxu1 %v7555_v26 }
 0x899   :  { %5055 = vmatpush1.bf16.msra.mxu0 %v7556_v59  ;;  %5119 = vmatpush1.bf16.msra.mxu1 %v7557_v43 }
 0x89a   :  { %5057 = vmatprep.subr.bf16.mxu0 %v7558_v61  ;;  %5121 = vmatprep.subr.bf16.mxu1 %v7559_v51 }
 0x89d   :  { %5059 = vmatpush1.bf16.msra.mxu0 %v7560_v3  ;;  %5123 = vmatpush1.bf16.msra.mxu1 %v7561_v28 }
 0x89e   :  { %5061 = vmatprep.subr.bf16.mxu0 %v7562_v33  ;;  %5125 = vmatprep.subr.bf16.mxu1 %v7563_v15  ;;  %v3348_v33 = vld [vmem:[#allocation9] sm:$0xff]  ;;  %v3349_v15 = vld [vmem:[#allocation9 + $0x8] sm:$0xff] }
 0x8a1   :  { %5063 = vmatpush1.bf16.msra.mxu0 %v7564_v21  ;;  %5127 = vmatpush1.bf16.msra.mxu1 %v7565_v52  ;;  %v5129_v21 = vpack.c.bf16 %v3349_v15, %v3348_v33  ;;  %v5611_v52 = vmov 0.0|0.0  }
 0x8a2   :  { %5128 = vmatprep.subr.bf16.mxu0 %v5611_v52 }
 0x917   :  { %v2908_v30 = vpop.f32.mrb[28].mxu0  ;;  %v2979_v22 = vpop.f32.mrb[28].mxu1 }
 0x918   :  { %v2909_v35 = vadd.f32 %v2908_v30, %v7566_v55  ;;  %v2910_v38 = vpop.f32.mrb[29].mxu0  ;;  %v2981_v42 = vpop.f32.mrb[29].mxu1  ;;  %v2980_v4 = vadd.f32 %v2979_v22, %v7269_v2  ;;  %v3350_v30 = vld [vmem:[#allocation9 + $0x10] sm:$0xff]  ;;  %v3351_v22 = vld [vmem:[#allocation9 + $0x18] sm:$0xff] }
 0x919   :  { %v2911_v47 = vadd.f32 %v2910_v38, %v7267_v29  ;;  %v2982_v60 = vadd.f32 %v2981_v42, %v7567_v57  ;;  %v3353_v38 = vld [vmem:[#allocation9 + $0x28] sm:$0xff] }
 0x91a   :  { %v3514_v50 = vmul.f32 -1.442695, %v2909_v35  ;;  %v5132_v35 = vpack.c.bf16 %v3351_v22, %v3350_v30 }
 0x91b   :  { %v3515_v54 = vmul.f32 -1.442695, %v2911_v47  ;;  %v3516_v1 = vmul.f32 -1.442695, %v2982_v60  ;;  %v3354_v47 = vld [vmem:[#allocation9 + $0x30] sm:$0xff]  ;;  %v3356_v60 = vld [vmem:[#allocation9 + $0x40] sm:$0xff] }
 0x91c   :  { %5436 = vpow2.f32 %v3514_v50  ;;  %v3355_v50 = vld [vmem:[#allocation9 + $0x38] sm:$0xff] }
 0x91d   :  { %5438 = vpow2.f32 %v3515_v54  ;;  %v5138_v54 = vpack.c.bf16 %v3355_v50, %v3354_v47 }
 0x91e   :  { %5440 = vpow2.f32 %v3516_v1  ;;  %v3357_v1 = vld [vmem:[#allocation9 + $0x48] sm:$0xff] }
 0x91f   :  { %5442 = vtanh.f32 %v2980_v4  ;;  %v5141_v4 = vpack.c.bf16 %v3357_v1, %v3356_v60 }
 0x926   :  { %v5437_v7 = vpop.eup %5436 }
 0x927   :  { %v5439_v10 = vpop.eup %5438  ;;  %v2987_v14 = vadd.f32 1.0, %v5437_v7  ;;  %v3358_v7 = vld [vmem:[#allocation9 + $0x50] sm:$0xff] }
 0x928   :  { %v2993_v17 = vadd.f32 1.0, %v5439_v10  ;;  %v5441_v20 = vpop.eup %5440  ;;  %v3359_v10 = vld [vmem:[#allocation9 + $0x58] sm:$0xff] }
 0x929   :  { %5444 = vrcp.f32 %v2987_v14  ;;  %v5443_v23 = vpop.eup %5442  ;;  %v3000_v40 = vadd.f32 1.0, %v5441_v20  ;;  %v3360_v14 = vld [vmem:[#allocation9 + $0x60] sm:$0xff]  ;;  %v3361_v20 = vld [vmem:[#allocation9 + $0x68] sm:$0xff] }
 0x92a   :  { %5446 = vrcp.f32 %v2993_v17  ;;  %v5144_v17 = vpack.c.bf16 %v3359_v10, %v3358_v7 }
 0x92b   :  { %5448 = vrcp.f32 %v3000_v40 }
 0x933   :  { %v5445_v27 = vpop.eup %5444 }
 0x934   :  { %v5447_v32 = vpop.eup %5446  ;;  %v3004_v36 = vmul.f32 %v5445_v27, %v5443_v23  ;;  %v5147_v23 = vpack.c.bf16 %v3361_v20, %v3360_v14  ;;  %v3362_v27 = vld [vmem:[#allocation9 + $0x70] sm:$0xff] }
 0x935   :  { %v3003_v45 = vmul.f32 %v5447_v32, %v6805_v25  ;;  %v5449_v25 = vpop.eup %5448  ;;  %v3363_v32 = vld [vmem:[#allocation9 + $0x78] sm:$0xff] }
 0x937   :  { %v3078_v49 = vpop.f32.mrb[14].mxu0  ;;  %v3149_v53 = vpop.f32.mrb[14].mxu1  ;;  %v6917_v58 = vadd.f32 %v3004_v36, %v3003_v45  ;;  %v5150_v36 = vpack.c.bf16 %v3363_v32, %v3362_v27 }
 0x938   :  { %v5166_v5 = vadd.f32 %v3078_v49, %v7568_v63  ;;  %v3080_v9 = vpop.f32.mrb[15].mxu0  ;;  %v3151_v13 = vpop.f32.mrb[15].mxu1  ;;  %v5182_v56 = vadd.f32 %v3149_v53, %v6108_v41 }
 0x939   :  { %v5167_v19 = vadd.f32 %v3080_v9, %v7210_v37  ;;  %5450 = vtanh.f32 %v6917_v58  ;;  %v5183_v44 = vadd.f32 %v3151_v13, %v7569_v39 }
 0x93a   :  { %v3517_v24 = vmul.f32 -1.442695, %v5166_v5 }
 0x93b   :  { %v3518_v31 = vmul.f32 -1.442695, %v5167_v19  ;;  %v3519_v48 = vmul.f32 -1.442695, %v5183_v44 }
 0x93c   :  { %5452 = vpow2.f32 %v3517_v24 }
 0x93d   :  { %5454 = vpow2.f32 %v3518_v31 }
 0x93e   :  { %5456 = vpow2.f32 %v3519_v48 }
 0x93f   :  { %5458 = vtanh.f32 %v5182_v56 }
 0x943   :  { %v5451_v46 = vpop.eup %5450 }
 0x944   :  { %v3007_v6 = vmul.f32 %v5451_v46, %v5449_v25 }
 0x946   :  { %v5453_v8 = vpop.eup %5452  ;;  %3246 = vmatprep.mubr.f32.mxu0 %v3007_v6  ;;  %3317 = vmatprep.mubr.f32.mxu1 %v3007_v6 }
 0x947   :  { %v5455_v11 = vpop.eup %5454  ;;  %v3161_v18 = vadd.f32 1.0, %v5453_v8 }
 0x948   :  { %v3167_v37 = vadd.f32 1.0, %v5455_v11  ;;  %v5457_v0 = vpop.eup %5456 }
 0x949   :  { %5460 = vrcp.f32 %v3161_v18  ;;  %v5459_v34 = vpop.eup %5458  ;;  %v3174_v43 = vadd.f32 1.0, %v5457_v0 }
 0x94a   :  { %5462 = vrcp.f32 %v3167_v37  ;;  %v3523_v37 = vld [vmem:[%s6953_s7] ss:$0 sm:$0xff] }
 0x94b   :  { %5464 = vrcp.f32 %v3174_v43 }
 0x953   :  { %v5461_v12 = vpop.eup %5460 }
 0x954   :  { %v5463_v26 = vpop.eup %5462  ;;  %v3178_v59 = vmul.f32 %v5461_v12, %v5459_v34 }
 0x955   :  { %v3177_v61 = vmul.f32 %v5463_v26, %v6813_v62  ;;  %v5465_v51 = vpop.eup %5464  ;;  %v3352_v62 = vld [vmem:[#allocation9 + $0x20] sm:$0xff] }
 0x956   :  { %v5135_v42 = vpack.c.bf16 %v3353_v38, %v3352_v62 }
 0x957   :  { %v3179_v41 = vadd.f32 %v3178_v59, %v3177_v61 }
 0x959   :  { %5466 = vtanh.f32 %v3179_v41 }
 0x963   :  { %v5467_v3 = vpop.eup %5466 }
 0x964   :  { %v3181_v28 = vmul.f32 %v5467_v3, %v5465_v51 }
 0x966   :  { %3247 = vmatmul.mubr.f32.vlgmr.msra.gmra.mrb[30].mxu0 %v3181_v28  ;;  %3318 = vmatmul.mubr.f32.vlgmr.msra.gmra.mrb[30].mxu1 %v3181_v28 }
 0x967   :  { %5130 = vmatpush3.bf16.msra.mxu0 %v5129_v21  ;;  %3573 = vmatprep.mubr.msk.f32.mxu0 %vm5612_vm1, %v7149_v16 }
 0x968   :  { %5131 = vmatprep.subr.bf16.mxu0 %v5611_v52 }
 0x96b   :  { %5133 = vmatpush3.bf16.msra.mxu0 %v5132_v35 }
 0x96c   :  { %5134 = vmatprep.subr.bf16.mxu0 %v5611_v52 }
 0x96f   :  { %5136 = vmatpush3.bf16.msra.mxu0 %v5135_v42 }
 0x970   :  { %5137 = vmatprep.subr.bf16.mxu0 %v5611_v52 }
 0x973   :  { %5139 = vmatpush3.bf16.msra.mxu0 %v5138_v54 }
 0x974   :  { %5140 = vmatprep.subr.bf16.mxu0 %v5611_v52 }
 0x977   :  { %5142 = vmatpush3.bf16.msra.mxu0 %v5141_v4 }
 0x978   :  { %5143 = vmatprep.subr.bf16.mxu0 %v5611_v52 }
 0x97b   :  { %5145 = vmatpush3.bf16.msra.mxu0 %v5144_v17 }
 0x97c   :  { %5146 = vmatprep.subr.bf16.mxu0 %v5611_v52 }
 0x97f   :  { %5148 = vmatpush3.bf16.msra.mxu0 %v5147_v23 }
 0x980   :  { %5149 = vmatprep.subr.bf16.mxu0 %v5611_v52 }
 0x983   :  { %5151 = vmatpush3.bf16.msra.mxu0 %v5150_v36 }
 0xa39   :  { %v3248_v40 = vpop.f32.mrb[30].mxu0  ;;  %v3319_v45 = vpop.f32.mrb[30].mxu1 }
 0xa3a   :  { %v3249_v49 = vadd.f32 %v3248_v40, %v7566_v55  ;;  %v3250_v53 = vpop.f32.mrb[31].mxu0  ;;  %v3321_v63 = vpop.f32.mrb[31].mxu1  ;;  %v3320_v24 = vadd.f32 %v3319_v45, %v7269_v2 }
 0xa3b   :  { %v3251_v5 = vadd.f32 %v3250_v53, %v7267_v29  ;;  %v3322_v16 = vadd.f32 %v3321_v63, %v7567_v57 }
 0xa3c   :  { %v3520_v9 = vmul.f32 -1.442695, %v3249_v49 }
 0xa3d   :  { %v3521_v13 = vmul.f32 -1.442695, %v3251_v5  ;;  %v3522_v19 = vmul.f32 -1.442695, %v3322_v16 }
 0xa3e   :  { %5468 = vpow2.f32 %v3520_v9 }
 0xa3f   :  { %5470 = vpow2.f32 %v3521_v13 }
 0xa40   :  { %5472 = vpow2.f32 %v3522_v19 }
 0xa41   :  { %5474 = vtanh.f32 %v3320_v24 }
 0xa48   :  { %v5469_v31 = vpop.eup %5468 }
 0xa49   :  { %v5471_v39 = vpop.eup %5470  ;;  %v3327_v44 = vadd.f32 1.0, %v5469_v31 }
 0xa4a   :  { %v3333_v25 = vadd.f32 1.0, %v5471_v39  ;;  %v5473_v55 = vpop.eup %5472 }
 0xa4b   :  { %5476 = vrcp.f32 %v3327_v44  ;;  %v5475_v46 = vpop.eup %5474  ;;  %v3340_v6 = vadd.f32 1.0, %v5473_v55 }
 0xa4c   :  { %5478 = vrcp.f32 %v3333_v25 }
 0xa4d   :  { %5480 = vrcp.f32 %v3340_v6 }
 0xa55   :  { %v5477_v29 = vpop.eup %5476 }
 0xa56   :  { %v5479_v48 = vpop.eup %5478  ;;  %v3344_v56 = vmul.f32 %v5477_v29, %v5475_v46 }
 0xa57   :  { %v3343_v8 = vmul.f32 %v5479_v48, %v6917_v58  ;;  %v5481_v2 = vpop.eup %5480 }
 0xa59   :  { %v3345_v57 = vadd.f32 %v3344_v56, %v3343_v8 }
 0xa5b   :  { %5482 = vtanh.f32 %v3345_v57 }
 0xa65   :  { %v5483_v11 = vpop.eup %5482 }
 0xa66   :  { %v3347_v18 = vmul.f32 %v5483_v11, %v5481_v2 }
 0xa68   :  { %3574 = vmatmul.mubr.f32.vlgmr.msra.gmra.mrb[32].mxu0 %v3347_v18 }
 0xb3b   :  { %v3437_v0 = vpop.f32.mrb[32].mxu0 }
 0xb3c   :  { %v3438_v34 = vadd.f32 %v3523_v37, %v3437_v0  ;;  %v3575_v12 = vpop.f32.mrb[33].mxu0 }
 0xb3e   :  { %3441 = vst [vmem:[#allocation11] sm:$0xff] %v3438_v34 }
 0xb3f   :  { %5583 = shalt.err (!%p5580_p8)
}
 0xb40   :  { %s5584_s18 = scalar_lea.hbm %s6954_s8, 128 }
 0xb41   :  { %p5585_p9 = scmp.ne.s32.totalorder %s6954_s8, %s5584_s18  ;;  %p5588_p10 = scmp.lt.u32.totalorder %s5584_s18, %s6954_s8 }
 0xb43   :  { %p5590_p11 = pnand %p5588_p10, %p5585_p9 }
 0xb45   :  { %5593 = shalt.err (!%p5590_p11)
}
 0xb46   :  { %3451 = dma.vmem_to_hbm [thread:$0]  %s3449_s2, 128, %s6954_s8, [#allocation5]  }
 0xb47   :  { %5600 = dma.done.wait [#allocation5], 128  }
 0xb48   :  { %5601 = vsyncadd [#allocation5], 4294967168 }
 0xb49   :  { %3455 = vsyncpa [#allocation4], 1 }
 0xb4a   :  { %3456 = vsyncpa [#allocation7], 1 }
 0xb4b   :  { %3457 = vsyncpa [#allocation10], 1 }
 0xb4c   :  { %3458 = vsyncpa [#allocation5], 1 }

</bundles_post_ra>
